<compile_context>
chip_gen: v7x
topology: tpu7x:2x2x1
jax: 0.10.0
libtpu: 0.0.40
codegen_flags: <defaults>
</compile_context>

<pallas_src>
import functools

import jax
import jax.numpy as jnp
from jax.experimental import pallas as pl
from jax.experimental.pallas import tpu as pltpu

_STRIDES = (2, 1, 1, 1)      # conv strides of the PyTorch module
_NCH = 32                    # every conv layer has 32 output channels
_EPS = 1e-5                  # PyTorch LayerNorm default eps


def _conv_out(n, k=3, s=1):
    return (n - k) // s + 1


# ------------------------------- fused kernel --------------------------------

def _encoder_kernel(x_ref,                                   # (1,4,H2,Cpad,W2)
                    w0_ref, b0_ref, w1_ref, b1_ref,
                    w2_ref, b2_ref, w3_ref, b3_ref,          # (32, 9*Cin), (32, 1)
                    wt_ref, bt_ref, g_ref, be_ref,           # (32,H4*W4,F), (1,F)x3
                    o_ref,                                   # (1, 1, F)
                    *, conv_hw, eps):
    """Whole encoder for ONE batch element; every activation stays in VMEM."""
    Ho0, Wo0 = conv_hw[0]

    # ---- layer 0: 3x3 / stride-2 conv read from the phase-split input -------
    # rows[r] holds spatial row r of the activation in channels-first (32, W)
    # layout; it never leaves VMEM.
    w0 = w0_ref[...]
    b0 = b0_ref[...]
    rows = []
    for io in range(Ho0):
        pieces = []
        for ki in range(3):
            for kj in range(3):
                p = (ki % 2) * 2 + (kj % 2)        # phase id = (row, col) parity
                r = io + ki // 2                   # row inside that phase image
                c0 = kj // 2                       # first column inside it
                pieces.append(x_ref[0, p, r, :, c0:c0 + Wo0])   # (Cpad, Wo0)
        pat = jnp.concatenate(pieces, axis=0).astype(w0.dtype)  # (9*Cpad, Wo0)
        y = jnp.dot(w0, pat, preferred_element_type=jnp.float32) + b0
        rows.append(jnp.maximum(y, 0.0))                        # (32, Wo0) f32

    # ---- layers 1..3: 3x3 / stride-1 convs on VMEM-resident rows -------------
    for li, (wr, br) in enumerate(((w1_ref, b1_ref),
                                   (w2_ref, b2_ref),
                                   (w3_ref, b3_ref)), start=1):
        Ho, Wo = conv_hw[li]
        w = wr[...]
        b = br[...]
        new_rows = []
        for io in range(Ho):
            pieces = [rows[io + ki][:, kj:kj + Wo]
                      for ki in range(3) for kj in range(3)]       # 9 x (32, Wo)
            pat = jnp.concatenate(pieces, axis=0).astype(w.dtype)  # (288, Wo)
            y = jnp.dot(w, pat, preferred_element_type=jnp.float32) + b
            new_rows.append(jnp.maximum(y, 0.0))                   # (32, Wo) f32
        rows = new_rows

    # ---- trunk: Linear (NCHW-flatten order) + LayerNorm + Tanh ---------------
    # h[c, i*W + j] = activation(channel c, row i, col j); the NCHW flatten is
    # absorbed by wt = w_fc.reshape(32, H*W, F) in the wrapper, so no transpose
    # or reshape of the activation is needed.
    h = jnp.concatenate(rows, axis=1)                      # (32, H4*W4)
    acc = bt_ref[...]                                      # (1, F) f32
    for c in range(_NCH):
        hc = h[c:c + 1, :].astype(wt_ref.dtype)
        acc = acc + jnp.dot(hc, wt_ref[c], preferred_element_type=jnp.float32)
    mu = jnp.mean(acc, axis=-1, keepdims=True)
    var = jnp.mean((acc - mu) ** 2, axis=-1, keepdims=True)  # biased (PyTorch LN)
    yn = (acc - mu) * jax.lax.rsqrt(var + eps)
    o_ref[0] = jnp.tanh(yn * g_ref[...] + be_ref[...]).astype(o_ref.dtype)


# ----------------------------- params / wrapper -------------------------------

def init_params(key, obs_shape, feature_dim):
    """Synthetic parameters with the same shapes as the PyTorch module."""
    # TODO(synk): utils.weight_init uses orthogonal init; scaled-normal used here
    # (init-time only, forward math/structure identical).
    C, H, W = obs_shape
    keys = jax.random.split(key, 6)
    convs = []
    cin, hh, ww = C, H, W
    for i in range(4):
        fan_in = 3 * 3 * cin
        wk = jax.random.normal(keys[i], (3, 3, cin, _NCH), jnp.float32) / jnp.sqrt(fan_in)
        bk = jnp.zeros((_NCH,), jnp.float32)
        convs.append((wk, bk))
        hh, ww = _conv_out(hh, 3, _STRIDES[i]), _conv_out(ww, 3, _STRIDES[i])
        cin = _NCH
    repr_dim = _NCH * hh * ww
    w_fc = jax.random.normal(keys[4], (repr_dim, feature_dim), jnp.float32) / jnp.sqrt(repr_dim)
    return {"convs": convs, "strides": _STRIDES, "w_fc": w_fc,
            "b_fc": jnp.zeros((feature_dim,), jnp.float32),
            "gamma": jnp.ones((feature_dim,), jnp.float32),
            "beta": jnp.zeros((feature_dim,), jnp.float32)}


def prepare_params(params, use_bf16_matmul=False):
    """Kernel-layout weights: fold `obs/255 - 0.5` into conv0 (exact), pad its
    input channels to 8 sublanes, reshape convs to (32, 9*Cin) and w_fc to
    (32, H*W, F) (absorbs the NCHW flatten).  Arrays only -> jit friendly."""
    mm_dtype = jnp.bfloat16 if use_bf16_matmul else jnp.float32
    conv_w, conv_b = [], []
    for li, (wk, bk) in enumerate(params["convs"]):
        if li == 0:
            bk = bk - 0.5 * jnp.sum(wk, axis=(0, 1, 2))      # fold the "- 0.5"
            wk = wk / 255.0                                   # fold the "/ 255"
            cin = wk.shape[2]
            c_pad = ((cin + 7) // 8) * 8
            wk = jnp.pad(wk, ((0, 0), (0, 0), (0, c_pad - cin), (0, 0)))
        cin = wk.shape[2]
        conv_w.append(wk.reshape(9 * cin, _NCH).T.astype(mm_dtype))   # (32, 9*Cin)
        conv_b.append(bk.reshape(_NCH, 1).astype(jnp.float32))
    F = params["w_fc"].shape[-1]
    return {"conv_w": conv_w, "conv_b": conv_b,
            "wt": params["w_fc"].reshape(_NCH, -1, F).astype(mm_dtype),
            "bt": params["b_fc"].reshape(1, F).astype(jnp.float32),
            "gamma": params["gamma"].reshape(1, F).astype(jnp.float32),
            "beta": params["beta"].reshape(1, F).astype(jnp.float32)}


def _phase_split(obs, c_pad):
    """(B, C, H, W) -> (B, 4, ceil(H/2), c_pad, ceil(W/2)) space-to-depth.

    Same element count as the raw input (no im2col expansion); makes every
    stride-2 access inside the kernel a contiguous static slice."""
    B, C, H, W = obs.shape
    H2, W2 = (H + 1) // 2, (W + 1) // 2
    phases = []
    for pr in range(2):
        for pc in range(2):
            ph = obs[:, :, pr::2, pc::2]
            ph = jnp.pad(ph, ((0, 0), (0, 0),
                              (0, H2 - ph.shape[2]), (0, W2 - ph.shape[3])))
            phases.append(ph)
    x = jnp.stack(phases, axis=1)               # (B, 4, C, H2, W2)
    x = jnp.transpose(x, (0, 1, 3, 2, 4))       # (B, 4, H2, C, W2)
    return jnp.pad(x, ((0, 0), (0, 0), (0, 0), (0, c_pad - C), (0, 0)))


def encoder_forward(kparams, obs):
    """obs: (B, C, H, W) float32 in [0, 255]  ->  (B, feature_dim)."""
    B, C, H, W = obs.shape
    conv_hw = []
    hh, ww = H, W
    for s in _STRIDES:
        hh, ww = _conv_out(hh, 3, s), _conv_out(ww, 3, s)
        conv_hw.append((hh, ww))
    conv_hw = tuple(conv_hw)
    H2, W2 = (H + 1) // 2, (W + 1) // 2
    c_pad = kparams["conv_w"][0].shape[1] // 9
    F = kparams["wt"].shape[-1]
    assert kparams["wt"].shape[1] == conv_hw[-1][0] * conv_hw[-1][1]

    x = _phase_split(obs.astype(jnp.float32), c_pad)

    def const_spec(arr):                 # whole-array block, re-used every step
        n = arr.ndim
        return pl.BlockSpec(arr.shape, lambda b: (0,) * n)

    in_specs = [pl.BlockSpec((1, 4, H2, c_pad, W2), lambda b: (b, 0, 0, 0, 0))]
    operands = [x]
    for w_l, b_l in zip(kparams["conv_w"], kparams["conv_b"]):
        in_specs += [const_spec(w_l), const_spec(b_l)]
        operands += [w_l, b_l]
    for arr in (kparams["wt"], kparams["bt"], kparams["gamma"], kparams["beta"]):
        in_specs.append(const_spec(arr))
        operands.append(arr)

    kernel = functools.partial(_encoder_kernel, conv_hw=conv_hw, eps=_EPS)
    out = pl.pallas_call(
        kernel,
        out_shape=jax.ShapeDtypeStruct((B, 1, F), jnp.float32),
        grid=(B,),
        in_specs=in_specs,
        out_specs=pl.BlockSpec((1, 1, F), lambda b: (b, 0, 0)),
        compiler_params=pltpu.CompilerParams(
            dimension_semantics=("parallel",)),   # batch: pipelined + megacore
    )(*operands)
    return out.reshape(B, F)


# ------------------------------ pure-JAX reference ----------------------------

def encoder_reference(params, obs):
    """f32 / highest-precision reference of the PyTorch forward."""
    x = obs / 255.0 - 0.5
    for i, (wk, bk) in enumerate(params["convs"]):
        x = jax.lax.conv_general_dilated(
            x, jnp.transpose(wk, (3, 2, 0, 1)),
            window_strides=(params["strides"][i],) * 2, padding="VALID",
            dimension_numbers=("NCHW", "OIHW", "NCHW"),
            precision=jax.lax.Precision.HIGHEST)
        x = jnp.maximum(x + bk[None, :, None, None], 0.0)
    h = x.reshape(x.shape[0], -1)
    y = jnp.dot(h, params["w_fc"], precision=jax.lax.Precision.HIGHEST) + params["b_fc"]
    mu = jnp.mean(y, axis=-1, keepdims=True)
    var = jnp.mean((y - mu) ** 2, axis=-1, keepdims=True)
    yn = (y - mu) * jax.lax.rsqrt(var + _EPS)
    return jnp.tanh(yn * params["gamma"] + params["beta"])


# ------------------------------------ main ------------------------------------

if __name__ == "__main__":
    key = jax.random.PRNGKey(0)
    k_obs, k_par = jax.random.split(key)

    B, C, H, W = 2, 4, 20, 20          # conv chain: 20 -> 9 -> 7 -> 5 -> 3
    feature_dim = 32

    obs = jax.random.uniform(k_obs, (B, C, H, W), jnp.float32, 0.0, 255.0)
    params = init_params(k_par, (C, H, W), feature_dim)
    # use_bf16_matmul=True targets the v6e/v5e MXU (f32 accumulation kept);
    # default False keeps the forward exactly comparable to the f32 reference.
    kparams = prepare_params(params, use_bf16_matmul=False)

    fwd = jax.jit(encoder_forward)
    out = jax.block_until_ready(fwd(kparams, obs))

    assert out.shape == (B, feature_dim)
    assert bool(jnp.all(jnp.isfinite(out)))
    ref = encoder_reference(params, obs)
    max_err = float(jnp.max(jnp.abs(out - ref)))
    assert max_err < 5e-2, f"mismatch vs reference: {max_err}"
    print("KERNEL_OK")
</pallas_src>

<mosaic_0001>
module attributes {stable_mosaic.version = 11 : i64} {
  func.func @_encoder_kernel(%arg0: i32, %arg1: memref<1x4x10x8x10xf32, #tpu.memory_space<vmem>>, %arg2: memref<32x72xf32, #tpu.memory_space<vmem>>, %arg3: memref<32x1xf32, #tpu.memory_space<vmem>>, %arg4: memref<32x288xf32, #tpu.memory_space<vmem>>, %arg5: memref<32x1xf32, #tpu.memory_space<vmem>>, %arg6: memref<32x288xf32, #tpu.memory_space<vmem>>, %arg7: memref<32x1xf32, #tpu.memory_space<vmem>>, %arg8: memref<32x288xf32, #tpu.memory_space<vmem>>, %arg9: memref<32x1xf32, #tpu.memory_space<vmem>>, %arg10: memref<32x9x32xf32, #tpu.memory_space<vmem>>, %arg11: memref<1x32xf32, #tpu.memory_space<vmem>>, %arg12: memref<1x32xf32, #tpu.memory_space<vmem>>, %arg13: memref<1x32xf32, #tpu.memory_space<vmem>>, %arg14: memref<1x1x32xf32, #tpu.memory_space<vmem>>) attributes {dimension_semantics = [#tpu.dimension_semantics<parallel>], iteration_bounds = array<i64: 2>, scalar_prefetch = 0 : i64, scratch_operands = 0 : i64, tpu.core_type = #tpu.core_type<tc>, window_params = [{transform_indices = @transform_0, window_bounds = array<i64: 1, 4, 10, 8, 10>}, {pipeline_mode = #tpu.pipeline_mode<synchronous>, transform_indices = @transform_1, window_bounds = array<i64: 32, 72>}, {pipeline_mode = #tpu.pipeline_mode<synchronous>, transform_indices = @transform_2, window_bounds = array<i64: 32, 1>}, {pipeline_mode = #tpu.pipeline_mode<synchronous>, transform_indices = @transform_3, window_bounds = array<i64: 32, 288>}, {pipeline_mode = #tpu.pipeline_mode<synchronous>, transform_indices = @transform_4, window_bounds = array<i64: 32, 1>}, {pipeline_mode = #tpu.pipeline_mode<synchronous>, transform_indices = @transform_5, window_bounds = array<i64: 32, 288>}, {pipeline_mode = #tpu.pipeline_mode<synchronous>, transform_indices = @transform_6, window_bounds = array<i64: 32, 1>}, {pipeline_mode = #tpu.pipeline_mode<synchronous>, transform_indices = @transform_7, window_bounds = array<i64: 32, 288>}, {pipeline_mode = #tpu.pipeline_mode<synchronous>, transform_indices = @transform_8, window_bounds = array<i64: 32, 1>}, {pipeline_mode = #tpu.pipeline_mode<synchronous>, transform_indices = @transform_9, window_bounds = array<i64: 32, 9, 32>}, {pipeline_mode = #tpu.pipeline_mode<synchronous>, transform_indices = @transform_10, window_bounds = array<i64: 1, 32>}, {pipeline_mode = #tpu.pipeline_mode<synchronous>, transform_indices = @transform_11, window_bounds = array<i64: 1, 32>}, {pipeline_mode = #tpu.pipeline_mode<synchronous>, transform_indices = @transform_12, window_bounds = array<i64: 1, 32>}, {transform_indices = @transform_13, window_bounds = array<i64: 1, 1, 32>}]} {
    %c0 = arith.constant 0 : index
    %c0_0 = arith.constant 0 : index
    %0 = vector.load %arg2[%c0, %c0_0] : memref<32x72xf32, #tpu.memory_space<vmem>>, vector<32x72xf32>
    %c0_1 = arith.constant 0 : index
    %c0_2 = arith.constant 0 : index
    %1 = vector.load %arg3[%c0_1, %c0_2] : memref<32x1xf32, #tpu.memory_space<vmem>>, vector<32x1xf32>
    %c0_3 = arith.constant 0 : index
    %c0_4 = arith.constant 0 : index
    %c0_5 = arith.constant 0 : index
    %c0_6 = arith.constant 0 : index
    %c0_7 = arith.constant 0 : index
    %2 = vector.load %arg1[%c0_3, %c0_4, %c0_5, %c0_6, %c0_7] : memref<1x4x10x8x10xf32, #tpu.memory_space<vmem>>, vector<1x1x1x8x9xf32>
    %3 = vector.shape_cast %2 : vector<1x1x1x8x9xf32> to vector<8x9xf32>
    %c0_8 = arith.constant 0 : index
    %c1 = arith.constant 1 : index
    %c0_9 = arith.constant 0 : index
    %c0_10 = arith.constant 0 : index
    %c0_11 = arith.constant 0 : index
    %4 = vector.load %arg1[%c0_8, %c1, %c0_9, %c0_10, %c0_11] : memref<1x4x10x8x10xf32, #tpu.memory_space<vmem>>, vector<1x1x1x8x9xf32>
    %5 = vector.shape_cast %4 : vector<1x1x1x8x9xf32> to vector<8x9xf32>
    %c0_12 = arith.constant 0 : index
    %c0_13 = arith.constant 0 : index
    %c0_14 = arith.constant 0 : index
    %c0_15 = arith.constant 0 : index
    %c1_16 = arith.constant 1 : index
    %6 = vector.load %arg1[%c0_12, %c0_13, %c0_14, %c0_15, %c1_16] : memref<1x4x10x8x10xf32, #tpu.memory_space<vmem>>, vector<1x1x1x8x9xf32>
    %7 = vector.shape_cast %6 : vector<1x1x1x8x9xf32> to vector<8x9xf32>
    %c0_17 = arith.constant 0 : index
    %c2 = arith.constant 2 : index
    %c0_18 = arith.constant 0 : index
    %c0_19 = arith.constant 0 : index
    %c0_20 = arith.constant 0 : index
    %8 = vector.load %arg1[%c0_17, %c2, %c0_18, %c0_19, %c0_20] : memref<1x4x10x8x10xf32, #tpu.memory_space<vmem>>, vector<1x1x1x8x9xf32>
    %9 = vector.shape_cast %8 : vector<1x1x1x8x9xf32> to vector<8x9xf32>
    %c0_21 = arith.constant 0 : index
    %c3 = arith.constant 3 : index
    %c0_22 = arith.constant 0 : index
    %c0_23 = arith.constant 0 : index
    %c0_24 = arith.constant 0 : index
    %10 = vector.load %arg1[%c0_21, %c3, %c0_22, %c0_23, %c0_24] : memref<1x4x10x8x10xf32, #tpu.memory_space<vmem>>, vector<1x1x1x8x9xf32>
    %11 = vector.shape_cast %10 : vector<1x1x1x8x9xf32> to vector<8x9xf32>
    %c0_25 = arith.constant 0 : index
    %c2_26 = arith.constant 2 : index
    %c0_27 = arith.constant 0 : index
    %c0_28 = arith.constant 0 : index
    %c1_29 = arith.constant 1 : index
    %12 = vector.load %arg1[%c0_25, %c2_26, %c0_27, %c0_28, %c1_29] : memref<1x4x10x8x10xf32, #tpu.memory_space<vmem>>, vector<1x1x1x8x9xf32>
    %13 = vector.shape_cast %12 : vector<1x1x1x8x9xf32> to vector<8x9xf32>
    %c0_30 = arith.constant 0 : index
    %c0_31 = arith.constant 0 : index
    %c1_32 = arith.constant 1 : index
    %c0_33 = arith.constant 0 : index
    %c0_34 = arith.constant 0 : index
    %14 = vector.load %arg1[%c0_30, %c0_31, %c1_32, %c0_33, %c0_34] : memref<1x4x10x8x10xf32, #tpu.memory_space<vmem>>, vector<1x1x1x8x9xf32>
    %15 = vector.shape_cast %14 : vector<1x1x1x8x9xf32> to vector<8x9xf32>
    %c0_35 = arith.constant 0 : index
    %c1_36 = arith.constant 1 : index
    %c1_37 = arith.constant 1 : index
    %c0_38 = arith.constant 0 : index
    %c0_39 = arith.constant 0 : index
    %16 = vector.load %arg1[%c0_35, %c1_36, %c1_37, %c0_38, %c0_39] : memref<1x4x10x8x10xf32, #tpu.memory_space<vmem>>, vector<1x1x1x8x9xf32>
    %17 = vector.shape_cast %16 : vector<1x1x1x8x9xf32> to vector<8x9xf32>
    %c0_40 = arith.constant 0 : index
    %c0_41 = arith.constant 0 : index
    %c1_42 = arith.constant 1 : index
    %c0_43 = arith.constant 0 : index
    %c1_44 = arith.constant 1 : index
    %18 = vector.load %arg1[%c0_40, %c0_41, %c1_42, %c0_43, %c1_44] : memref<1x4x10x8x10xf32, #tpu.memory_space<vmem>>, vector<1x1x1x8x9xf32>
    %19 = vector.shape_cast %18 : vector<1x1x1x8x9xf32> to vector<8x9xf32>
    %20 = tpu.concatenate %3, %5, %7, %9, %11, %13, %15, %17, %19 in 0 : vector<8x9xf32>, vector<8x9xf32>, vector<8x9xf32>, vector<8x9xf32>, vector<8x9xf32>, vector<8x9xf32>, vector<8x9xf32>, vector<8x9xf32>, vector<8x9xf32> -> vector<72x9xf32>
    %cst = arith.constant dense<0.000000e+00> : vector<32x9xf32>
    %21 = tpu.matmul %0, %20, %cst {dimension_numbers = #tpu.dot_dimension_numbers<[1], [0], [0], [1], [0, 0, 1, 1], [], []>} : vector<32x72xf32>, vector<72x9xf32>, vector<32x9xf32> -> vector<32x9xf32>
    %22 = vector.broadcast %1 : vector<32x1xf32> to vector<32x9xf32>
    %23 = arith.addf %21, %22 : vector<32x9xf32>
    %cst_45 = arith.constant 0.000000e+00 : f32
    %24 = vector.broadcast %cst_45 : f32 to vector<32x9xf32>
    %25 = arith.maximumf %23, %24 : vector<32x9xf32>
    %c0_46 = arith.constant 0 : index
    %c0_47 = arith.constant 0 : index
    %c1_48 = arith.constant 1 : index
    %c0_49 = arith.constant 0 : index
    %c0_50 = arith.constant 0 : index
    %26 = vector.load %arg1[%c0_46, %c0_47, %c1_48, %c0_49, %c0_50] : memref<1x4x10x8x10xf32, #tpu.memory_space<vmem>>, vector<1x1x1x8x9xf32>
    %27 = vector.shape_cast %26 : vector<1x1x1x8x9xf32> to vector<8x9xf32>
    %c0_51 = arith.constant 0 : index
    %c1_52 = arith.constant 1 : index
    %c1_53 = arith.constant 1 : index
    %c0_54 = arith.constant 0 : index
    %c0_55 = arith.constant 0 : index
    %28 = vector.load %arg1[%c0_51, %c1_52, %c1_53, %c0_54, %c0_55] : memref<1x4x10x8x10xf32, #tpu.memory_space<vmem>>, vector<1x1x1x8x9xf32>
    %29 = vector.shape_cast %28 : vector<1x1x1x8x9xf32> to vector<8x9xf32>
    %c0_56 = arith.constant 0 : index
    %c0_57 = arith.constant 0 : index
    %c1_58 = arith.constant 1 : index
    %c0_59 = arith.constant 0 : index
    %c1_60 = arith.constant 1 : index
    %30 = vector.load %arg1[%c0_56, %c0_57, %c1_58, %c0_59, %c1_60] : memref<1x4x10x8x10xf32, #tpu.memory_space<vmem>>, vector<1x1x1x8x9xf32>
    %31 = vector.shape_cast %30 : vector<1x1x1x8x9xf32> to vector<8x9xf32>
    %c0_61 = arith.constant 0 : index
    %c2_62 = arith.constant 2 : index
    %c1_63 = arith.constant 1 : index
    %c0_64 = arith.constant 0 : index
    %c0_65 = arith.constant 0 : index
    %32 = vector.load %arg1[%c0_61, %c2_62, %c1_63, %c0_64, %c0_65] : memref<1x4x10x8x10xf32, #tpu.memory_space<vmem>>, vector<1x1x1x8x9xf32>
    %33 = vector.shape_cast %32 : vector<1x1x1x8x9xf32> to vector<8x9xf32>
    %c0_66 = arith.constant 0 : index
    %c3_67 = arith.constant 3 : index
    %c1_68 = arith.constant 1 : index
    %c0_69 = arith.constant 0 : index
    %c0_70 = arith.constant 0 : index
    %34 = vector.load %arg1[%c0_66, %c3_67, %c1_68, %c0_69, %c0_70] : memref<1x4x10x8x10xf32, #tpu.memory_space<vmem>>, vector<1x1x1x8x9xf32>
    %35 = vector.shape_cast %34 : vector<1x1x1x8x9xf32> to vector<8x9xf32>
    %c0_71 = arith.constant 0 : index
    %c2_72 = arith.constant 2 : index
    %c1_73 = arith.constant 1 : index
    %c0_74 = arith.constant 0 : index
    %c1_75 = arith.constant 1 : index
    %36 = vector.load %arg1[%c0_71, %c2_72, %c1_73, %c0_74, %c1_75] : memref<1x4x10x8x10xf32, #tpu.memory_space<vmem>>, vector<1x1x1x8x9xf32>
    %37 = vector.shape_cast %36 : vector<1x1x1x8x9xf32> to vector<8x9xf32>
    %c0_76 = arith.constant 0 : index
    %c0_77 = arith.constant 0 : index
    %c2_78 = arith.constant 2 : index
    %c0_79 = arith.constant 0 : index
    %c0_80 = arith.constant 0 : index
    %38 = vector.load %arg1[%c0_76, %c0_77, %c2_78, %c0_79, %c0_80] : memref<1x4x10x8x10xf32, #tpu.memory_space<vmem>>, vector<1x1x1x8x9xf32>
    %39 = vector.shape_cast %38 : vector<1x1x1x8x9xf32> to vector<8x9xf32>
    %c0_81 = arith.constant 0 : index
    %c1_82 = arith.constant 1 : index
    %c2_83 = arith.constant 2 : index
    %c0_84 = arith.constant 0 : index
    %c0_85 = arith.constant 0 : index
    %40 = vector.load %arg1[%c0_81, %c1_82, %c2_83, %c0_84, %c0_85] : memref<1x4x10x8x10xf32, #tpu.memory_space<vmem>>, vector<1x1x1x8x9xf32>
    %41 = vector.shape_cast %40 : vector<1x1x1x8x9xf32> to vector<8x9xf32>
    %c0_86 = arith.constant 0 : index
    %c0_87 = arith.constant 0 : index
    %c2_88 = arith.constant 2 : index
    %c0_89 = arith.constant 0 : index
    %c1_90 = arith.constant 1 : index
    %42 = vector.load %arg1[%c0_86, %c0_87, %c2_88, %c0_89, %c1_90] : memref<1x4x10x8x10xf32, #tpu.memory_space<vmem>>, vector<1x1x1x8x9xf32>
    %43 = vector.shape_cast %42 : vector<1x1x1x8x9xf32> to vector<8x9xf32>
    %44 = tpu.concatenate %27, %29, %31, %33, %35, %37, %39, %41, %43 in 0 : vector<8x9xf32>, vector<8x9xf32>, vector<8x9xf32>, vector<8x9xf32>, vector<8x9xf32>, vector<8x9xf32>, vector<8x9xf32>, vector<8x9xf32>, vector<8x9xf32> -> vector<72x9xf32>
    %cst_91 = arith.constant dense<0.000000e+00> : vector<32x9xf32>
    %45 = tpu.matmul %0, %44, %cst_91 {dimension_numbers = #tpu.dot_dimension_numbers<[1], [0], [0], [1], [0, 0, 1, 1], [], []>} : vector<32x72xf32>, vector<72x9xf32>, vector<32x9xf32> -> vector<32x9xf32>
    %46 = vector.broadcast %1 : vector<32x1xf32> to vector<32x9xf32>
    %47 = arith.addf %45, %46 : vector<32x9xf32>
    %cst_92 = arith.constant 0.000000e+00 : f32
    %48 = vector.broadcast %cst_92 : f32 to vector<32x9xf32>
    %49 = arith.maximumf %47, %48 : vector<32x9xf32>
    %c0_93 = arith.constant 0 : index
    %c0_94 = arith.constant 0 : index
    %c2_95 = arith.constant 2 : index
    %c0_96 = arith.constant 0 : index
    %c0_97 = arith.constant 0 : index
    %50 = vector.load %arg1[%c0_93, %c0_94, %c2_95, %c0_96, %c0_97] : memref<1x4x10x8x10xf32, #tpu.memory_space<vmem>>, vector<1x1x1x8x9xf32>
    %51 = vector.shape_cast %50 : vector<1x1x1x8x9xf32> to vector<8x9xf32>
    %c0_98 = arith.constant 0 : index
    %c1_99 = arith.constant 1 : index
    %c2_100 = arith.constant 2 : index
    %c0_101 = arith.constant 0 : index
    %c0_102 = arith.constant 0 : index
    %52 = vector.load %arg1[%c0_98, %c1_99, %c2_100, %c0_101, %c0_102] : memref<1x4x10x8x10xf32, #tpu.memory_space<vmem>>, vector<1x1x1x8x9xf32>
    %53 = vector.shape_cast %52 : vector<1x1x1x8x9xf32> to vector<8x9xf32>
    %c0_103 = arith.constant 0 : index
    %c0_104 = arith.constant 0 : index
    %c2_105 = arith.constant 2 : index
    %c0_106 = arith.constant 0 : index
    %c1_107 = arith.constant 1 : index
    %54 = vector.load %arg1[%c0_103, %c0_104, %c2_105, %c0_106, %c1_107] : memref<1x4x10x8x10xf32, #tpu.memory_space<vmem>>, vector<1x1x1x8x9xf32>
    %55 = vector.shape_cast %54 : vector<1x1x1x8x9xf32> to vector<8x9xf32>
    %c0_108 = arith.constant 0 : index
    %c2_109 = arith.constant 2 : index
    %c2_110 = arith.constant 2 : index
    %c0_111 = arith.constant 0 : index
    %c0_112 = arith.constant 0 : index
    %56 = vector.load %arg1[%c0_108, %c2_109, %c2_110, %c0_111, %c0_112] : memref<1x4x10x8x10xf32, #tpu.memory_space<vmem>>, vector<1x1x1x8x9xf32>
    %57 = vector.shape_cast %56 : vector<1x1x1x8x9xf32> to vector<8x9xf32>
    %c0_113 = arith.constant 0 : index
    %c3_114 = arith.constant 3 : index
    %c2_115 = arith.constant 2 : index
    %c0_116 = arith.constant 0 : index
    %c0_117 = arith.constant 0 : index
    %58 = vector.load %arg1[%c0_113, %c3_114, %c2_115, %c0_116, %c0_117] : memref<1x4x10x8x10xf32, #tpu.memory_space<vmem>>, vector<1x1x1x8x9xf32>
    %59 = vector.shape_cast %58 : vector<1x1x1x8x9xf32> to vector<8x9xf32>
    %c0_118 = arith.constant 0 : index
    %c2_119 = arith.constant 2 : index
    %c2_120 = arith.constant 2 : index
    %c0_121 = arith.constant 0 : index
    %c1_122 = arith.constant 1 : index
    %60 = vector.load %arg1[%c0_118, %c2_119, %c2_120, %c0_121, %c1_122] : memref<1x4x10x8x10xf32, #tpu.memory_space<vmem>>, vector<1x1x1x8x9xf32>
    %61 = vector.shape_cast %60 : vector<1x1x1x8x9xf32> to vector<8x9xf32>
    %c0_123 = arith.constant 0 : index
    %c0_124 = arith.constant 0 : index
    %c3_125 = arith.constant 3 : index
    %c0_126 = arith.constant 0 : index
    %c0_127 = arith.constant 0 : index
    %62 = vector.load %arg1[%c0_123, %c0_124, %c3_125, %c0_126, %c0_127] : memref<1x4x10x8x10xf32, #tpu.memory_space<vmem>>, vector<1x1x1x8x9xf32>
    %63 = vector.shape_cast %62 : vector<1x1x1x8x9xf32> to vector<8x9xf32>
    %c0_128 = arith.constant 0 : index
    %c1_129 = arith.constant 1 : index
    %c3_130 = arith.constant 3 : index
    %c0_131 = arith.constant 0 : index
    %c0_132 = arith.constant 0 : index
    %64 = vector.load %arg1[%c0_128, %c1_129, %c3_130, %c0_131, %c0_132] : memref<1x4x10x8x10xf32, #tpu.memory_space<vmem>>, vector<1x1x1x8x9xf32>
    %65 = vector.shape_cast %64 : vector<1x1x1x8x9xf32> to vector<8x9xf32>
    %c0_133 = arith.constant 0 : index
    %c0_134 = arith.constant 0 : index
    %c3_135 = arith.constant 3 : index
    %c0_136 = arith.constant 0 : index
    %c1_137 = arith.constant 1 : index
    %66 = vector.load %arg1[%c0_133, %c0_134, %c3_135, %c0_136, %c1_137] : memref<1x4x10x8x10xf32, #tpu.memory_space<vmem>>, vector<1x1x1x8x9xf32>
    %67 = vector.shape_cast %66 : vector<1x1x1x8x9xf32> to vector<8x9xf32>
    %68 = tpu.concatenate %51, %53, %55, %57, %59, %61, %63, %65, %67 in 0 : vector<8x9xf32>, vector<8x9xf32>, vector<8x9xf32>, vector<8x9xf32>, vector<8x9xf32>, vector<8x9xf32>, vector<8x9xf32>, vector<8x9xf32>, vector<8x9xf32> -> vector<72x9xf32>
    %cst_138 = arith.constant dense<0.000000e+00> : vector<32x9xf32>
    %69 = tpu.matmul %0, %68, %cst_138 {dimension_numbers = #tpu.dot_dimension_numbers<[1], [0], [0], [1], [0, 0, 1, 1], [], []>} : vector<32x72xf32>, vector<72x9xf32>, vector<32x9xf32> -> vector<32x9xf32>
    %70 = vector.broadcast %1 : vector<32x1xf32> to vector<32x9xf32>
    %71 = arith.addf %69, %70 : vector<32x9xf32>
    %cst_139 = arith.constant 0.000000e+00 : f32
    %72 = vector.broadcast %cst_139 : f32 to vector<32x9xf32>
    %73 = arith.maximumf %71, %72 : vector<32x9xf32>
    %c0_140 = arith.constant 0 : index
    %c0_141 = arith.constant 0 : index
    %c3_142 = arith.constant 3 : index
    %c0_143 = arith.constant 0 : index
    %c0_144 = arith.constant 0 : index
    %74 = vector.load %arg1[%c0_140, %c0_141, %c3_142, %c0_143, %c0_144] : memref<1x4x10x8x10xf32, #tpu.memory_space<vmem>>, vector<1x1x1x8x9xf32>
    %75 = vector.shape_cast %74 : vector<1x1x1x8x9xf32> to vector<8x9xf32>
    %c0_145 = arith.constant 0 : index
    %c1_146 = arith.constant 1 : index
    %c3_147 = arith.constant 3 : index
    %c0_148 = arith.constant 0 : index
    %c0_149 = arith.constant 0 : index
    %76 = vector.load %arg1[%c0_145, %c1_146, %c3_147, %c0_148, %c0_149] : memref<1x4x10x8x10xf32, #tpu.memory_space<vmem>>, vector<1x1x1x8x9xf32>
    %77 = vector.shape_cast %76 : vector<1x1x1x8x9xf32> to vector<8x9xf32>
    %c0_150 = arith.constant 0 : index
    %c0_151 = arith.constant 0 : index
    %c3_152 = arith.constant 3 : index
    %c0_153 = arith.constant 0 : index
    %c1_154 = arith.constant 1 : index
    %78 = vector.load %arg1[%c0_150, %c0_151, %c3_152, %c0_153, %c1_154] : memref<1x4x10x8x10xf32, #tpu.memory_space<vmem>>, vector<1x1x1x8x9xf32>
    %79 = vector.shape_cast %78 : vector<1x1x1x8x9xf32> to vector<8x9xf32>
    %c0_155 = arith.constant 0 : index
    %c2_156 = arith.constant 2 : index
    %c3_157 = arith.constant 3 : index
    %c0_158 = arith.constant 0 : index
    %c0_159 = arith.constant 0 : index
    %80 = vector.load %arg1[%c0_155, %c2_156, %c3_157, %c0_158, %c0_159] : memref<1x4x10x8x10xf32, #tpu.memory_space<vmem>>, vector<1x1x1x8x9xf32>
    %81 = vector.shape_cast %80 : vector<1x1x1x8x9xf32> to vector<8x9xf32>
    %c0_160 = arith.constant 0 : index
    %c3_161 = arith.constant 3 : index
    %c3_162 = arith.constant 3 : index
    %c0_163 = arith.constant 0 : index
    %c0_164 = arith.constant 0 : index
    %82 = vector.load %arg1[%c0_160, %c3_161, %c3_162, %c0_163, %c0_164] : memref<1x4x10x8x10xf32, #tpu.memory_space<vmem>>, vector<1x1x1x8x9xf32>
    %83 = vector.shape_cast %82 : vector<1x1x1x8x9xf32> to vector<8x9xf32>
    %c0_165 = arith.constant 0 : index
    %c2_166 = arith.constant 2 : index
    %c3_167 = arith.constant 3 : index
    %c0_168 = arith.constant 0 : index
    %c1_169 = arith.constant 1 : index
    %84 = vector.load %arg1[%c0_165, %c2_166, %c3_167, %c0_168, %c1_169] : memref<1x4x10x8x10xf32, #tpu.memory_space<vmem>>, vector<1x1x1x8x9xf32>
    %85 = vector.shape_cast %84 : vector<1x1x1x8x9xf32> to vector<8x9xf32>
    %c0_170 = arith.constant 0 : index
    %c0_171 = arith.constant 0 : index
    %c4 = arith.constant 4 : index
    %c0_172 = arith.constant 0 : index
    %c0_173 = arith.constant 0 : index
    %86 = vector.load %arg1[%c0_170, %c0_171, %c4, %c0_172, %c0_173] : memref<1x4x10x8x10xf32, #tpu.memory_space<vmem>>, vector<1x1x1x8x9xf32>
    %87 = vector.shape_cast %86 : vector<1x1x1x8x9xf32> to vector<8x9xf32>
    %c0_174 = arith.constant 0 : index
    %c1_175 = arith.constant 1 : index
    %c4_176 = arith.constant 4 : index
    %c0_177 = arith.constant 0 : index
    %c0_178 = arith.constant 0 : index
    %88 = vector.load %arg1[%c0_174, %c1_175, %c4_176, %c0_177, %c0_178] : memref<1x4x10x8x10xf32, #tpu.memory_space<vmem>>, vector<1x1x1x8x9xf32>
    %89 = vector.shape_cast %88 : vector<1x1x1x8x9xf32> to vector<8x9xf32>
    %c0_179 = arith.constant 0 : index
    %c0_180 = arith.constant 0 : index
    %c4_181 = arith.constant 4 : index
    %c0_182 = arith.constant 0 : index
    %c1_183 = arith.constant 1 : index
    %90 = vector.load %arg1[%c0_179, %c0_180, %c4_181, %c0_182, %c1_183] : memref<1x4x10x8x10xf32, #tpu.memory_space<vmem>>, vector<1x1x1x8x9xf32>
    %91 = vector.shape_cast %90 : vector<1x1x1x8x9xf32> to vector<8x9xf32>
    %92 = tpu.concatenate %75, %77, %79, %81, %83, %85, %87, %89, %91 in 0 : vector<8x9xf32>, vector<8x9xf32>, vector<8x9xf32>, vector<8x9xf32>, vector<8x9xf32>, vector<8x9xf32>, vector<8x9xf32>, vector<8x9xf32>, vector<8x9xf32> -> vector<72x9xf32>
    %cst_184 = arith.constant dense<0.000000e+00> : vector<32x9xf32>
    %93 = tpu.matmul %0, %92, %cst_184 {dimension_numbers = #tpu.dot_dimension_numbers<[1], [0], [0], [1], [0, 0, 1, 1], [], []>} : vector<32x72xf32>, vector<72x9xf32>, vector<32x9xf32> -> vector<32x9xf32>
    %94 = vector.broadcast %1 : vector<32x1xf32> to vector<32x9xf32>
    %95 = arith.addf %93, %94 : vector<32x9xf32>
    %cst_185 = arith.constant 0.000000e+00 : f32
    %96 = vector.broadcast %cst_185 : f32 to vector<32x9xf32>
    %97 = arith.maximumf %95, %96 : vector<32x9xf32>
    %c0_186 = arith.constant 0 : index
    %c0_187 = arith.constant 0 : index
    %c4_188 = arith.constant 4 : index
    %c0_189 = arith.constant 0 : index
    %c0_190 = arith.constant 0 : index
    %98 = vector.load %arg1[%c0_186, %c0_187, %c4_188, %c0_189, %c0_190] : memref<1x4x10x8x10xf32, #tpu.memory_space<vmem>>, vector<1x1x1x8x9xf32>
    %99 = vector.shape_cast %98 : vector<1x1x1x8x9xf32> to vector<8x9xf32>
    %c0_191 = arith.constant 0 : index
    %c1_192 = arith.constant 1 : index
    %c4_193 = arith.constant 4 : index
    %c0_194 = arith.constant 0 : index
    %c0_195 = arith.constant 0 : index
    %100 = vector.load %arg1[%c0_191, %c1_192, %c4_193, %c0_194, %c0_195] : memref<1x4x10x8x10xf32, #tpu.memory_space<vmem>>, vector<1x1x1x8x9xf32>
    %101 = vector.shape_cast %100 : vector<1x1x1x8x9xf32> to vector<8x9xf32>
    %c0_196 = arith.constant 0 : index
    %c0_197 = arith.constant 0 : index
    %c4_198 = arith.constant 4 : index
    %c0_199 = arith.constant 0 : index
    %c1_200 = arith.constant 1 : index
    %102 = vector.load %arg1[%c0_196, %c0_197, %c4_198, %c0_199, %c1_200] : memref<1x4x10x8x10xf32, #tpu.memory_space<vmem>>, vector<1x1x1x8x9xf32>
    %103 = vector.shape_cast %102 : vector<1x1x1x8x9xf32> to vector<8x9xf32>
    %c0_201 = arith.constant 0 : index
    %c2_202 = arith.constant 2 : index
    %c4_203 = arith.constant 4 : index
    %c0_204 = arith.constant 0 : index
    %c0_205 = arith.constant 0 : index
    %104 = vector.load %arg1[%c0_201, %c2_202, %c4_203, %c0_204, %c0_205] : memref<1x4x10x8x10xf32, #tpu.memory_space<vmem>>, vector<1x1x1x8x9xf32>
    %105 = vector.shape_cast %104 : vector<1x1x1x8x9xf32> to vector<8x9xf32>
    %c0_206 = arith.constant 0 : index
    %c3_207 = arith.constant 3 : index
    %c4_208 = arith.constant 4 : index
    %c0_209 = arith.constant 0 : index
    %c0_210 = arith.constant 0 : index
    %106 = vector.load %arg1[%c0_206, %c3_207, %c4_208, %c0_209, %c0_210] : memref<1x4x10x8x10xf32, #tpu.memory_space<vmem>>, vector<1x1x1x8x9xf32>
    %107 = vector.shape_cast %106 : vector<1x1x1x8x9xf32> to vector<8x9xf32>
    %c0_211 = arith.constant 0 : index
    %c2_212 = arith.constant 2 : index
    %c4_213 = arith.constant 4 : index
    %c0_214 = arith.constant 0 : index
    %c1_215 = arith.constant 1 : index
    %108 = vector.load %arg1[%c0_211, %c2_212, %c4_213, %c0_214, %c1_215] : memref<1x4x10x8x10xf32, #tpu.memory_space<vmem>>, vector<1x1x1x8x9xf32>
    %109 = vector.shape_cast %108 : vector<1x1x1x8x9xf32> to vector<8x9xf32>
    %c0_216 = arith.constant 0 : index
    %c0_217 = arith.constant 0 : index
    %c5 = arith.constant 5 : index
    %c0_218 = arith.constant 0 : index
    %c0_219 = arith.constant 0 : index
    %110 = vector.load %arg1[%c0_216, %c0_217, %c5, %c0_218, %c0_219] : memref<1x4x10x8x10xf32, #tpu.memory_space<vmem>>, vector<1x1x1x8x9xf32>
    %111 = vector.shape_cast %110 : vector<1x1x1x8x9xf32> to vector<8x9xf32>
    %c0_220 = arith.constant 0 : index
    %c1_221 = arith.constant 1 : index
    %c5_222 = arith.constant 5 : index
    %c0_223 = arith.constant 0 : index
    %c0_224 = arith.constant 0 : index
    %112 = vector.load %arg1[%c0_220, %c1_221, %c5_222, %c0_223, %c0_224] : memref<1x4x10x8x10xf32, #tpu.memory_space<vmem>>, vector<1x1x1x8x9xf32>
    %113 = vector.shape_cast %112 : vector<1x1x1x8x9xf32> to vector<8x9xf32>
    %c0_225 = arith.constant 0 : index
    %c0_226 = arith.constant 0 : index
    %c5_227 = arith.constant 5 : index
    %c0_228 = arith.constant 0 : index
    %c1_229 = arith.constant 1 : index
    %114 = vector.load %arg1[%c0_225, %c0_226, %c5_227, %c0_228, %c1_229] : memref<1x4x10x8x10xf32, #tpu.memory_space<vmem>>, vector<1x1x1x8x9xf32>
    %115 = vector.shape_cast %114 : vector<1x1x1x8x9xf32> to vector<8x9xf32>
    %116 = tpu.concatenate %99, %101, %103, %105, %107, %109, %111, %113, %115 in 0 : vector<8x9xf32>, vector<8x9xf32>, vector<8x9xf32>, vector<8x9xf32>, vector<8x9xf32>, vector<8x9xf32>, vector<8x9xf32>, vector<8x9xf32>, vector<8x9xf32> -> vector<72x9xf32>
    %cst_230 = arith.constant dense<0.000000e+00> : vector<32x9xf32>
    %117 = tpu.matmul %0, %116, %cst_230 {dimension_numbers = #tpu.dot_dimension_numbers<[1], [0], [0], [1], [0, 0, 1, 1], [], []>} : vector<32x72xf32>, vector<72x9xf32>, vector<32x9xf32> -> vector<32x9xf32>
    %118 = vector.broadcast %1 : vector<32x1xf32> to vector<32x9xf32>
    %119 = arith.addf %117, %118 : vector<32x9xf32>
    %cst_231 = arith.constant 0.000000e+00 : f32
    %120 = vector.broadcast %cst_231 : f32 to vector<32x9xf32>
    %121 = arith.maximumf %119, %120 : vector<32x9xf32>
    %c0_232 = arith.constant 0 : index
    %c0_233 = arith.constant 0 : index
    %c5_234 = arith.constant 5 : index
    %c0_235 = arith.constant 0 : index
    %c0_236 = arith.constant 0 : index
    %122 = vector.load %arg1[%c0_232, %c0_233, %c5_234, %c0_235, %c0_236] : memref<1x4x10x8x10xf32, #tpu.memory_space<vmem>>, vector<1x1x1x8x9xf32>
    %123 = vector.shape_cast %122 : vector<1x1x1x8x9xf32> to vector<8x9xf32>
    %c0_237 = arith.constant 0 : index
    %c1_238 = arith.constant 1 : index
    %c5_239 = arith.constant 5 : index
    %c0_240 = arith.constant 0 : index
    %c0_241 = arith.constant 0 : index
    %124 = vector.load %arg1[%c0_237, %c1_238, %c5_239, %c0_240, %c0_241] : memref<1x4x10x8x10xf32, #tpu.memory_space<vmem>>, vector<1x1x1x8x9xf32>
    %125 = vector.shape_cast %124 : vector<1x1x1x8x9xf32> to vector<8x9xf32>
    %c0_242 = arith.constant 0 : index
    %c0_243 = arith.constant 0 : index
    %c5_244 = arith.constant 5 : index
    %c0_245 = arith.constant 0 : index
    %c1_246 = arith.constant 1 : index
    %126 = vector.load %arg1[%c0_242, %c0_243, %c5_244, %c0_245, %c1_246] : memref<1x4x10x8x10xf32, #tpu.memory_space<vmem>>, vector<1x1x1x8x9xf32>
    %127 = vector.shape_cast %126 : vector<1x1x1x8x9xf32> to vector<8x9xf32>
    %c0_247 = arith.constant 0 : index
    %c2_248 = arith.constant 2 : index
    %c5_249 = arith.constant 5 : index
    %c0_250 = arith.constant 0 : index
    %c0_251 = arith.constant 0 : index
    %128 = vector.load %arg1[%c0_247, %c2_248, %c5_249, %c0_250, %c0_251] : memref<1x4x10x8x10xf32, #tpu.memory_space<vmem>>, vector<1x1x1x8x9xf32>
    %129 = vector.shape_cast %128 : vector<1x1x1x8x9xf32> to vector<8x9xf32>
    %c0_252 = arith.constant 0 : index
    %c3_253 = arith.constant 3 : index
    %c5_254 = arith.constant 5 : index
    %c0_255 = arith.constant 0 : index
    %c0_256 = arith.constant 0 : index
    %130 = vector.load %arg1[%c0_252, %c3_253, %c5_254, %c0_255, %c0_256] : memref<1x4x10x8x10xf32, #tpu.memory_space<vmem>>, vector<1x1x1x8x9xf32>
    %131 = vector.shape_cast %130 : vector<1x1x1x8x9xf32> to vector<8x9xf32>
    %c0_257 = arith.constant 0 : index
    %c2_258 = arith.constant 2 : index
    %c5_259 = arith.constant 5 : index
    %c0_260 = arith.constant 0 : index
    %c1_261 = arith.constant 1 : index
    %132 = vector.load %arg1[%c0_257, %c2_258, %c5_259, %c0_260, %c1_261] : memref<1x4x10x8x10xf32, #tpu.memory_space<vmem>>, vector<1x1x1x8x9xf32>
    %133 = vector.shape_cast %132 : vector<1x1x1x8x9xf32> to vector<8x9xf32>
    %c0_262 = arith.constant 0 : index
    %c0_263 = arith.constant 0 : index
    %c6 = arith.constant 6 : index
    %c0_264 = arith.constant 0 : index
    %c0_265 = arith.constant 0 : index
    %134 = vector.load %arg1[%c0_262, %c0_263, %c6, %c0_264, %c0_265] : memref<1x4x10x8x10xf32, #tpu.memory_space<vmem>>, vector<1x1x1x8x9xf32>
    %135 = vector.shape_cast %134 : vector<1x1x1x8x9xf32> to vector<8x9xf32>
    %c0_266 = arith.constant 0 : index
    %c1_267 = arith.constant 1 : index
    %c6_268 = arith.constant 6 : index
    %c0_269 = arith.constant 0 : index
    %c0_270 = arith.constant 0 : index
    %136 = vector.load %arg1[%c0_266, %c1_267, %c6_268, %c0_269, %c0_270] : memref<1x4x10x8x10xf32, #tpu.memory_space<vmem>>, vector<1x1x1x8x9xf32>
    %137 = vector.shape_cast %136 : vector<1x1x1x8x9xf32> to vector<8x9xf32>
    %c0_271 = arith.constant 0 : index
    %c0_272 = arith.constant 0 : index
    %c6_273 = arith.constant 6 : index
    %c0_274 = arith.constant 0 : index
    %c1_275 = arith.constant 1 : index
    %138 = vector.load %arg1[%c0_271, %c0_272, %c6_273, %c0_274, %c1_275] : memref<1x4x10x8x10xf32, #tpu.memory_space<vmem>>, vector<1x1x1x8x9xf32>
    %139 = vector.shape_cast %138 : vector<1x1x1x8x9xf32> to vector<8x9xf32>
    %140 = tpu.concatenate %123, %125, %127, %129, %131, %133, %135, %137, %139 in 0 : vector<8x9xf32>, vector<8x9xf32>, vector<8x9xf32>, vector<8x9xf32>, vector<8x9xf32>, vector<8x9xf32>, vector<8x9xf32>, vector<8x9xf32>, vector<8x9xf32> -> vector<72x9xf32>
    %cst_276 = arith.constant dense<0.000000e+00> : vector<32x9xf32>
    %141 = tpu.matmul %0, %140, %cst_276 {dimension_numbers = #tpu.dot_dimension_numbers<[1], [0], [0], [1], [0, 0, 1, 1], [], []>} : vector<32x72xf32>, vector<72x9xf32>, vector<32x9xf32> -> vector<32x9xf32>
    %142 = vector.broadcast %1 : vector<32x1xf32> to vector<32x9xf32>
    %143 = arith.addf %141, %142 : vector<32x9xf32>
    %cst_277 = arith.constant 0.000000e+00 : f32
    %144 = vector.broadcast %cst_277 : f32 to vector<32x9xf32>
    %145 = arith.maximumf %143, %144 : vector<32x9xf32>
    %c0_278 = arith.constant 0 : index
    %c0_279 = arith.constant 0 : index
    %c6_280 = arith.constant 6 : index
    %c0_281 = arith.constant 0 : index
    %c0_282 = arith.constant 0 : index
    %146 = vector.load %arg1[%c0_278, %c0_279, %c6_280, %c0_281, %c0_282] : memref<1x4x10x8x10xf32, #tpu.memory_space<vmem>>, vector<1x1x1x8x9xf32>
    %147 = vector.shape_cast %146 : vector<1x1x1x8x9xf32> to vector<8x9xf32>
    %c0_283 = arith.constant 0 : index
    %c1_284 = arith.constant 1 : index
    %c6_285 = arith.constant 6 : index
    %c0_286 = arith.constant 0 : index
    %c0_287 = arith.constant 0 : index
    %148 = vector.load %arg1[%c0_283, %c1_284, %c6_285, %c0_286, %c0_287] : memref<1x4x10x8x10xf32, #tpu.memory_space<vmem>>, vector<1x1x1x8x9xf32>
    %149 = vector.shape_cast %148 : vector<1x1x1x8x9xf32> to vector<8x9xf32>
    %c0_288 = arith.constant 0 : index
    %c0_289 = arith.constant 0 : index
    %c6_290 = arith.constant 6 : index
    %c0_291 = arith.constant 0 : index
    %c1_292 = arith.constant 1 : index
    %150 = vector.load %arg1[%c0_288, %c0_289, %c6_290, %c0_291, %c1_292] : memref<1x4x10x8x10xf32, #tpu.memory_space<vmem>>, vector<1x1x1x8x9xf32>
    %151 = vector.shape_cast %150 : vector<1x1x1x8x9xf32> to vector<8x9xf32>
    %c0_293 = arith.constant 0 : index
    %c2_294 = arith.constant 2 : index
    %c6_295 = arith.constant 6 : index
    %c0_296 = arith.constant 0 : index
    %c0_297 = arith.constant 0 : index
    %152 = vector.load %arg1[%c0_293, %c2_294, %c6_295, %c0_296, %c0_297] : memref<1x4x10x8x10xf32, #tpu.memory_space<vmem>>, vector<1x1x1x8x9xf32>
    %153 = vector.shape_cast %152 : vector<1x1x1x8x9xf32> to vector<8x9xf32>
    %c0_298 = arith.constant 0 : index
    %c3_299 = arith.constant 3 : index
    %c6_300 = arith.constant 6 : index
    %c0_301 = arith.constant 0 : index
    %c0_302 = arith.constant 0 : index
    %154 = vector.load %arg1[%c0_298, %c3_299, %c6_300, %c0_301, %c0_302] : memref<1x4x10x8x10xf32, #tpu.memory_space<vmem>>, vector<1x1x1x8x9xf32>
    %155 = vector.shape_cast %154 : vector<1x1x1x8x9xf32> to vector<8x9xf32>
    %c0_303 = arith.constant 0 : index
    %c2_304 = arith.constant 2 : index
    %c6_305 = arith.constant 6 : index
    %c0_306 = arith.constant 0 : index
    %c1_307 = arith.constant 1 : index
    %156 = vector.load %arg1[%c0_303, %c2_304, %c6_305, %c0_306, %c1_307] : memref<1x4x10x8x10xf32, #tpu.memory_space<vmem>>, vector<1x1x1x8x9xf32>
    %157 = vector.shape_cast %156 : vector<1x1x1x8x9xf32> to vector<8x9xf32>
    %c0_308 = arith.constant 0 : index
    %c0_309 = arith.constant 0 : index
    %c7 = arith.constant 7 : index
    %c0_310 = arith.constant 0 : index
    %c0_311 = arith.constant 0 : index
    %158 = vector.load %arg1[%c0_308, %c0_309, %c7, %c0_310, %c0_311] : memref<1x4x10x8x10xf32, #tpu.memory_space<vmem>>, vector<1x1x1x8x9xf32>
    %159 = vector.shape_cast %158 : vector<1x1x1x8x9xf32> to vector<8x9xf32>
    %c0_312 = arith.constant 0 : index
    %c1_313 = arith.constant 1 : index
    %c7_314 = arith.constant 7 : index
    %c0_315 = arith.constant 0 : index
    %c0_316 = arith.constant 0 : index
    %160 = vector.load %arg1[%c0_312, %c1_313, %c7_314, %c0_315, %c0_316] : memref<1x4x10x8x10xf32, #tpu.memory_space<vmem>>, vector<1x1x1x8x9xf32>
    %161 = vector.shape_cast %160 : vector<1x1x1x8x9xf32> to vector<8x9xf32>
    %c0_317 = arith.constant 0 : index
    %c0_318 = arith.constant 0 : index
    %c7_319 = arith.constant 7 : index
    %c0_320 = arith.constant 0 : index
    %c1_321 = arith.constant 1 : index
    %162 = vector.load %arg1[%c0_317, %c0_318, %c7_319, %c0_320, %c1_321] : memref<1x4x10x8x10xf32, #tpu.memory_space<vmem>>, vector<1x1x1x8x9xf32>
    %163 = vector.shape_cast %162 : vector<1x1x1x8x9xf32> to vector<8x9xf32>
    %164 = tpu.concatenate %147, %149, %151, %153, %155, %157, %159, %161, %163 in 0 : vector<8x9xf32>, vector<8x9xf32>, vector<8x9xf32>, vector<8x9xf32>, vector<8x9xf32>, vector<8x9xf32>, vector<8x9xf32>, vector<8x9xf32>, vector<8x9xf32> -> vector<72x9xf32>
    %cst_322 = arith.constant dense<0.000000e+00> : vector<32x9xf32>
    %165 = tpu.matmul %0, %164, %cst_322 {dimension_numbers = #tpu.dot_dimension_numbers<[1], [0], [0], [1], [0, 0, 1, 1], [], []>} : vector<32x72xf32>, vector<72x9xf32>, vector<32x9xf32> -> vector<32x9xf32>
    %166 = vector.broadcast %1 : vector<32x1xf32> to vector<32x9xf32>
    %167 = arith.addf %165, %166 : vector<32x9xf32>
    %cst_323 = arith.constant 0.000000e+00 : f32
    %168 = vector.broadcast %cst_323 : f32 to vector<32x9xf32>
    %169 = arith.maximumf %167, %168 : vector<32x9xf32>
    %c0_324 = arith.constant 0 : index
    %c0_325 = arith.constant 0 : index
    %c7_326 = arith.constant 7 : index
    %c0_327 = arith.constant 0 : index
    %c0_328 = arith.constant 0 : index
    %170 = vector.load %arg1[%c0_324, %c0_325, %c7_326, %c0_327, %c0_328] : memref<1x4x10x8x10xf32, #tpu.memory_space<vmem>>, vector<1x1x1x8x9xf32>
    %171 = vector.shape_cast %170 : vector<1x1x1x8x9xf32> to vector<8x9xf32>
    %c0_329 = arith.constant 0 : index
    %c1_330 = arith.constant 1 : index
    %c7_331 = arith.constant 7 : index
    %c0_332 = arith.constant 0 : index
    %c0_333 = arith.constant 0 : index
    %172 = vector.load %arg1[%c0_329, %c1_330, %c7_331, %c0_332, %c0_333] : memref<1x4x10x8x10xf32, #tpu.memory_space<vmem>>, vector<1x1x1x8x9xf32>
    %173 = vector.shape_cast %172 : vector<1x1x1x8x9xf32> to vector<8x9xf32>
    %c0_334 = arith.constant 0 : index
    %c0_335 = arith.constant 0 : index
    %c7_336 = arith.constant 7 : index
    %c0_337 = arith.constant 0 : index
    %c1_338 = arith.constant 1 : index
    %174 = vector.load %arg1[%c0_334, %c0_335, %c7_336, %c0_337, %c1_338] : memref<1x4x10x8x10xf32, #tpu.memory_space<vmem>>, vector<1x1x1x8x9xf32>
    %175 = vector.shape_cast %174 : vector<1x1x1x8x9xf32> to vector<8x9xf32>
    %c0_339 = arith.constant 0 : index
    %c2_340 = arith.constant 2 : index
    %c7_341 = arith.constant 7 : index
    %c0_342 = arith.constant 0 : index
    %c0_343 = arith.constant 0 : index
    %176 = vector.load %arg1[%c0_339, %c2_340, %c7_341, %c0_342, %c0_343] : memref<1x4x10x8x10xf32, #tpu.memory_space<vmem>>, vector<1x1x1x8x9xf32>
    %177 = vector.shape_cast %176 : vector<1x1x1x8x9xf32> to vector<8x9xf32>
    %c0_344 = arith.constant 0 : index
    %c3_345 = arith.constant 3 : index
    %c7_346 = arith.constant 7 : index
    %c0_347 = arith.constant 0 : index
    %c0_348 = arith.constant 0 : index
    %178 = vector.load %arg1[%c0_344, %c3_345, %c7_346, %c0_347, %c0_348] : memref<1x4x10x8x10xf32, #tpu.memory_space<vmem>>, vector<1x1x1x8x9xf32>
    %179 = vector.shape_cast %178 : vector<1x1x1x8x9xf32> to vector<8x9xf32>
    %c0_349 = arith.constant 0 : index
    %c2_350 = arith.constant 2 : index
    %c7_351 = arith.constant 7 : index
    %c0_352 = arith.constant 0 : index
    %c1_353 = arith.constant 1 : index
    %180 = vector.load %arg1[%c0_349, %c2_350, %c7_351, %c0_352, %c1_353] : memref<1x4x10x8x10xf32, #tpu.memory_space<vmem>>, vector<1x1x1x8x9xf32>
    %181 = vector.shape_cast %180 : vector<1x1x1x8x9xf32> to vector<8x9xf32>
    %c0_354 = arith.constant 0 : index
    %c0_355 = arith.constant 0 : index
    %c8 = arith.constant 8 : index
    %c0_356 = arith.constant 0 : index
    %c0_357 = arith.constant 0 : index
    %182 = vector.load %arg1[%c0_354, %c0_355, %c8, %c0_356, %c0_357] : memref<1x4x10x8x10xf32, #tpu.memory_space<vmem>>, vector<1x1x1x8x9xf32>
    %183 = vector.shape_cast %182 : vector<1x1x1x8x9xf32> to vector<8x9xf32>
    %c0_358 = arith.constant 0 : index
    %c1_359 = arith.constant 1 : index
    %c8_360 = arith.constant 8 : index
    %c0_361 = arith.constant 0 : index
    %c0_362 = arith.constant 0 : index
    %184 = vector.load %arg1[%c0_358, %c1_359, %c8_360, %c0_361, %c0_362] : memref<1x4x10x8x10xf32, #tpu.memory_space<vmem>>, vector<1x1x1x8x9xf32>
    %185 = vector.shape_cast %184 : vector<1x1x1x8x9xf32> to vector<8x9xf32>
    %c0_363 = arith.constant 0 : index
    %c0_364 = arith.constant 0 : index
    %c8_365 = arith.constant 8 : index
    %c0_366 = arith.constant 0 : index
    %c1_367 = arith.constant 1 : index
    %186 = vector.load %arg1[%c0_363, %c0_364, %c8_365, %c0_366, %c1_367] : memref<1x4x10x8x10xf32, #tpu.memory_space<vmem>>, vector<1x1x1x8x9xf32>
    %187 = vector.shape_cast %186 : vector<1x1x1x8x9xf32> to vector<8x9xf32>
    %188 = tpu.concatenate %171, %173, %175, %177, %179, %181, %183, %185, %187 in 0 : vector<8x9xf32>, vector<8x9xf32>, vector<8x9xf32>, vector<8x9xf32>, vector<8x9xf32>, vector<8x9xf32>, vector<8x9xf32>, vector<8x9xf32>, vector<8x9xf32> -> vector<72x9xf32>
    %cst_368 = arith.constant dense<0.000000e+00> : vector<32x9xf32>
    %189 = tpu.matmul %0, %188, %cst_368 {dimension_numbers = #tpu.dot_dimension_numbers<[1], [0], [0], [1], [0, 0, 1, 1], [], []>} : vector<32x72xf32>, vector<72x9xf32>, vector<32x9xf32> -> vector<32x9xf32>
    %190 = vector.broadcast %1 : vector<32x1xf32> to vector<32x9xf32>
    %191 = arith.addf %189, %190 : vector<32x9xf32>
    %cst_369 = arith.constant 0.000000e+00 : f32
    %192 = vector.broadcast %cst_369 : f32 to vector<32x9xf32>
    %193 = arith.maximumf %191, %192 : vector<32x9xf32>
    %c0_370 = arith.constant 0 : index
    %c0_371 = arith.constant 0 : index
    %c8_372 = arith.constant 8 : index
    %c0_373 = arith.constant 0 : index
    %c0_374 = arith.constant 0 : index
    %194 = vector.load %arg1[%c0_370, %c0_371, %c8_372, %c0_373, %c0_374] : memref<1x4x10x8x10xf32, #tpu.memory_space<vmem>>, vector<1x1x1x8x9xf32>
    %195 = vector.shape_cast %194 : vector<1x1x1x8x9xf32> to vector<8x9xf32>
    %c0_375 = arith.constant 0 : index
    %c1_376 = arith.constant 1 : index
    %c8_377 = arith.constant 8 : index
    %c0_378 = arith.constant 0 : index
    %c0_379 = arith.constant 0 : index
    %196 = vector.load %arg1[%c0_375, %c1_376, %c8_377, %c0_378, %c0_379] : memref<1x4x10x8x10xf32, #tpu.memory_space<vmem>>, vector<1x1x1x8x9xf32>
    %197 = vector.shape_cast %196 : vector<1x1x1x8x9xf32> to vector<8x9xf32>
    %c0_380 = arith.constant 0 : index
    %c0_381 = arith.constant 0 : index
    %c8_382 = arith.constant 8 : index
    %c0_383 = arith.constant 0 : index
    %c1_384 = arith.constant 1 : index
    %198 = vector.load %arg1[%c0_380, %c0_381, %c8_382, %c0_383, %c1_384] : memref<1x4x10x8x10xf32, #tpu.memory_space<vmem>>, vector<1x1x1x8x9xf32>
    %199 = vector.shape_cast %198 : vector<1x1x1x8x9xf32> to vector<8x9xf32>
    %c0_385 = arith.constant 0 : index
    %c2_386 = arith.constant 2 : index
    %c8_387 = arith.constant 8 : index
    %c0_388 = arith.constant 0 : index
    %c0_389 = arith.constant 0 : index
    %200 = vector.load %arg1[%c0_385, %c2_386, %c8_387, %c0_388, %c0_389] : memref<1x4x10x8x10xf32, #tpu.memory_space<vmem>>, vector<1x1x1x8x9xf32>
    %201 = vector.shape_cast %200 : vector<1x1x1x8x9xf32> to vector<8x9xf32>
    %c0_390 = arith.constant 0 : index
    %c3_391 = arith.constant 3 : index
    %c8_392 = arith.constant 8 : index
    %c0_393 = arith.constant 0 : index
    %c0_394 = arith.constant 0 : index
    %202 = vector.load %arg1[%c0_390, %c3_391, %c8_392, %c0_393, %c0_394] : memref<1x4x10x8x10xf32, #tpu.memory_space<vmem>>, vector<1x1x1x8x9xf32>
    %203 = vector.shape_cast %202 : vector<1x1x1x8x9xf32> to vector<8x9xf32>
    %c0_395 = arith.constant 0 : index
    %c2_396 = arith.constant 2 : index
    %c8_397 = arith.constant 8 : index
    %c0_398 = arith.constant 0 : index
    %c1_399 = arith.constant 1 : index
    %204 = vector.load %arg1[%c0_395, %c2_396, %c8_397, %c0_398, %c1_399] : memref<1x4x10x8x10xf32, #tpu.memory_space<vmem>>, vector<1x1x1x8x9xf32>
    %205 = vector.shape_cast %204 : vector<1x1x1x8x9xf32> to vector<8x9xf32>
    %c0_400 = arith.constant 0 : index
    %c0_401 = arith.constant 0 : index
    %c9 = arith.constant 9 : index
    %c0_402 = arith.constant 0 : index
    %c0_403 = arith.constant 0 : index
    %206 = vector.load %arg1[%c0_400, %c0_401, %c9, %c0_402, %c0_403] : memref<1x4x10x8x10xf32, #tpu.memory_space<vmem>>, vector<1x1x1x8x9xf32>
    %207 = vector.shape_cast %206 : vector<1x1x1x8x9xf32> to vector<8x9xf32>
    %c0_404 = arith.constant 0 : index
    %c1_405 = arith.constant 1 : index
    %c9_406 = arith.constant 9 : index
    %c0_407 = arith.constant 0 : index
    %c0_408 = arith.constant 0 : index
    %208 = vector.load %arg1[%c0_404, %c1_405, %c9_406, %c0_407, %c0_408] : memref<1x4x10x8x10xf32, #tpu.memory_space<vmem>>, vector<1x1x1x8x9xf32>
    %209 = vector.shape_cast %208 : vector<1x1x1x8x9xf32> to vector<8x9xf32>
    %c0_409 = arith.constant 0 : index
    %c0_410 = arith.constant 0 : index
    %c9_411 = arith.constant 9 : index
    %c0_412 = arith.constant 0 : index
    %c1_413 = arith.constant 1 : index
    %210 = vector.load %arg1[%c0_409, %c0_410, %c9_411, %c0_412, %c1_413] : memref<1x4x10x8x10xf32, #tpu.memory_space<vmem>>, vector<1x1x1x8x9xf32>
    %211 = vector.shape_cast %210 : vector<1x1x1x8x9xf32> to vector<8x9xf32>
    %212 = tpu.concatenate %195, %197, %199, %201, %203, %205, %207, %209, %211 in 0 : vector<8x9xf32>, vector<8x9xf32>, vector<8x9xf32>, vector<8x9xf32>, vector<8x9xf32>, vector<8x9xf32>, vector<8x9xf32>, vector<8x9xf32>, vector<8x9xf32> -> vector<72x9xf32>
    %cst_414 = arith.constant dense<0.000000e+00> : vector<32x9xf32>
    %213 = tpu.matmul %0, %212, %cst_414 {dimension_numbers = #tpu.dot_dimension_numbers<[1], [0], [0], [1], [0, 0, 1, 1], [], []>} : vector<32x72xf32>, vector<72x9xf32>, vector<32x9xf32> -> vector<32x9xf32>
    %214 = vector.broadcast %1 : vector<32x1xf32> to vector<32x9xf32>
    %215 = arith.addf %213, %214 : vector<32x9xf32>
    %cst_415 = arith.constant 0.000000e+00 : f32
    %216 = vector.broadcast %cst_415 : f32 to vector<32x9xf32>
    %217 = arith.maximumf %215, %216 : vector<32x9xf32>
    %c0_416 = arith.constant 0 : index
    %c0_417 = arith.constant 0 : index
    %218 = vector.load %arg4[%c0_416, %c0_417] : memref<32x288xf32, #tpu.memory_space<vmem>>, vector<32x288xf32>
    %c0_418 = arith.constant 0 : index
    %c0_419 = arith.constant 0 : index
    %219 = vector.load %arg5[%c0_418, %c0_419] : memref<32x1xf32, #tpu.memory_space<vmem>>, vector<32x1xf32>
    %220 = vector.extract_strided_slice %25 {offsets = [0, 0], sizes = [32, 7], strides = [1, 1]} : vector<32x9xf32> to vector<32x7xf32>
    %221 = vector.extract_strided_slice %25 {offsets = [0, 1], sizes = [32, 7], strides = [1, 1]} : vector<32x9xf32> to vector<32x7xf32>
    %222 = vector.extract_strided_slice %25 {offsets = [0, 2], sizes = [32, 7], strides = [1, 1]} : vector<32x9xf32> to vector<32x7xf32>
    %223 = vector.extract_strided_slice %49 {offsets = [0, 0], sizes = [32, 7], strides = [1, 1]} : vector<32x9xf32> to vector<32x7xf32>
    %224 = vector.extract_strided_slice %49 {offsets = [0, 1], sizes = [32, 7], strides = [1, 1]} : vector<32x9xf32> to vector<32x7xf32>
    %225 = vector.extract_strided_slice %49 {offsets = [0, 2], sizes = [32, 7], strides = [1, 1]} : vector<32x9xf32> to vector<32x7xf32>
    %226 = vector.extract_strided_slice %73 {offsets = [0, 0], sizes = [32, 7], strides = [1, 1]} : vector<32x9xf32> to vector<32x7xf32>
    %227 = vector.extract_strided_slice %73 {offsets = [0, 1], sizes = [32, 7], strides = [1, 1]} : vector<32x9xf32> to vector<32x7xf32>
    %228 = vector.extract_strided_slice %73 {offsets = [0, 2], sizes = [32, 7], strides = [1, 1]} : vector<32x9xf32> to vector<32x7xf32>
    %229 = tpu.concatenate %220, %221, %222, %223, %224, %225, %226, %227, %228 in 0 : vector<32x7xf32>, vector<32x7xf32>, vector<32x7xf32>, vector<32x7xf32>, vector<32x7xf32>, vector<32x7xf32>, vector<32x7xf32>, vector<32x7xf32>, vector<32x7xf32> -> vector<288x7xf32>
    %cst_420 = arith.constant dense<0.000000e+00> : vector<32x7xf32>
    %230 = tpu.matmul %218, %229, %cst_420 {dimension_numbers = #tpu.dot_dimension_numbers<[1], [0], [0], [1], [0, 0, 1, 1], [], []>} : vector<32x288xf32>, vector<288x7xf32>, vector<32x7xf32> -> vector<32x7xf32>
    %231 = vector.broadcast %219 : vector<32x1xf32> to vector<32x7xf32>
    %232 = arith.addf %230, %231 : vector<32x7xf32>
    %cst_421 = arith.constant 0.000000e+00 : f32
    %233 = vector.broadcast %cst_421 : f32 to vector<32x7xf32>
    %234 = arith.maximumf %232, %233 : vector<32x7xf32>
    %235 = vector.extract_strided_slice %49 {offsets = [0, 0], sizes = [32, 7], strides = [1, 1]} : vector<32x9xf32> to vector<32x7xf32>
    %236 = vector.extract_strided_slice %49 {offsets = [0, 1], sizes = [32, 7], strides = [1, 1]} : vector<32x9xf32> to vector<32x7xf32>
    %237 = vector.extract_strided_slice %49 {offsets = [0, 2], sizes = [32, 7], strides = [1, 1]} : vector<32x9xf32> to vector<32x7xf32>
    %238 = vector.extract_strided_slice %73 {offsets = [0, 0], sizes = [32, 7], strides = [1, 1]} : vector<32x9xf32> to vector<32x7xf32>
    %239 = vector.extract_strided_slice %73 {offsets = [0, 1], sizes = [32, 7], strides = [1, 1]} : vector<32x9xf32> to vector<32x7xf32>
    %240 = vector.extract_strided_slice %73 {offsets = [0, 2], sizes = [32, 7], strides = [1, 1]} : vector<32x9xf32> to vector<32x7xf32>
    %241 = vector.extract_strided_slice %97 {offsets = [0, 0], sizes = [32, 7], strides = [1, 1]} : vector<32x9xf32> to vector<32x7xf32>
    %242 = vector.extract_strided_slice %97 {offsets = [0, 1], sizes = [32, 7], strides = [1, 1]} : vector<32x9xf32> to vector<32x7xf32>
    %243 = vector.extract_strided_slice %97 {offsets = [0, 2], sizes = [32, 7], strides = [1, 1]} : vector<32x9xf32> to vector<32x7xf32>
    %244 = tpu.concatenate %235, %236, %237, %238, %239, %240, %241, %242, %243 in 0 : vector<32x7xf32>, vector<32x7xf32>, vector<32x7xf32>, vector<32x7xf32>, vector<32x7xf32>, vector<32x7xf32>, vector<32x7xf32>, vector<32x7xf32>, vector<32x7xf32> -> vector<288x7xf32>
    %cst_422 = arith.constant dense<0.000000e+00> : vector<32x7xf32>
    %245 = tpu.matmul %218, %244, %cst_422 {dimension_numbers = #tpu.dot_dimension_numbers<[1], [0], [0], [1], [0, 0, 1, 1], [], []>} : vector<32x288xf32>, vector<288x7xf32>, vector<32x7xf32> -> vector<32x7xf32>
    %246 = vector.broadcast %219 : vector<32x1xf32> to vector<32x7xf32>
    %247 = arith.addf %245, %246 : vector<32x7xf32>
    %cst_423 = arith.constant 0.000000e+00 : f32
    %248 = vector.broadcast %cst_423 : f32 to vector<32x7xf32>
    %249 = arith.maximumf %247, %248 : vector<32x7xf32>
    %250 = vector.extract_strided_slice %73 {offsets = [0, 0], sizes = [32, 7], strides = [1, 1]} : vector<32x9xf32> to vector<32x7xf32>
    %251 = vector.extract_strided_slice %73 {offsets = [0, 1], sizes = [32, 7], strides = [1, 1]} : vector<32x9xf32> to vector<32x7xf32>
    %252 = vector.extract_strided_slice %73 {offsets = [0, 2], sizes = [32, 7], strides = [1, 1]} : vector<32x9xf32> to vector<32x7xf32>
    %253 = vector.extract_strided_slice %97 {offsets = [0, 0], sizes = [32, 7], strides = [1, 1]} : vector<32x9xf32> to vector<32x7xf32>
    %254 = vector.extract_strided_slice %97 {offsets = [0, 1], sizes = [32, 7], strides = [1, 1]} : vector<32x9xf32> to vector<32x7xf32>
    %255 = vector.extract_strided_slice %97 {offsets = [0, 2], sizes = [32, 7], strides = [1, 1]} : vector<32x9xf32> to vector<32x7xf32>
    %256 = vector.extract_strided_slice %121 {offsets = [0, 0], sizes = [32, 7], strides = [1, 1]} : vector<32x9xf32> to vector<32x7xf32>
    %257 = vector.extract_strided_slice %121 {offsets = [0, 1], sizes = [32, 7], strides = [1, 1]} : vector<32x9xf32> to vector<32x7xf32>
    %258 = vector.extract_strided_slice %121 {offsets = [0, 2], sizes = [32, 7], strides = [1, 1]} : vector<32x9xf32> to vector<32x7xf32>
    %259 = tpu.concatenate %250, %251, %252, %253, %254, %255, %256, %257, %258 in 0 : vector<32x7xf32>, vector<32x7xf32>, vector<32x7xf32>, vector<32x7xf32>, vector<32x7xf32>, vector<32x7xf32>, vector<32x7xf32>, vector<32x7xf32>, vector<32x7xf32> -> vector<288x7xf32>
    %cst_424 = arith.constant dense<0.000000e+00> : vector<32x7xf32>
    %260 = tpu.matmul %218, %259, %cst_424 {dimension_numbers = #tpu.dot_dimension_numbers<[1], [0], [0], [1], [0, 0, 1, 1], [], []>} : vector<32x288xf32>, vector<288x7xf32>, vector<32x7xf32> -> vector<32x7xf32>
    %261 = vector.broadcast %219 : vector<32x1xf32> to vector<32x7xf32>
    %262 = arith.addf %260, %261 : vector<32x7xf32>
    %cst_425 = arith.constant 0.000000e+00 : f32
    %263 = vector.broadcast %cst_425 : f32 to vector<32x7xf32>
    %264 = arith.maximumf %262, %263 : vector<32x7xf32>
    %265 = vector.extract_strided_slice %97 {offsets = [0, 0], sizes = [32, 7], strides = [1, 1]} : vector<32x9xf32> to vector<32x7xf32>
    %266 = vector.extract_strided_slice %97 {offsets = [0, 1], sizes = [32, 7], strides = [1, 1]} : vector<32x9xf32> to vector<32x7xf32>
    %267 = vector.extract_strided_slice %97 {offsets = [0, 2], sizes = [32, 7], strides = [1, 1]} : vector<32x9xf32> to vector<32x7xf32>
    %268 = vector.extract_strided_slice %121 {offsets = [0, 0], sizes = [32, 7], strides = [1, 1]} : vector<32x9xf32> to vector<32x7xf32>
    %269 = vector.extract_strided_slice %121 {offsets = [0, 1], sizes = [32, 7], strides = [1, 1]} : vector<32x9xf32> to vector<32x7xf32>
    %270 = vector.extract_strided_slice %121 {offsets = [0, 2], sizes = [32, 7], strides = [1, 1]} : vector<32x9xf32> to vector<32x7xf32>
    %271 = vector.extract_strided_slice %145 {offsets = [0, 0], sizes = [32, 7], strides = [1, 1]} : vector<32x9xf32> to vector<32x7xf32>
    %272 = vector.extract_strided_slice %145 {offsets = [0, 1], sizes = [32, 7], strides = [1, 1]} : vector<32x9xf32> to vector<32x7xf32>
    %273 = vector.extract_strided_slice %145 {offsets = [0, 2], sizes = [32, 7], strides = [1, 1]} : vector<32x9xf32> to vector<32x7xf32>
    %274 = tpu.concatenate %265, %266, %267, %268, %269, %270, %271, %272, %273 in 0 : vector<32x7xf32>, vector<32x7xf32>, vector<32x7xf32>, vector<32x7xf32>, vector<32x7xf32>, vector<32x7xf32>, vector<32x7xf32>, vector<32x7xf32>, vector<32x7xf32> -> vector<288x7xf32>
    %cst_426 = arith.constant dense<0.000000e+00> : vector<32x7xf32>
    %275 = tpu.matmul %218, %274, %cst_426 {dimension_numbers = #tpu.dot_dimension_numbers<[1], [0], [0], [1], [0, 0, 1, 1], [], []>} : vector<32x288xf32>, vector<288x7xf32>, vector<32x7xf32> -> vector<32x7xf32>
    %276 = vector.broadcast %219 : vector<32x1xf32> to vector<32x7xf32>
    %277 = arith.addf %275, %276 : vector<32x7xf32>
    %cst_427 = arith.constant 0.000000e+00 : f32
    %278 = vector.broadcast %cst_427 : f32 to vector<32x7xf32>
    %279 = arith.maximumf %277, %278 : vector<32x7xf32>
    %280 = vector.extract_strided_slice %121 {offsets = [0, 0], sizes = [32, 7], strides = [1, 1]} : vector<32x9xf32> to vector<32x7xf32>
    %281 = vector.extract_strided_slice %121 {offsets = [0, 1], sizes = [32, 7], strides = [1, 1]} : vector<32x9xf32> to vector<32x7xf32>
    %282 = vector.extract_strided_slice %121 {offsets = [0, 2], sizes = [32, 7], strides = [1, 1]} : vector<32x9xf32> to vector<32x7xf32>
    %283 = vector.extract_strided_slice %145 {offsets = [0, 0], sizes = [32, 7], strides = [1, 1]} : vector<32x9xf32> to vector<32x7xf32>
    %284 = vector.extract_strided_slice %145 {offsets = [0, 1], sizes = [32, 7], strides = [1, 1]} : vector<32x9xf32> to vector<32x7xf32>
    %285 = vector.extract_strided_slice %145 {offsets = [0, 2], sizes = [32, 7], strides = [1, 1]} : vector<32x9xf32> to vector<32x7xf32>
    %286 = vector.extract_strided_slice %169 {offsets = [0, 0], sizes = [32, 7], strides = [1, 1]} : vector<32x9xf32> to vector<32x7xf32>
    %287 = vector.extract_strided_slice %169 {offsets = [0, 1], sizes = [32, 7], strides = [1, 1]} : vector<32x9xf32> to vector<32x7xf32>
    %288 = vector.extract_strided_slice %169 {offsets = [0, 2], sizes = [32, 7], strides = [1, 1]} : vector<32x9xf32> to vector<32x7xf32>
    %289 = tpu.concatenate %280, %281, %282, %283, %284, %285, %286, %287, %288 in 0 : vector<32x7xf32>, vector<32x7xf32>, vector<32x7xf32>, vector<32x7xf32>, vector<32x7xf32>, vector<32x7xf32>, vector<32x7xf32>, vector<32x7xf32>, vector<32x7xf32> -> vector<288x7xf32>
    %cst_428 = arith.constant dense<0.000000e+00> : vector<32x7xf32>
    %290 = tpu.matmul %218, %289, %cst_428 {dimension_numbers = #tpu.dot_dimension_numbers<[1], [0], [0], [1], [0, 0, 1, 1], [], []>} : vector<32x288xf32>, vector<288x7xf32>, vector<32x7xf32> -> vector<32x7xf32>
    %291 = vector.broadcast %219 : vector<32x1xf32> to vector<32x7xf32>
    %292 = arith.addf %290, %291 : vector<32x7xf32>
    %cst_429 = arith.constant 0.000000e+00 : f32
    %293 = vector.broadcast %cst_429 : f32 to vector<32x7xf32>
    %294 = arith.maximumf %292, %293 : vector<32x7xf32>
    %295 = vector.extract_strided_slice %145 {offsets = [0, 0], sizes = [32, 7], strides = [1, 1]} : vector<32x9xf32> to vector<32x7xf32>
    %296 = vector.extract_strided_slice %145 {offsets = [0, 1], sizes = [32, 7], strides = [1, 1]} : vector<32x9xf32> to vector<32x7xf32>
    %297 = vector.extract_strided_slice %145 {offsets = [0, 2], sizes = [32, 7], strides = [1, 1]} : vector<32x9xf32> to vector<32x7xf32>
    %298 = vector.extract_strided_slice %169 {offsets = [0, 0], sizes = [32, 7], strides = [1, 1]} : vector<32x9xf32> to vector<32x7xf32>
    %299 = vector.extract_strided_slice %169 {offsets = [0, 1], sizes = [32, 7], strides = [1, 1]} : vector<32x9xf32> to vector<32x7xf32>
    %300 = vector.extract_strided_slice %169 {offsets = [0, 2], sizes = [32, 7], strides = [1, 1]} : vector<32x9xf32> to vector<32x7xf32>
    %301 = vector.extract_strided_slice %193 {offsets = [0, 0], sizes = [32, 7], strides = [1, 1]} : vector<32x9xf32> to vector<32x7xf32>
    %302 = vector.extract_strided_slice %193 {offsets = [0, 1], sizes = [32, 7], strides = [1, 1]} : vector<32x9xf32> to vector<32x7xf32>
    %303 = vector.extract_strided_slice %193 {offsets = [0, 2], sizes = [32, 7], strides = [1, 1]} : vector<32x9xf32> to vector<32x7xf32>
    %304 = tpu.concatenate %295, %296, %297, %298, %299, %300, %301, %302, %303 in 0 : vector<32x7xf32>, vector<32x7xf32>, vector<32x7xf32>, vector<32x7xf32>, vector<32x7xf32>, vector<32x7xf32>, vector<32x7xf32>, vector<32x7xf32>, vector<32x7xf32> -> vector<288x7xf32>
    %cst_430 = arith.constant dense<0.000000e+00> : vector<32x7xf32>
    %305 = tpu.matmul %218, %304, %cst_430 {dimension_numbers = #tpu.dot_dimension_numbers<[1], [0], [0], [1], [0, 0, 1, 1], [], []>} : vector<32x288xf32>, vector<288x7xf32>, vector<32x7xf32> -> vector<32x7xf32>
    %306 = vector.broadcast %219 : vector<32x1xf32> to vector<32x7xf32>
    %307 = arith.addf %305, %306 : vector<32x7xf32>
    %cst_431 = arith.constant 0.000000e+00 : f32
    %308 = vector.broadcast %cst_431 : f32 to vector<32x7xf32>
    %309 = arith.maximumf %307, %308 : vector<32x7xf32>
    %310 = vector.extract_strided_slice %169 {offsets = [0, 0], sizes = [32, 7], strides = [1, 1]} : vector<32x9xf32> to vector<32x7xf32>
    %311 = vector.extract_strided_slice %169 {offsets = [0, 1], sizes = [32, 7], strides = [1, 1]} : vector<32x9xf32> to vector<32x7xf32>
    %312 = vector.extract_strided_slice %169 {offsets = [0, 2], sizes = [32, 7], strides = [1, 1]} : vector<32x9xf32> to vector<32x7xf32>
    %313 = vector.extract_strided_slice %193 {offsets = [0, 0], sizes = [32, 7], strides = [1, 1]} : vector<32x9xf32> to vector<32x7xf32>
    %314 = vector.extract_strided_slice %193 {offsets = [0, 1], sizes = [32, 7], strides = [1, 1]} : vector<32x9xf32> to vector<32x7xf32>
    %315 = vector.extract_strided_slice %193 {offsets = [0, 2], sizes = [32, 7], strides = [1, 1]} : vector<32x9xf32> to vector<32x7xf32>
    %316 = vector.extract_strided_slice %217 {offsets = [0, 0], sizes = [32, 7], strides = [1, 1]} : vector<32x9xf32> to vector<32x7xf32>
    %317 = vector.extract_strided_slice %217 {offsets = [0, 1], sizes = [32, 7], strides = [1, 1]} : vector<32x9xf32> to vector<32x7xf32>
    %318 = vector.extract_strided_slice %217 {offsets = [0, 2], sizes = [32, 7], strides = [1, 1]} : vector<32x9xf32> to vector<32x7xf32>
    %319 = tpu.concatenate %310, %311, %312, %313, %314, %315, %316, %317, %318 in 0 : vector<32x7xf32>, vector<32x7xf32>, vector<32x7xf32>, vector<32x7xf32>, vector<32x7xf32>, vector<32x7xf32>, vector<32x7xf32>, vector<32x7xf32>, vector<32x7xf32> -> vector<288x7xf32>
    %cst_432 = arith.constant dense<0.000000e+00> : vector<32x7xf32>
    %320 = tpu.matmul %218, %319, %cst_432 {dimension_numbers = #tpu.dot_dimension_numbers<[1], [0], [0], [1], [0, 0, 1, 1], [], []>} : vector<32x288xf32>, vector<288x7xf32>, vector<32x7xf32> -> vector<32x7xf32>
    %321 = vector.broadcast %219 : vector<32x1xf32> to vector<32x7xf32>
    %322 = arith.addf %320, %321 : vector<32x7xf32>
    %cst_433 = arith.constant 0.000000e+00 : f32
    %323 = vector.broadcast %cst_433 : f32 to vector<32x7xf32>
    %324 = arith.maximumf %322, %323 : vector<32x7xf32>
    %c0_434 = arith.constant 0 : index
    %c0_435 = arith.constant 0 : index
    %325 = vector.load %arg6[%c0_434, %c0_435] : memref<32x288xf32, #tpu.memory_space<vmem>>, vector<32x288xf32>
    %c0_436 = arith.constant 0 : index
    %c0_437 = arith.constant 0 : index
    %326 = vector.load %arg7[%c0_436, %c0_437] : memref<32x1xf32, #tpu.memory_space<vmem>>, vector<32x1xf32>
    %327 = vector.extract_strided_slice %234 {offsets = [0, 0], sizes = [32, 5], strides = [1, 1]} : vector<32x7xf32> to vector<32x5xf32>
    %328 = vector.extract_strided_slice %234 {offsets = [0, 1], sizes = [32, 5], strides = [1, 1]} : vector<32x7xf32> to vector<32x5xf32>
    %329 = vector.extract_strided_slice %234 {offsets = [0, 2], sizes = [32, 5], strides = [1, 1]} : vector<32x7xf32> to vector<32x5xf32>
    %330 = vector.extract_strided_slice %249 {offsets = [0, 0], sizes = [32, 5], strides = [1, 1]} : vector<32x7xf32> to vector<32x5xf32>
    %331 = vector.extract_strided_slice %249 {offsets = [0, 1], sizes = [32, 5], strides = [1, 1]} : vector<32x7xf32> to vector<32x5xf32>
    %332 = vector.extract_strided_slice %249 {offsets = [0, 2], sizes = [32, 5], strides = [1, 1]} : vector<32x7xf32> to vector<32x5xf32>
    %333 = vector.extract_strided_slice %264 {offsets = [0, 0], sizes = [32, 5], strides = [1, 1]} : vector<32x7xf32> to vector<32x5xf32>
    %334 = vector.extract_strided_slice %264 {offsets = [0, 1], sizes = [32, 5], strides = [1, 1]} : vector<32x7xf32> to vector<32x5xf32>
    %335 = vector.extract_strided_slice %264 {offsets = [0, 2], sizes = [32, 5], strides = [1, 1]} : vector<32x7xf32> to vector<32x5xf32>
    %336 = tpu.concatenate %327, %328, %329, %330, %331, %332, %333, %334, %335 in 0 : vector<32x5xf32>, vector<32x5xf32>, vector<32x5xf32>, vector<32x5xf32>, vector<32x5xf32>, vector<32x5xf32>, vector<32x5xf32>, vector<32x5xf32>, vector<32x5xf32> -> vector<288x5xf32>
    %cst_438 = arith.constant dense<0.000000e+00> : vector<32x5xf32>
    %337 = tpu.matmul %325, %336, %cst_438 {dimension_numbers = #tpu.dot_dimension_numbers<[1], [0], [0], [1], [0, 0, 1, 1], [], []>} : vector<32x288xf32>, vector<288x5xf32>, vector<32x5xf32> -> vector<32x5xf32>
    %338 = vector.broadcast %326 : vector<32x1xf32> to vector<32x5xf32>
    %339 = arith.addf %337, %338 : vector<32x5xf32>
    %cst_439 = arith.constant 0.000000e+00 : f32
    %340 = vector.broadcast %cst_439 : f32 to vector<32x5xf32>
    %341 = arith.maximumf %339, %340 : vector<32x5xf32>
    %342 = vector.extract_strided_slice %249 {offsets = [0, 0], sizes = [32, 5], strides = [1, 1]} : vector<32x7xf32> to vector<32x5xf32>
    %343 = vector.extract_strided_slice %249 {offsets = [0, 1], sizes = [32, 5], strides = [1, 1]} : vector<32x7xf32> to vector<32x5xf32>
    %344 = vector.extract_strided_slice %249 {offsets = [0, 2], sizes = [32, 5], strides = [1, 1]} : vector<32x7xf32> to vector<32x5xf32>
    %345 = vector.extract_strided_slice %264 {offsets = [0, 0], sizes = [32, 5], strides = [1, 1]} : vector<32x7xf32> to vector<32x5xf32>
    %346 = vector.extract_strided_slice %264 {offsets = [0, 1], sizes = [32, 5], strides = [1, 1]} : vector<32x7xf32> to vector<32x5xf32>
    %347 = vector.extract_strided_slice %264 {offsets = [0, 2], sizes = [32, 5], strides = [1, 1]} : vector<32x7xf32> to vector<32x5xf32>
    %348 = vector.extract_strided_slice %279 {offsets = [0, 0], sizes = [32, 5], strides = [1, 1]} : vector<32x7xf32> to vector<32x5xf32>
    %349 = vector.extract_strided_slice %279 {offsets = [0, 1], sizes = [32, 5], strides = [1, 1]} : vector<32x7xf32> to vector<32x5xf32>
    %350 = vector.extract_strided_slice %279 {offsets = [0, 2], sizes = [32, 5], strides = [1, 1]} : vector<32x7xf32> to vector<32x5xf32>
    %351 = tpu.concatenate %342, %343, %344, %345, %346, %347, %348, %349, %350 in 0 : vector<32x5xf32>, vector<32x5xf32>, vector<32x5xf32>, vector<32x5xf32>, vector<32x5xf32>, vector<32x5xf32>, vector<32x5xf32>, vector<32x5xf32>, vector<32x5xf32> -> vector<288x5xf32>
    %cst_440 = arith.constant dense<0.000000e+00> : vector<32x5xf32>
    %352 = tpu.matmul %325, %351, %cst_440 {dimension_numbers = #tpu.dot_dimension_numbers<[1], [0], [0], [1], [0, 0, 1, 1], [], []>} : vector<32x288xf32>, vector<288x5xf32>, vector<32x5xf32> -> vector<32x5xf32>
    %353 = vector.broadcast %326 : vector<32x1xf32> to vector<32x5xf32>
    %354 = arith.addf %352, %353 : vector<32x5xf32>
    %cst_441 = arith.constant 0.000000e+00 : f32
    %355 = vector.broadcast %cst_441 : f32 to vector<32x5xf32>
    %356 = arith.maximumf %354, %355 : vector<32x5xf32>
    %357 = vector.extract_strided_slice %264 {offsets = [0, 0], sizes = [32, 5], strides = [1, 1]} : vector<32x7xf32> to vector<32x5xf32>
    %358 = vector.extract_strided_slice %264 {offsets = [0, 1], sizes = [32, 5], strides = [1, 1]} : vector<32x7xf32> to vector<32x5xf32>
    %359 = vector.extract_strided_slice %264 {offsets = [0, 2], sizes = [32, 5], strides = [1, 1]} : vector<32x7xf32> to vector<32x5xf32>
    %360 = vector.extract_strided_slice %279 {offsets = [0, 0], sizes = [32, 5], strides = [1, 1]} : vector<32x7xf32> to vector<32x5xf32>
    %361 = vector.extract_strided_slice %279 {offsets = [0, 1], sizes = [32, 5], strides = [1, 1]} : vector<32x7xf32> to vector<32x5xf32>
    %362 = vector.extract_strided_slice %279 {offsets = [0, 2], sizes = [32, 5], strides = [1, 1]} : vector<32x7xf32> to vector<32x5xf32>
    %363 = vector.extract_strided_slice %294 {offsets = [0, 0], sizes = [32, 5], strides = [1, 1]} : vector<32x7xf32> to vector<32x5xf32>
    %364 = vector.extract_strided_slice %294 {offsets = [0, 1], sizes = [32, 5], strides = [1, 1]} : vector<32x7xf32> to vector<32x5xf32>
    %365 = vector.extract_strided_slice %294 {offsets = [0, 2], sizes = [32, 5], strides = [1, 1]} : vector<32x7xf32> to vector<32x5xf32>
    %366 = tpu.concatenate %357, %358, %359, %360, %361, %362, %363, %364, %365 in 0 : vector<32x5xf32>, vector<32x5xf32>, vector<32x5xf32>, vector<32x5xf32>, vector<32x5xf32>, vector<32x5xf32>, vector<32x5xf32>, vector<32x5xf32>, vector<32x5xf32> -> vector<288x5xf32>
    %cst_442 = arith.constant dense<0.000000e+00> : vector<32x5xf32>
    %367 = tpu.matmul %325, %366, %cst_442 {dimension_numbers = #tpu.dot_dimension_numbers<[1], [0], [0], [1], [0, 0, 1, 1], [], []>} : vector<32x288xf32>, vector<288x5xf32>, vector<32x5xf32> -> vector<32x5xf32>
    %368 = vector.broadcast %326 : vector<32x1xf32> to vector<32x5xf32>
    %369 = arith.addf %367, %368 : vector<32x5xf32>
    %cst_443 = arith.constant 0.000000e+00 : f32
    %370 = vector.broadcast %cst_443 : f32 to vector<32x5xf32>
    %371 = arith.maximumf %369, %370 : vector<32x5xf32>
    %372 = vector.extract_strided_slice %279 {offsets = [0, 0], sizes = [32, 5], strides = [1, 1]} : vector<32x7xf32> to vector<32x5xf32>
    %373 = vector.extract_strided_slice %279 {offsets = [0, 1], sizes = [32, 5], strides = [1, 1]} : vector<32x7xf32> to vector<32x5xf32>
    %374 = vector.extract_strided_slice %279 {offsets = [0, 2], sizes = [32, 5], strides = [1, 1]} : vector<32x7xf32> to vector<32x5xf32>
    %375 = vector.extract_strided_slice %294 {offsets = [0, 0], sizes = [32, 5], strides = [1, 1]} : vector<32x7xf32> to vector<32x5xf32>
    %376 = vector.extract_strided_slice %294 {offsets = [0, 1], sizes = [32, 5], strides = [1, 1]} : vector<32x7xf32> to vector<32x5xf32>
    %377 = vector.extract_strided_slice %294 {offsets = [0, 2], sizes = [32, 5], strides = [1, 1]} : vector<32x7xf32> to vector<32x5xf32>
    %378 = vector.extract_strided_slice %309 {offsets = [0, 0], sizes = [32, 5], strides = [1, 1]} : vector<32x7xf32> to vector<32x5xf32>
    %379 = vector.extract_strided_slice %309 {offsets = [0, 1], sizes = [32, 5], strides = [1, 1]} : vector<32x7xf32> to vector<32x5xf32>
    %380 = vector.extract_strided_slice %309 {offsets = [0, 2], sizes = [32, 5], strides = [1, 1]} : vector<32x7xf32> to vector<32x5xf32>
    %381 = tpu.concatenate %372, %373, %374, %375, %376, %377, %378, %379, %380 in 0 : vector<32x5xf32>, vector<32x5xf32>, vector<32x5xf32>, vector<32x5xf32>, vector<32x5xf32>, vector<32x5xf32>, vector<32x5xf32>, vector<32x5xf32>, vector<32x5xf32> -> vector<288x5xf32>
    %cst_444 = arith.constant dense<0.000000e+00> : vector<32x5xf32>
    %382 = tpu.matmul %325, %381, %cst_444 {dimension_numbers = #tpu.dot_dimension_numbers<[1], [0], [0], [1], [0, 0, 1, 1], [], []>} : vector<32x288xf32>, vector<288x5xf32>, vector<32x5xf32> -> vector<32x5xf32>
    %383 = vector.broadcast %326 : vector<32x1xf32> to vector<32x5xf32>
    %384 = arith.addf %382, %383 : vector<32x5xf32>
    %cst_445 = arith.constant 0.000000e+00 : f32
    %385 = vector.broadcast %cst_445 : f32 to vector<32x5xf32>
    %386 = arith.maximumf %384, %385 : vector<32x5xf32>
    %387 = vector.extract_strided_slice %294 {offsets = [0, 0], sizes = [32, 5], strides = [1, 1]} : vector<32x7xf32> to vector<32x5xf32>
    %388 = vector.extract_strided_slice %294 {offsets = [0, 1], sizes = [32, 5], strides = [1, 1]} : vector<32x7xf32> to vector<32x5xf32>
    %389 = vector.extract_strided_slice %294 {offsets = [0, 2], sizes = [32, 5], strides = [1, 1]} : vector<32x7xf32> to vector<32x5xf32>
    %390 = vector.extract_strided_slice %309 {offsets = [0, 0], sizes = [32, 5], strides = [1, 1]} : vector<32x7xf32> to vector<32x5xf32>
    %391 = vector.extract_strided_slice %309 {offsets = [0, 1], sizes = [32, 5], strides = [1, 1]} : vector<32x7xf32> to vector<32x5xf32>
    %392 = vector.extract_strided_slice %309 {offsets = [0, 2], sizes = [32, 5], strides = [1, 1]} : vector<32x7xf32> to vector<32x5xf32>
    %393 = vector.extract_strided_slice %324 {offsets = [0, 0], sizes = [32, 5], strides = [1, 1]} : vector<32x7xf32> to vector<32x5xf32>
    %394 = vector.extract_strided_slice %324 {offsets = [0, 1], sizes = [32, 5], strides = [1, 1]} : vector<32x7xf32> to vector<32x5xf32>
    %395 = vector.extract_strided_slice %324 {offsets = [0, 2], sizes = [32, 5], strides = [1, 1]} : vector<32x7xf32> to vector<32x5xf32>
    %396 = tpu.concatenate %387, %388, %389, %390, %391, %392, %393, %394, %395 in 0 : vector<32x5xf32>, vector<32x5xf32>, vector<32x5xf32>, vector<32x5xf32>, vector<32x5xf32>, vector<32x5xf32>, vector<32x5xf32>, vector<32x5xf32>, vector<32x5xf32> -> vector<288x5xf32>
    %cst_446 = arith.constant dense<0.000000e+00> : vector<32x5xf32>
    %397 = tpu.matmul %325, %396, %cst_446 {dimension_numbers = #tpu.dot_dimension_numbers<[1], [0], [0], [1], [0, 0, 1, 1], [], []>} : vector<32x288xf32>, vector<288x5xf32>, vector<32x5xf32> -> vector<32x5xf32>
    %398 = vector.broadcast %326 : vector<32x1xf32> to vector<32x5xf32>
    %399 = arith.addf %397, %398 : vector<32x5xf32>
    %cst_447 = arith.constant 0.000000e+00 : f32
    %400 = vector.broadcast %cst_447 : f32 to vector<32x5xf32>
    %401 = arith.maximumf %399, %400 : vector<32x5xf32>
    %c0_448 = arith.constant 0 : index
    %c0_449 = arith.constant 0 : index
    %402 = vector.load %arg8[%c0_448, %c0_449] : memref<32x288xf32, #tpu.memory_space<vmem>>, vector<32x288xf32>
    %c0_450 = arith.constant 0 : index
    %c0_451 = arith.constant 0 : index
    %403 = vector.load %arg9[%c0_450, %c0_451] : memref<32x1xf32, #tpu.memory_space<vmem>>, vector<32x1xf32>
    %404 = vector.extract_strided_slice %341 {offsets = [0, 0], sizes = [32, 3], strides = [1, 1]} : vector<32x5xf32> to vector<32x3xf32>
    %405 = vector.extract_strided_slice %341 {offsets = [0, 1], sizes = [32, 3], strides = [1, 1]} : vector<32x5xf32> to vector<32x3xf32>
    %406 = vector.extract_strided_slice %341 {offsets = [0, 2], sizes = [32, 3], strides = [1, 1]} : vector<32x5xf32> to vector<32x3xf32>
    %407 = vector.extract_strided_slice %356 {offsets = [0, 0], sizes = [32, 3], strides = [1, 1]} : vector<32x5xf32> to vector<32x3xf32>
    %408 = vector.extract_strided_slice %356 {offsets = [0, 1], sizes = [32, 3], strides = [1, 1]} : vector<32x5xf32> to vector<32x3xf32>
    %409 = vector.extract_strided_slice %356 {offsets = [0, 2], sizes = [32, 3], strides = [1, 1]} : vector<32x5xf32> to vector<32x3xf32>
    %410 = vector.extract_strided_slice %371 {offsets = [0, 0], sizes = [32, 3], strides = [1, 1]} : vector<32x5xf32> to vector<32x3xf32>
    %411 = vector.extract_strided_slice %371 {offsets = [0, 1], sizes = [32, 3], strides = [1, 1]} : vector<32x5xf32> to vector<32x3xf32>
    %412 = vector.extract_strided_slice %371 {offsets = [0, 2], sizes = [32, 3], strides = [1, 1]} : vector<32x5xf32> to vector<32x3xf32>
    %413 = tpu.concatenate %404, %405, %406, %407, %408, %409, %410, %411, %412 in 0 : vector<32x3xf32>, vector<32x3xf32>, vector<32x3xf32>, vector<32x3xf32>, vector<32x3xf32>, vector<32x3xf32>, vector<32x3xf32>, vector<32x3xf32>, vector<32x3xf32> -> vector<288x3xf32>
    %cst_452 = arith.constant dense<0.000000e+00> : vector<32x3xf32>
    %414 = tpu.matmul %402, %413, %cst_452 {dimension_numbers = #tpu.dot_dimension_numbers<[1], [0], [0], [1], [0, 0, 1, 1], [], []>} : vector<32x288xf32>, vector<288x3xf32>, vector<32x3xf32> -> vector<32x3xf32>
    %415 = vector.broadcast %403 : vector<32x1xf32> to vector<32x3xf32>
    %416 = arith.addf %414, %415 : vector<32x3xf32>
    %cst_453 = arith.constant 0.000000e+00 : f32
    %417 = vector.broadcast %cst_453 : f32 to vector<32x3xf32>
    %418 = arith.maximumf %416, %417 : vector<32x3xf32>
    %419 = vector.extract_strided_slice %356 {offsets = [0, 0], sizes = [32, 3], strides = [1, 1]} : vector<32x5xf32> to vector<32x3xf32>
    %420 = vector.extract_strided_slice %356 {offsets = [0, 1], sizes = [32, 3], strides = [1, 1]} : vector<32x5xf32> to vector<32x3xf32>
    %421 = vector.extract_strided_slice %356 {offsets = [0, 2], sizes = [32, 3], strides = [1, 1]} : vector<32x5xf32> to vector<32x3xf32>
    %422 = vector.extract_strided_slice %371 {offsets = [0, 0], sizes = [32, 3], strides = [1, 1]} : vector<32x5xf32> to vector<32x3xf32>
    %423 = vector.extract_strided_slice %371 {offsets = [0, 1], sizes = [32, 3], strides = [1, 1]} : vector<32x5xf32> to vector<32x3xf32>
    %424 = vector.extract_strided_slice %371 {offsets = [0, 2], sizes = [32, 3], strides = [1, 1]} : vector<32x5xf32> to vector<32x3xf32>
    %425 = vector.extract_strided_slice %386 {offsets = [0, 0], sizes = [32, 3], strides = [1, 1]} : vector<32x5xf32> to vector<32x3xf32>
    %426 = vector.extract_strided_slice %386 {offsets = [0, 1], sizes = [32, 3], strides = [1, 1]} : vector<32x5xf32> to vector<32x3xf32>
    %427 = vector.extract_strided_slice %386 {offsets = [0, 2], sizes = [32, 3], strides = [1, 1]} : vector<32x5xf32> to vector<32x3xf32>
    %428 = tpu.concatenate %419, %420, %421, %422, %423, %424, %425, %426, %427 in 0 : vector<32x3xf32>, vector<32x3xf32>, vector<32x3xf32>, vector<32x3xf32>, vector<32x3xf32>, vector<32x3xf32>, vector<32x3xf32>, vector<32x3xf32>, vector<32x3xf32> -> vector<288x3xf32>
    %cst_454 = arith.constant dense<0.000000e+00> : vector<32x3xf32>
    %429 = tpu.matmul %402, %428, %cst_454 {dimension_numbers = #tpu.dot_dimension_numbers<[1], [0], [0], [1], [0, 0, 1, 1], [], []>} : vector<32x288xf32>, vector<288x3xf32>, vector<32x3xf32> -> vector<32x3xf32>
    %430 = vector.broadcast %403 : vector<32x1xf32> to vector<32x3xf32>
    %431 = arith.addf %429, %430 : vector<32x3xf32>
    %cst_455 = arith.constant 0.000000e+00 : f32
    %432 = vector.broadcast %cst_455 : f32 to vector<32x3xf32>
    %433 = arith.maximumf %431, %432 : vector<32x3xf32>
    %434 = vector.extract_strided_slice %371 {offsets = [0, 0], sizes = [32, 3], strides = [1, 1]} : vector<32x5xf32> to vector<32x3xf32>
    %435 = vector.extract_strided_slice %371 {offsets = [0, 1], sizes = [32, 3], strides = [1, 1]} : vector<32x5xf32> to vector<32x3xf32>
    %436 = vector.extract_strided_slice %371 {offsets = [0, 2], sizes = [32, 3], strides = [1, 1]} : vector<32x5xf32> to vector<32x3xf32>
    %437 = vector.extract_strided_slice %386 {offsets = [0, 0], sizes = [32, 3], strides = [1, 1]} : vector<32x5xf32> to vector<32x3xf32>
    %438 = vector.extract_strided_slice %386 {offsets = [0, 1], sizes = [32, 3], strides = [1, 1]} : vector<32x5xf32> to vector<32x3xf32>
    %439 = vector.extract_strided_slice %386 {offsets = [0, 2], sizes = [32, 3], strides = [1, 1]} : vector<32x5xf32> to vector<32x3xf32>
    %440 = vector.extract_strided_slice %401 {offsets = [0, 0], sizes = [32, 3], strides = [1, 1]} : vector<32x5xf32> to vector<32x3xf32>
    %441 = vector.extract_strided_slice %401 {offsets = [0, 1], sizes = [32, 3], strides = [1, 1]} : vector<32x5xf32> to vector<32x3xf32>
    %442 = vector.extract_strided_slice %401 {offsets = [0, 2], sizes = [32, 3], strides = [1, 1]} : vector<32x5xf32> to vector<32x3xf32>
    %443 = tpu.concatenate %434, %435, %436, %437, %438, %439, %440, %441, %442 in 0 : vector<32x3xf32>, vector<32x3xf32>, vector<32x3xf32>, vector<32x3xf32>, vector<32x3xf32>, vector<32x3xf32>, vector<32x3xf32>, vector<32x3xf32>, vector<32x3xf32> -> vector<288x3xf32>
    %cst_456 = arith.constant dense<0.000000e+00> : vector<32x3xf32>
    %444 = tpu.matmul %402, %443, %cst_456 {dimension_numbers = #tpu.dot_dimension_numbers<[1], [0], [0], [1], [0, 0, 1, 1], [], []>} : vector<32x288xf32>, vector<288x3xf32>, vector<32x3xf32> -> vector<32x3xf32>
    %445 = vector.broadcast %403 : vector<32x1xf32> to vector<32x3xf32>
    %446 = arith.addf %444, %445 : vector<32x3xf32>
    %cst_457 = arith.constant 0.000000e+00 : f32
    %447 = vector.broadcast %cst_457 : f32 to vector<32x3xf32>
    %448 = arith.maximumf %446, %447 : vector<32x3xf32>
    %449 = tpu.concatenate %418, %433, %448 in 1 : vector<32x3xf32>, vector<32x3xf32>, vector<32x3xf32> -> vector<32x9xf32>
    %c0_458 = arith.constant 0 : index
    %c0_459 = arith.constant 0 : index
    %450 = vector.load %arg11[%c0_458, %c0_459] : memref<1x32xf32, #tpu.memory_space<vmem>>, vector<1x32xf32>
    %451 = vector.extract_strided_slice %449 {offsets = [0, 0], sizes = [1, 9], strides = [1, 1]} : vector<32x9xf32> to vector<1x9xf32>
    %c0_460 = arith.constant 0 : index
    %c0_461 = arith.constant 0 : index
    %c0_462 = arith.constant 0 : index
    %452 = vector.load %arg10[%c0_460, %c0_461, %c0_462] : memref<32x9x32xf32, #tpu.memory_space<vmem>>, vector<1x9x32xf32>
    %453 = vector.shape_cast %452 : vector<1x9x32xf32> to vector<9x32xf32>
    %cst_463 = arith.constant dense<0.000000e+00> : vector<1x32xf32>
    %454 = tpu.matmul %451, %453, %cst_463 {dimension_numbers = #tpu.dot_dimension_numbers<[1], [0], [0], [1], [0, 0, 1, 1], [], []>} : vector<1x9xf32>, vector<9x32xf32>, vector<1x32xf32> -> vector<1x32xf32>
    %455 = arith.addf %450, %454 : vector<1x32xf32>
    %456 = vector.extract_strided_slice %449 {offsets = [1, 0], sizes = [1, 9], strides = [1, 1]} : vector<32x9xf32> to vector<1x9xf32>
    %c1_464 = arith.constant 1 : index
    %c0_465 = arith.constant 0 : index
    %c0_466 = arith.constant 0 : index
    %457 = vector.load %arg10[%c1_464, %c0_465, %c0_466] : memref<32x9x32xf32, #tpu.memory_space<vmem>>, vector<1x9x32xf32>
    %458 = vector.shape_cast %457 : vector<1x9x32xf32> to vector<9x32xf32>
    %cst_467 = arith.constant dense<0.000000e+00> : vector<1x32xf32>
    %459 = tpu.matmul %456, %458, %cst_467 {dimension_numbers = #tpu.dot_dimension_numbers<[1], [0], [0], [1], [0, 0, 1, 1], [], []>} : vector<1x9xf32>, vector<9x32xf32>, vector<1x32xf32> -> vector<1x32xf32>
    %460 = arith.addf %455, %459 : vector<1x32xf32>
    %461 = vector.extract_strided_slice %449 {offsets = [2, 0], sizes = [1, 9], strides = [1, 1]} : vector<32x9xf32> to vector<1x9xf32>
    %c2_468 = arith.constant 2 : index
    %c0_469 = arith.constant 0 : index
    %c0_470 = arith.constant 0 : index
    %462 = vector.load %arg10[%c2_468, %c0_469, %c0_470] : memref<32x9x32xf32, #tpu.memory_space<vmem>>, vector<1x9x32xf32>
    %463 = vector.shape_cast %462 : vector<1x9x32xf32> to vector<9x32xf32>
    %cst_471 = arith.constant dense<0.000000e+00> : vector<1x32xf32>
    %464 = tpu.matmul %461, %463, %cst_471 {dimension_numbers = #tpu.dot_dimension_numbers<[1], [0], [0], [1], [0, 0, 1, 1], [], []>} : vector<1x9xf32>, vector<9x32xf32>, vector<1x32xf32> -> vector<1x32xf32>
    %465 = arith.addf %460, %464 : vector<1x32xf32>
    %466 = vector.extract_strided_slice %449 {offsets = [3, 0], sizes = [1, 9], strides = [1, 1]} : vector<32x9xf32> to vector<1x9xf32>
    %c3_472 = arith.constant 3 : index
    %c0_473 = arith.constant 0 : index
    %c0_474 = arith.constant 0 : index
    %467 = vector.load %arg10[%c3_472, %c0_473, %c0_474] : memref<32x9x32xf32, #tpu.memory_space<vmem>>, vector<1x9x32xf32>
    %468 = vector.shape_cast %467 : vector<1x9x32xf32> to vector<9x32xf32>
    %cst_475 = arith.constant dense<0.000000e+00> : vector<1x32xf32>
    %469 = tpu.matmul %466, %468, %cst_475 {dimension_numbers = #tpu.dot_dimension_numbers<[1], [0], [0], [1], [0, 0, 1, 1], [], []>} : vector<1x9xf32>, vector<9x32xf32>, vector<1x32xf32> -> vector<1x32xf32>
    %470 = arith.addf %465, %469 : vector<1x32xf32>
    %471 = vector.extract_strided_slice %449 {offsets = [4, 0], sizes = [1, 9], strides = [1, 1]} : vector<32x9xf32> to vector<1x9xf32>
    %c4_476 = arith.constant 4 : index
    %c0_477 = arith.constant 0 : index
    %c0_478 = arith.constant 0 : index
    %472 = vector.load %arg10[%c4_476, %c0_477, %c0_478] : memref<32x9x32xf32, #tpu.memory_space<vmem>>, vector<1x9x32xf32>
    %473 = vector.shape_cast %472 : vector<1x9x32xf32> to vector<9x32xf32>
    %cst_479 = arith.constant dense<0.000000e+00> : vector<1x32xf32>
    %474 = tpu.matmul %471, %473, %cst_479 {dimension_numbers = #tpu.dot_dimension_numbers<[1], [0], [0], [1], [0, 0, 1, 1], [], []>} : vector<1x9xf32>, vector<9x32xf32>, vector<1x32xf32> -> vector<1x32xf32>
    %475 = arith.addf %470, %474 : vector<1x32xf32>
    %476 = vector.extract_strided_slice %449 {offsets = [5, 0], sizes = [1, 9], strides = [1, 1]} : vector<32x9xf32> to vector<1x9xf32>
    %c5_480 = arith.constant 5 : index
    %c0_481 = arith.constant 0 : index
    %c0_482 = arith.constant 0 : index
    %477 = vector.load %arg10[%c5_480, %c0_481, %c0_482] : memref<32x9x32xf32, #tpu.memory_space<vmem>>, vector<1x9x32xf32>
    %478 = vector.shape_cast %477 : vector<1x9x32xf32> to vector<9x32xf32>
    %cst_483 = arith.constant dense<0.000000e+00> : vector<1x32xf32>
    %479 = tpu.matmul %476, %478, %cst_483 {dimension_numbers = #tpu.dot_dimension_numbers<[1], [0], [0], [1], [0, 0, 1, 1], [], []>} : vector<1x9xf32>, vector<9x32xf32>, vector<1x32xf32> -> vector<1x32xf32>
    %480 = arith.addf %475, %479 : vector<1x32xf32>
    %481 = vector.extract_strided_slice %449 {offsets = [6, 0], sizes = [1, 9], strides = [1, 1]} : vector<32x9xf32> to vector<1x9xf32>
    %c6_484 = arith.constant 6 : index
    %c0_485 = arith.constant 0 : index
    %c0_486 = arith.constant 0 : index
    %482 = vector.load %arg10[%c6_484, %c0_485, %c0_486] : memref<32x9x32xf32, #tpu.memory_space<vmem>>, vector<1x9x32xf32>
    %483 = vector.shape_cast %482 : vector<1x9x32xf32> to vector<9x32xf32>
    %cst_487 = arith.constant dense<0.000000e+00> : vector<1x32xf32>
    %484 = tpu.matmul %481, %483, %cst_487 {dimension_numbers = #tpu.dot_dimension_numbers<[1], [0], [0], [1], [0, 0, 1, 1], [], []>} : vector<1x9xf32>, vector<9x32xf32>, vector<1x32xf32> -> vector<1x32xf32>
    %485 = arith.addf %480, %484 : vector<1x32xf32>
    %486 = vector.extract_strided_slice %449 {offsets = [7, 0], sizes = [1, 9], strides = [1, 1]} : vector<32x9xf32> to vector<1x9xf32>
    %c7_488 = arith.constant 7 : index
    %c0_489 = arith.constant 0 : index
    %c0_490 = arith.constant 0 : index
    %487 = vector.load %arg10[%c7_488, %c0_489, %c0_490] : memref<32x9x32xf32, #tpu.memory_space<vmem>>, vector<1x9x32xf32>
    %488 = vector.shape_cast %487 : vector<1x9x32xf32> to vector<9x32xf32>
    %cst_491 = arith.constant dense<0.000000e+00> : vector<1x32xf32>
    %489 = tpu.matmul %486, %488, %cst_491 {dimension_numbers = #tpu.dot_dimension_numbers<[1], [0], [0], [1], [0, 0, 1, 1], [], []>} : vector<1x9xf32>, vector<9x32xf32>, vector<1x32xf32> -> vector<1x32xf32>
    %490 = arith.addf %485, %489 : vector<1x32xf32>
    %491 = vector.extract_strided_slice %449 {offsets = [8, 0], sizes = [1, 9], strides = [1, 1]} : vector<32x9xf32> to vector<1x9xf32>
    %c8_492 = arith.constant 8 : index
    %c0_493 = arith.constant 0 : index
    %c0_494 = arith.constant 0 : index
    %492 = vector.load %arg10[%c8_492, %c0_493, %c0_494] : memref<32x9x32xf32, #tpu.memory_space<vmem>>, vector<1x9x32xf32>
    %493 = vector.shape_cast %492 : vector<1x9x32xf32> to vector<9x32xf32>
    %cst_495 = arith.constant dense<0.000000e+00> : vector<1x32xf32>
    %494 = tpu.matmul %491, %493, %cst_495 {dimension_numbers = #tpu.dot_dimension_numbers<[1], [0], [0], [1], [0, 0, 1, 1], [], []>} : vector<1x9xf32>, vector<9x32xf32>, vector<1x32xf32> -> vector<1x32xf32>
    %495 = arith.addf %490, %494 : vector<1x32xf32>
    %496 = vector.extract_strided_slice %449 {offsets = [9, 0], sizes = [1, 9], strides = [1, 1]} : vector<32x9xf32> to vector<1x9xf32>
    %c9_496 = arith.constant 9 : index
    %c0_497 = arith.constant 0 : index
    %c0_498 = arith.constant 0 : index
    %497 = vector.load %arg10[%c9_496, %c0_497, %c0_498] : memref<32x9x32xf32, #tpu.memory_space<vmem>>, vector<1x9x32xf32>
    %498 = vector.shape_cast %497 : vector<1x9x32xf32> to vector<9x32xf32>
    %cst_499 = arith.constant dense<0.000000e+00> : vector<1x32xf32>
    %499 = tpu.matmul %496, %498, %cst_499 {dimension_numbers = #tpu.dot_dimension_numbers<[1], [0], [0], [1], [0, 0, 1, 1], [], []>} : vector<1x9xf32>, vector<9x32xf32>, vector<1x32xf32> -> vector<1x32xf32>
    %500 = arith.addf %495, %499 : vector<1x32xf32>
    %501 = vector.extract_strided_slice %449 {offsets = [10, 0], sizes = [1, 9], strides = [1, 1]} : vector<32x9xf32> to vector<1x9xf32>
    %c10 = arith.constant 10 : index
    %c0_500 = arith.constant 0 : index
    %c0_501 = arith.constant 0 : index
    %502 = vector.load %arg10[%c10, %c0_500, %c0_501] : memref<32x9x32xf32, #tpu.memory_space<vmem>>, vector<1x9x32xf32>
    %503 = vector.shape_cast %502 : vector<1x9x32xf32> to vector<9x32xf32>
    %cst_502 = arith.constant dense<0.000000e+00> : vector<1x32xf32>
    %504 = tpu.matmul %501, %503, %cst_502 {dimension_numbers = #tpu.dot_dimension_numbers<[1], [0], [0], [1], [0, 0, 1, 1], [], []>} : vector<1x9xf32>, vector<9x32xf32>, vector<1x32xf32> -> vector<1x32xf32>
    %505 = arith.addf %500, %504 : vector<1x32xf32>
    %506 = vector.extract_strided_slice %449 {offsets = [11, 0], sizes = [1, 9], strides = [1, 1]} : vector<32x9xf32> to vector<1x9xf32>
    %c11 = arith.constant 11 : index
    %c0_503 = arith.constant 0 : index
    %c0_504 = arith.constant 0 : index
    %507 = vector.load %arg10[%c11, %c0_503, %c0_504] : memref<32x9x32xf32, #tpu.memory_space<vmem>>, vector<1x9x32xf32>
    %508 = vector.shape_cast %507 : vector<1x9x32xf32> to vector<9x32xf32>
    %cst_505 = arith.constant dense<0.000000e+00> : vector<1x32xf32>
    %509 = tpu.matmul %506, %508, %cst_505 {dimension_numbers = #tpu.dot_dimension_numbers<[1], [0], [0], [1], [0, 0, 1, 1], [], []>} : vector<1x9xf32>, vector<9x32xf32>, vector<1x32xf32> -> vector<1x32xf32>
    %510 = arith.addf %505, %509 : vector<1x32xf32>
    %511 = vector.extract_strided_slice %449 {offsets = [12, 0], sizes = [1, 9], strides = [1, 1]} : vector<32x9xf32> to vector<1x9xf32>
    %c12 = arith.constant 12 : index
    %c0_506 = arith.constant 0 : index
    %c0_507 = arith.constant 0 : index
    %512 = vector.load %arg10[%c12, %c0_506, %c0_507] : memref<32x9x32xf32, #tpu.memory_space<vmem>>, vector<1x9x32xf32>
    %513 = vector.shape_cast %512 : vector<1x9x32xf32> to vector<9x32xf32>
    %cst_508 = arith.constant dense<0.000000e+00> : vector<1x32xf32>
    %514 = tpu.matmul %511, %513, %cst_508 {dimension_numbers = #tpu.dot_dimension_numbers<[1], [0], [0], [1], [0, 0, 1, 1], [], []>} : vector<1x9xf32>, vector<9x32xf32>, vector<1x32xf32> -> vector<1x32xf32>
    %515 = arith.addf %510, %514 : vector<1x32xf32>
    %516 = vector.extract_strided_slice %449 {offsets = [13, 0], sizes = [1, 9], strides = [1, 1]} : vector<32x9xf32> to vector<1x9xf32>
    %c13 = arith.constant 13 : index
    %c0_509 = arith.constant 0 : index
    %c0_510 = arith.constant 0 : index
    %517 = vector.load %arg10[%c13, %c0_509, %c0_510] : memref<32x9x32xf32, #tpu.memory_space<vmem>>, vector<1x9x32xf32>
    %518 = vector.shape_cast %517 : vector<1x9x32xf32> to vector<9x32xf32>
    %cst_511 = arith.constant dense<0.000000e+00> : vector<1x32xf32>
    %519 = tpu.matmul %516, %518, %cst_511 {dimension_numbers = #tpu.dot_dimension_numbers<[1], [0], [0], [1], [0, 0, 1, 1], [], []>} : vector<1x9xf32>, vector<9x32xf32>, vector<1x32xf32> -> vector<1x32xf32>
    %520 = arith.addf %515, %519 : vector<1x32xf32>
    %521 = vector.extract_strided_slice %449 {offsets = [14, 0], sizes = [1, 9], strides = [1, 1]} : vector<32x9xf32> to vector<1x9xf32>
    %c14 = arith.constant 14 : index
    %c0_512 = arith.constant 0 : index
    %c0_513 = arith.constant 0 : index
    %522 = vector.load %arg10[%c14, %c0_512, %c0_513] : memref<32x9x32xf32, #tpu.memory_space<vmem>>, vector<1x9x32xf32>
    %523 = vector.shape_cast %522 : vector<1x9x32xf32> to vector<9x32xf32>
    %cst_514 = arith.constant dense<0.000000e+00> : vector<1x32xf32>
    %524 = tpu.matmul %521, %523, %cst_514 {dimension_numbers = #tpu.dot_dimension_numbers<[1], [0], [0], [1], [0, 0, 1, 1], [], []>} : vector<1x9xf32>, vector<9x32xf32>, vector<1x32xf32> -> vector<1x32xf32>
    %525 = arith.addf %520, %524 : vector<1x32xf32>
    %526 = vector.extract_strided_slice %449 {offsets = [15, 0], sizes = [1, 9], strides = [1, 1]} : vector<32x9xf32> to vector<1x9xf32>
    %c15 = arith.constant 15 : index
    %c0_515 = arith.constant 0 : index
    %c0_516 = arith.constant 0 : index
    %527 = vector.load %arg10[%c15, %c0_515, %c0_516] : memref<32x9x32xf32, #tpu.memory_space<vmem>>, vector<1x9x32xf32>
    %528 = vector.shape_cast %527 : vector<1x9x32xf32> to vector<9x32xf32>
    %cst_517 = arith.constant dense<0.000000e+00> : vector<1x32xf32>
    %529 = tpu.matmul %526, %528, %cst_517 {dimension_numbers = #tpu.dot_dimension_numbers<[1], [0], [0], [1], [0, 0, 1, 1], [], []>} : vector<1x9xf32>, vector<9x32xf32>, vector<1x32xf32> -> vector<1x32xf32>
    %530 = arith.addf %525, %529 : vector<1x32xf32>
    %531 = vector.extract_strided_slice %449 {offsets = [16, 0], sizes = [1, 9], strides = [1, 1]} : vector<32x9xf32> to vector<1x9xf32>
    %c16 = arith.constant 16 : index
    %c0_518 = arith.constant 0 : index
    %c0_519 = arith.constant 0 : index
    %532 = vector.load %arg10[%c16, %c0_518, %c0_519] : memref<32x9x32xf32, #tpu.memory_space<vmem>>, vector<1x9x32xf32>
    %533 = vector.shape_cast %532 : vector<1x9x32xf32> to vector<9x32xf32>
    %cst_520 = arith.constant dense<0.000000e+00> : vector<1x32xf32>
    %534 = tpu.matmul %531, %533, %cst_520 {dimension_numbers = #tpu.dot_dimension_numbers<[1], [0], [0], [1], [0, 0, 1, 1], [], []>} : vector<1x9xf32>, vector<9x32xf32>, vector<1x32xf32> -> vector<1x32xf32>
    %535 = arith.addf %530, %534 : vector<1x32xf32>
    %536 = vector.extract_strided_slice %449 {offsets = [17, 0], sizes = [1, 9], strides = [1, 1]} : vector<32x9xf32> to vector<1x9xf32>
    %c17 = arith.constant 17 : index
    %c0_521 = arith.constant 0 : index
    %c0_522 = arith.constant 0 : index
    %537 = vector.load %arg10[%c17, %c0_521, %c0_522] : memref<32x9x32xf32, #tpu.memory_space<vmem>>, vector<1x9x32xf32>
    %538 = vector.shape_cast %537 : vector<1x9x32xf32> to vector<9x32xf32>
    %cst_523 = arith.constant dense<0.000000e+00> : vector<1x32xf32>
    %539 = tpu.matmul %536, %538, %cst_523 {dimension_numbers = #tpu.dot_dimension_numbers<[1], [0], [0], [1], [0, 0, 1, 1], [], []>} : vector<1x9xf32>, vector<9x32xf32>, vector<1x32xf32> -> vector<1x32xf32>
    %540 = arith.addf %535, %539 : vector<1x32xf32>
    %541 = vector.extract_strided_slice %449 {offsets = [18, 0], sizes = [1, 9], strides = [1, 1]} : vector<32x9xf32> to vector<1x9xf32>
    %c18 = arith.constant 18 : index
    %c0_524 = arith.constant 0 : index
    %c0_525 = arith.constant 0 : index
    %542 = vector.load %arg10[%c18, %c0_524, %c0_525] : memref<32x9x32xf32, #tpu.memory_space<vmem>>, vector<1x9x32xf32>
    %543 = vector.shape_cast %542 : vector<1x9x32xf32> to vector<9x32xf32>
    %cst_526 = arith.constant dense<0.000000e+00> : vector<1x32xf32>
    %544 = tpu.matmul %541, %543, %cst_526 {dimension_numbers = #tpu.dot_dimension_numbers<[1], [0], [0], [1], [0, 0, 1, 1], [], []>} : vector<1x9xf32>, vector<9x32xf32>, vector<1x32xf32> -> vector<1x32xf32>
    %545 = arith.addf %540, %544 : vector<1x32xf32>
    %546 = vector.extract_strided_slice %449 {offsets = [19, 0], sizes = [1, 9], strides = [1, 1]} : vector<32x9xf32> to vector<1x9xf32>
    %c19 = arith.constant 19 : index
    %c0_527 = arith.constant 0 : index
    %c0_528 = arith.constant 0 : index
    %547 = vector.load %arg10[%c19, %c0_527, %c0_528] : memref<32x9x32xf32, #tpu.memory_space<vmem>>, vector<1x9x32xf32>
    %548 = vector.shape_cast %547 : vector<1x9x32xf32> to vector<9x32xf32>
    %cst_529 = arith.constant dense<0.000000e+00> : vector<1x32xf32>
    %549 = tpu.matmul %546, %548, %cst_529 {dimension_numbers = #tpu.dot_dimension_numbers<[1], [0], [0], [1], [0, 0, 1, 1], [], []>} : vector<1x9xf32>, vector<9x32xf32>, vector<1x32xf32> -> vector<1x32xf32>
    %550 = arith.addf %545, %549 : vector<1x32xf32>
    %551 = vector.extract_strided_slice %449 {offsets = [20, 0], sizes = [1, 9], strides = [1, 1]} : vector<32x9xf32> to vector<1x9xf32>
    %c20 = arith.constant 20 : index
    %c0_530 = arith.constant 0 : index
    %c0_531 = arith.constant 0 : index
    %552 = vector.load %arg10[%c20, %c0_530, %c0_531] : memref<32x9x32xf32, #tpu.memory_space<vmem>>, vector<1x9x32xf32>
    %553 = vector.shape_cast %552 : vector<1x9x32xf32> to vector<9x32xf32>
    %cst_532 = arith.constant dense<0.000000e+00> : vector<1x32xf32>
    %554 = tpu.matmul %551, %553, %cst_532 {dimension_numbers = #tpu.dot_dimension_numbers<[1], [0], [0], [1], [0, 0, 1, 1], [], []>} : vector<1x9xf32>, vector<9x32xf32>, vector<1x32xf32> -> vector<1x32xf32>
    %555 = arith.addf %550, %554 : vector<1x32xf32>
    %556 = vector.extract_strided_slice %449 {offsets = [21, 0], sizes = [1, 9], strides = [1, 1]} : vector<32x9xf32> to vector<1x9xf32>
    %c21 = arith.constant 21 : index
    %c0_533 = arith.constant 0 : index
    %c0_534 = arith.constant 0 : index
    %557 = vector.load %arg10[%c21, %c0_533, %c0_534] : memref<32x9x32xf32, #tpu.memory_space<vmem>>, vector<1x9x32xf32>
    %558 = vector.shape_cast %557 : vector<1x9x32xf32> to vector<9x32xf32>
    %cst_535 = arith.constant dense<0.000000e+00> : vector<1x32xf32>
    %559 = tpu.matmul %556, %558, %cst_535 {dimension_numbers = #tpu.dot_dimension_numbers<[1], [0], [0], [1], [0, 0, 1, 1], [], []>} : vector<1x9xf32>, vector<9x32xf32>, vector<1x32xf32> -> vector<1x32xf32>
    %560 = arith.addf %555, %559 : vector<1x32xf32>
    %561 = vector.extract_strided_slice %449 {offsets = [22, 0], sizes = [1, 9], strides = [1, 1]} : vector<32x9xf32> to vector<1x9xf32>
    %c22 = arith.constant 22 : index
    %c0_536 = arith.constant 0 : index
    %c0_537 = arith.constant 0 : index
    %562 = vector.load %arg10[%c22, %c0_536, %c0_537] : memref<32x9x32xf32, #tpu.memory_space<vmem>>, vector<1x9x32xf32>
    %563 = vector.shape_cast %562 : vector<1x9x32xf32> to vector<9x32xf32>
    %cst_538 = arith.constant dense<0.000000e+00> : vector<1x32xf32>
    %564 = tpu.matmul %561, %563, %cst_538 {dimension_numbers = #tpu.dot_dimension_numbers<[1], [0], [0], [1], [0, 0, 1, 1], [], []>} : vector<1x9xf32>, vector<9x32xf32>, vector<1x32xf32> -> vector<1x32xf32>
    %565 = arith.addf %560, %564 : vector<1x32xf32>
    %566 = vector.extract_strided_slice %449 {offsets = [23, 0], sizes = [1, 9], strides = [1, 1]} : vector<32x9xf32> to vector<1x9xf32>
    %c23 = arith.constant 23 : index
    %c0_539 = arith.constant 0 : index
    %c0_540 = arith.constant 0 : index
    %567 = vector.load %arg10[%c23, %c0_539, %c0_540] : memref<32x9x32xf32, #tpu.memory_space<vmem>>, vector<1x9x32xf32>
    %568 = vector.shape_cast %567 : vector<1x9x32xf32> to vector<9x32xf32>
    %cst_541 = arith.constant dense<0.000000e+00> : vector<1x32xf32>
    %569 = tpu.matmul %566, %568, %cst_541 {dimension_numbers = #tpu.dot_dimension_numbers<[1], [0], [0], [1], [0, 0, 1, 1], [], []>} : vector<1x9xf32>, vector<9x32xf32>, vector<1x32xf32> -> vector<1x32xf32>
    %570 = arith.addf %565, %569 : vector<1x32xf32>
    %571 = vector.extract_strided_slice %449 {offsets = [24, 0], sizes = [1, 9], strides = [1, 1]} : vector<32x9xf32> to vector<1x9xf32>
    %c24 = arith.constant 24 : index
    %c0_542 = arith.constant 0 : index
    %c0_543 = arith.constant 0 : index
    %572 = vector.load %arg10[%c24, %c0_542, %c0_543] : memref<32x9x32xf32, #tpu.memory_space<vmem>>, vector<1x9x32xf32>
    %573 = vector.shape_cast %572 : vector<1x9x32xf32> to vector<9x32xf32>
    %cst_544 = arith.constant dense<0.000000e+00> : vector<1x32xf32>
    %574 = tpu.matmul %571, %573, %cst_544 {dimension_numbers = #tpu.dot_dimension_numbers<[1], [0], [0], [1], [0, 0, 1, 1], [], []>} : vector<1x9xf32>, vector<9x32xf32>, vector<1x32xf32> -> vector<1x32xf32>
    %575 = arith.addf %570, %574 : vector<1x32xf32>
    %576 = vector.extract_strided_slice %449 {offsets = [25, 0], sizes = [1, 9], strides = [1, 1]} : vector<32x9xf32> to vector<1x9xf32>
    %c25 = arith.constant 25 : index
    %c0_545 = arith.constant 0 : index
    %c0_546 = arith.constant 0 : index
    %577 = vector.load %arg10[%c25, %c0_545, %c0_546] : memref<32x9x32xf32, #tpu.memory_space<vmem>>, vector<1x9x32xf32>
    %578 = vector.shape_cast %577 : vector<1x9x32xf32> to vector<9x32xf32>
    %cst_547 = arith.constant dense<0.000000e+00> : vector<1x32xf32>
    %579 = tpu.matmul %576, %578, %cst_547 {dimension_numbers = #tpu.dot_dimension_numbers<[1], [0], [0], [1], [0, 0, 1, 1], [], []>} : vector<1x9xf32>, vector<9x32xf32>, vector<1x32xf32> -> vector<1x32xf32>
    %580 = arith.addf %575, %579 : vector<1x32xf32>
    %581 = vector.extract_strided_slice %449 {offsets = [26, 0], sizes = [1, 9], strides = [1, 1]} : vector<32x9xf32> to vector<1x9xf32>
    %c26 = arith.constant 26 : index
    %c0_548 = arith.constant 0 : index
    %c0_549 = arith.constant 0 : index
    %582 = vector.load %arg10[%c26, %c0_548, %c0_549] : memref<32x9x32xf32, #tpu.memory_space<vmem>>, vector<1x9x32xf32>
    %583 = vector.shape_cast %582 : vector<1x9x32xf32> to vector<9x32xf32>
    %cst_550 = arith.constant dense<0.000000e+00> : vector<1x32xf32>
    %584 = tpu.matmul %581, %583, %cst_550 {dimension_numbers = #tpu.dot_dimension_numbers<[1], [0], [0], [1], [0, 0, 1, 1], [], []>} : vector<1x9xf32>, vector<9x32xf32>, vector<1x32xf32> -> vector<1x32xf32>
    %585 = arith.addf %580, %584 : vector<1x32xf32>
    %586 = vector.extract_strided_slice %449 {offsets = [27, 0], sizes = [1, 9], strides = [1, 1]} : vector<32x9xf32> to vector<1x9xf32>
    %c27 = arith.constant 27 : index
    %c0_551 = arith.constant 0 : index
    %c0_552 = arith.constant 0 : index
    %587 = vector.load %arg10[%c27, %c0_551, %c0_552] : memref<32x9x32xf32, #tpu.memory_space<vmem>>, vector<1x9x32xf32>
    %588 = vector.shape_cast %587 : vector<1x9x32xf32> to vector<9x32xf32>
    %cst_553 = arith.constant dense<0.000000e+00> : vector<1x32xf32>
    %589 = tpu.matmul %586, %588, %cst_553 {dimension_numbers = #tpu.dot_dimension_numbers<[1], [0], [0], [1], [0, 0, 1, 1], [], []>} : vector<1x9xf32>, vector<9x32xf32>, vector<1x32xf32> -> vector<1x32xf32>
    %590 = arith.addf %585, %589 : vector<1x32xf32>
    %591 = vector.extract_strided_slice %449 {offsets = [28, 0], sizes = [1, 9], strides = [1, 1]} : vector<32x9xf32> to vector<1x9xf32>
    %c28 = arith.constant 28 : index
    %c0_554 = arith.constant 0 : index
    %c0_555 = arith.constant 0 : index
    %592 = vector.load %arg10[%c28, %c0_554, %c0_555] : memref<32x9x32xf32, #tpu.memory_space<vmem>>, vector<1x9x32xf32>
    %593 = vector.shape_cast %592 : vector<1x9x32xf32> to vector<9x32xf32>
    %cst_556 = arith.constant dense<0.000000e+00> : vector<1x32xf32>
    %594 = tpu.matmul %591, %593, %cst_556 {dimension_numbers = #tpu.dot_dimension_numbers<[1], [0], [0], [1], [0, 0, 1, 1], [], []>} : vector<1x9xf32>, vector<9x32xf32>, vector<1x32xf32> -> vector<1x32xf32>
    %595 = arith.addf %590, %594 : vector<1x32xf32>
    %596 = vector.extract_strided_slice %449 {offsets = [29, 0], sizes = [1, 9], strides = [1, 1]} : vector<32x9xf32> to vector<1x9xf32>
    %c29 = arith.constant 29 : index
    %c0_557 = arith.constant 0 : index
    %c0_558 = arith.constant 0 : index
    %597 = vector.load %arg10[%c29, %c0_557, %c0_558] : memref<32x9x32xf32, #tpu.memory_space<vmem>>, vector<1x9x32xf32>
    %598 = vector.shape_cast %597 : vector<1x9x32xf32> to vector<9x32xf32>
    %cst_559 = arith.constant dense<0.000000e+00> : vector<1x32xf32>
    %599 = tpu.matmul %596, %598, %cst_559 {dimension_numbers = #tpu.dot_dimension_numbers<[1], [0], [0], [1], [0, 0, 1, 1], [], []>} : vector<1x9xf32>, vector<9x32xf32>, vector<1x32xf32> -> vector<1x32xf32>
    %600 = arith.addf %595, %599 : vector<1x32xf32>
    %601 = vector.extract_strided_slice %449 {offsets = [30, 0], sizes = [1, 9], strides = [1, 1]} : vector<32x9xf32> to vector<1x9xf32>
    %c30 = arith.constant 30 : index
    %c0_560 = arith.constant 0 : index
    %c0_561 = arith.constant 0 : index
    %602 = vector.load %arg10[%c30, %c0_560, %c0_561] : memref<32x9x32xf32, #tpu.memory_space<vmem>>, vector<1x9x32xf32>
    %603 = vector.shape_cast %602 : vector<1x9x32xf32> to vector<9x32xf32>
    %cst_562 = arith.constant dense<0.000000e+00> : vector<1x32xf32>
    %604 = tpu.matmul %601, %603, %cst_562 {dimension_numbers = #tpu.dot_dimension_numbers<[1], [0], [0], [1], [0, 0, 1, 1], [], []>} : vector<1x9xf32>, vector<9x32xf32>, vector<1x32xf32> -> vector<1x32xf32>
    %605 = arith.addf %600, %604 : vector<1x32xf32>
    %606 = vector.extract_strided_slice %449 {offsets = [31, 0], sizes = [1, 9], strides = [1, 1]} : vector<32x9xf32> to vector<1x9xf32>
    %c31 = arith.constant 31 : index
    %c0_563 = arith.constant 0 : index
    %c0_564 = arith.constant 0 : index
    %607 = vector.load %arg10[%c31, %c0_563, %c0_564] : memref<32x9x32xf32, #tpu.memory_space<vmem>>, vector<1x9x32xf32>
    %608 = vector.shape_cast %607 : vector<1x9x32xf32> to vector<9x32xf32>
    %cst_565 = arith.constant dense<0.000000e+00> : vector<1x32xf32>
    %609 = tpu.matmul %606, %608, %cst_565 {dimension_numbers = #tpu.dot_dimension_numbers<[1], [0], [0], [1], [0, 0, 1, 1], [], []>} : vector<1x9xf32>, vector<9x32xf32>, vector<1x32xf32> -> vector<1x32xf32>
    %610 = arith.addf %605, %609 : vector<1x32xf32>
    %cst_566 = arith.constant dense<0.000000e+00> : vector<1xf32>
    %611 = vector.multi_reduction <add>, %610, %cst_566 [1] : vector<1x32xf32> to vector<1xf32>
    %612 = vector.shape_cast %611 : vector<1xf32> to vector<1x1xf32>
    %cst_567 = arith.constant 3.200000e+01 : f32
    %613 = vector.broadcast %cst_567 : f32 to vector<1x1xf32>
    %614 = arith.divf %612, %613 : vector<1x1xf32>
    %615 = vector.broadcast %614 : vector<1x1xf32> to vector<1x32xf32>
    %616 = arith.subf %610, %615 : vector<1x32xf32>
    %617 = arith.mulf %616, %616 : vector<1x32xf32>
    %cst_568 = arith.constant dense<0.000000e+00> : vector<1xf32>
    %618 = vector.multi_reduction <add>, %617, %cst_568 [1] : vector<1x32xf32> to vector<1xf32>
    %619 = vector.shape_cast %618 : vector<1xf32> to vector<1x1xf32>
    %cst_569 = arith.constant 3.200000e+01 : f32
    %620 = vector.broadcast %cst_569 : f32 to vector<1x1xf32>
    %621 = arith.divf %619, %620 : vector<1x1xf32>
    %622 = vector.broadcast %614 : vector<1x1xf32> to vector<1x32xf32>
    %623 = arith.subf %610, %622 : vector<1x32xf32>
    %cst_570 = arith.constant 9.99999974E-6 : f32
    %624 = vector.broadcast %cst_570 : f32 to vector<1x1xf32>
    %625 = arith.addf %621, %624 : vector<1x1xf32>
    %626 = math.rsqrt %625 : vector<1x1xf32>
    %627 = vector.broadcast %626 : vector<1x1xf32> to vector<1x32xf32>
    %628 = arith.mulf %623, %627 : vector<1x32xf32>
    %c0_571 = arith.constant 0 : index
    %c0_572 = arith.constant 0 : index
    %629 = vector.load %arg12[%c0_571, %c0_572] : memref<1x32xf32, #tpu.memory_space<vmem>>, vector<1x32xf32>
    %630 = arith.mulf %628, %629 : vector<1x32xf32>
    %c0_573 = arith.constant 0 : index
    %c0_574 = arith.constant 0 : index
    %631 = vector.load %arg13[%c0_573, %c0_574] : memref<1x32xf32, #tpu.memory_space<vmem>>, vector<1x32xf32>
    %632 = arith.addf %630, %631 : vector<1x32xf32>
    %633 = math.tanh %632 : vector<1x32xf32>
    %c0_575 = arith.constant 0 : index
    %c0_576 = arith.constant 0 : index
    %c0_577 = arith.constant 0 : index
    %634 = vector.load %arg14[%c0_575, %c0_576, %c0_577] : memref<1x1x32xf32, #tpu.memory_space<vmem>>, vector<1x1x32xf32>
    %635 = vector.shape_cast %634 : vector<1x1x32xf32> to vector<1x32xf32>
    %636 = vector.shape_cast %633 : vector<1x32xf32> to vector<1x1x32xf32>
    tpu.vector_store %arg14[%c0_575, %c0_576, %c0_577], %636 {strides = array<i32>} : memref<1x1x32xf32, #tpu.memory_space<vmem>>, vector<1x1x32xf32>,
    return
  }
  func.func @transform_0(%arg0: i32) -> (i32, i32, i32, i32, i32) {
    %c0_i32 = arith.constant 0 : i32
    %c0_i32_0 = arith.constant 0 : i32
    %c0_i32_1 = arith.constant 0 : i32
    %c0_i32_2 = arith.constant 0 : i32
    %c0_i32_3 = arith.constant 0 : i32
    return %arg0, %c0_i32, %c0_i32_0, %c0_i32_1, %c0_i32_2 : i32, i32, i32, i32, i32
  }
  func.func @transform_1(%arg0: i32) -> (i32, i32) {
    %c0_i32 = arith.constant 0 : i32
    %c0_i32_0 = arith.constant 0 : i32
    %c0_i32_1 = arith.constant 0 : i32
    return %c0_i32, %c0_i32_0 : i32, i32
  }
  func.func @transform_2(%arg0: i32) -> (i32, i32) {
    %c0_i32 = arith.constant 0 : i32
    %c0_i32_0 = arith.constant 0 : i32
    %c0_i32_1 = arith.constant 0 : i32
    return %c0_i32, %c0_i32_0 : i32, i32
  }
  func.func @transform_3(%arg0: i32) -> (i32, i32) {
    %c0_i32 = arith.constant 0 : i32
    %c0_i32_0 = arith.constant 0 : i32
    %c0_i32_1 = arith.constant 0 : i32
    return %c0_i32, %c0_i32_0 : i32, i32
  }
  func.func @transform_4(%arg0: i32) -> (i32, i32) {
    %c0_i32 = arith.constant 0 : i32
    %c0_i32_0 = arith.constant 0 : i32
    %c0_i32_1 = arith.constant 0 : i32
    return %c0_i32, %c0_i32_0 : i32, i32
  }
  func.func @transform_5(%arg0: i32) -> (i32, i32) {
    %c0_i32 = arith.constant 0 : i32
    %c0_i32_0 = arith.constant 0 : i32
    %c0_i32_1 = arith.constant 0 : i32
    return %c0_i32, %c0_i32_0 : i32, i32
  }
  func.func @transform_6(%arg0: i32) -> (i32, i32) {
    %c0_i32 = arith.constant 0 : i32
    %c0_i32_0 = arith.constant 0 : i32
    %c0_i32_1 = arith.constant 0 : i32
    return %c0_i32, %c0_i32_0 : i32, i32
  }
  func.func @transform_7(%arg0: i32) -> (i32, i32) {
    %c0_i32 = arith.constant 0 : i32
    %c0_i32_0 = arith.constant 0 : i32
    %c0_i32_1 = arith.constant 0 : i32
    return %c0_i32, %c0_i32_0 : i32, i32
  }
  func.func @transform_8(%arg0: i32) -> (i32, i32) {
    %c0_i32 = arith.constant 0 : i32
    %c0_i32_0 = arith.constant 0 : i32
    %c0_i32_1 = arith.constant 0 : i32
    return %c0_i32, %c0_i32_0 : i32, i32
  }
  func.func @transform_9(%arg0: i32) -> (i32, i32, i32) {
    %c0_i32 = arith.constant 0 : i32
    %c0_i32_0 = arith.constant 0 : i32
    %c0_i32_1 = arith.constant 0 : i32
    %c0_i32_2 = arith.constant 0 : i32
    return %c0_i32, %c0_i32_0, %c0_i32_1 : i32, i32, i32
  }
  func.func @transform_10(%arg0: i32) -> (i32, i32) {
    %c0_i32 = arith.constant 0 : i32
    %c0_i32_0 = arith.constant 0 : i32
    %c0_i32_1 = arith.constant 0 : i32
    return %c0_i32, %c0_i32_0 : i32, i32
  }
  func.func @transform_11(%arg0: i32) -> (i32, i32) {
    %c0_i32 = arith.constant 0 : i32
    %c0_i32_0 = arith.constant 0 : i32
    %c0_i32_1 = arith.constant 0 : i32
    return %c0_i32, %c0_i32_0 : i32, i32
  }
  func.func @transform_12(%arg0: i32) -> (i32, i32) {
    %c0_i32 = arith.constant 0 : i32
    %c0_i32_0 = arith.constant 0 : i32
    %c0_i32_1 = arith.constant 0 : i32
    return %c0_i32, %c0_i32_0 : i32, i32
  }
  func.func @transform_13(%arg0: i32) -> (i32, i32, i32) {
    %c0_i32 = arith.constant 0 : i32
    %c0_i32_0 = arith.constant 0 : i32
    %c0_i32_1 = arith.constant 0 : i32
    return %arg0, %c0_i32, %c0_i32_0 : i32, i32, i32
  }
}

</mosaic_0001>

<bundles_post_ra>
// kernel: encoder_forward.1
= control target key start
LH: loop header
LB: loop body
LE: loop exit
PB: predicated region body
PF: predicated region fallthrough
CT: control target
= control target key end

     0   :  { %s12917_s0 = inlined_call_operand.vmem [shape: f32[2,4,10,8,10], index: 0, kind: input, shape index: {}]   ;;  %s12918_s1 = inlined_call_operand.vmem [shape: f32[32,72], index: 1, kind: input, shape index: {}]   ;;  %s12919_s2 = inlined_call_operand.vmem [shape: f32[32,1], index: 2, kind: input, shape index: {}]   ;;  %s12920_s3 = inlined_call_operand.vmem [shape: f32[32,288], index: 3, kind: input, shape index: {}]   ;;  %s12921_s4 = inlined_call_operand.vmem [shape: f32[32,1], index: 4, kind: input, shape index: {}]   ;;  %s12922_s5 = inlined_call_operand.vmem [shape: f32[32,288], index: 5, kind: input, shape index: {}]   ;;  %s12923_s6 = inlined_call_operand.vmem [shape: f32[32,1], index: 6, kind: input, shape index: {}]   ;;  %s12924_s7 = inlined_call_operand.vmem [shape: f32[32,288], index: 7, kind: input, shape index: {}]   ;;  %s12925_s8 = inlined_call_operand.vmem [shape: f32[32,1], index: 8, kind: input, shape index: {}]   ;;  %s12926_s9 = inlined_call_operand.vmem [shape: f32[32,9,32], index: 9, kind: input, shape index: {}]   ;;  %s12927_s10 = inlined_call_operand.vmem [shape: f32[1,32], index: 10, kind: input, shape index: {}]   ;;  %s12928_s11 = inlined_call_operand.vmem [shape: f32[1,32], index: 11, kind: input, shape index: {}]   ;;  %s12929_s12 = inlined_call_operand.vmem [shape: f32[1,32], index: 12, kind: input, shape index: {}]   ;;  %s12930_s13 = inlined_call_operand.hbm [shape: f32[2,1,32], index: 13, kind: output, shape index: {}]  }
   0x1   :  { %12931 = sst [smem:[#allocation6_spill]] %s12917_s0 }
   0x2   :  { %12932 = sst [smem:[#allocation7_spill]] %s12918_s1 }
   0x3   :  { %18 = vsyncpa [#allocation3], 0 }
   0x4   :  { %20 = vsyncpa [#allocation3 + $0x1], 0  ;;  %s10935_s25 = smov 0   ;;  %s10937_s26 = smov 0  }
   0x5   :  { %s10939_s27 = smov 0   ;;  %s10941_s28 = smov 0  }
   0x6 LB: > { %s10956_s29 = sadd.s32 4294967295, %s10853_s28   ;;  %s7467_s30 = sadd.s32 4294967294, %s10853_s28   ;;  %s10853_s28 = sphi %s10941_s28, %s12944_s28   ;;  %s10849_s27 = sphi %s10939_s27, %s12943_s27   ;;  %s10845_s26 = sphi %s10937_s26, %s12942_s26   ;;  %s10841_s25 = sphi %s10935_s25, %s12941_s25  }
   0x7   : > { %s10960_s14 = sadd.s32 1, %s10853_s28   ;;  %s311_s15 = sadd.s32 1, %s10849_s27 }
   0x8   : > { %s308_s16 = ssub.s32 %s10853_s28, %s10960_s14  ;;  %p321_p0 = scmp.ne.s32.totalorder %s10849_s27, %s10845_s26 }
   0x9   : > { %p309_p1 = scmp.eq.s32.totalorder %s308_s16, 0  ;;  %p322_p2 = scmp.eq.s32.totalorder %s10956_s29, 1 }
   0xa   : > { %p327_p3 = scmp.ne.s32.totalorder %s10845_s26, %s10841_s25  ;;  %p328_p4 = scmp.eq.s32.totalorder %s7467_s30, 1 }
   0xb   : > { %s10971_s17 = scalar_select %p309_p1, %s10849_s27, %s311_s15  }
   0xc   : > { %p10973_p5 = por %p322_p2, %p321_p0  ;;  %p10977_p6 = por %p328_p4, %p327_p3 }
   0xd   : > { %12933 = sst [smem:[#allocation5_spill]] %s10971_s17  ;;  %p7470_p7 = scmp.ge.s32.totalorder %s10853_s28, 1 }
   0xe   : > { %p390_p8 = scmp.lt.s32.totalorder %s10853_s28, 3 }
  0x10   : > { %p391_p9 = pnand %p7470_p7, %p390_p8 }
  0x11   : > { %p433_p10 = scmp.lt.s32.totalorder (!%p391_p9), %s10956_s29, 1  ;;  %v10855_v0 = vmov (!%p391_p9), 0   ;;  %s12936_s0 = sld [smem:[#allocation6_spill]] (!%p391_p9)  ;;  %vm489_vm0 = vcmask (!%p391_p9), 588800   ;;  %v443_v41 = vld [vmem:[%s12919_s2 + $0x8] sm:$0xff] (!%p391_p9)  ;;  %v444_v42 = vld [vmem:[%s12919_s2 + $0x10] sm:$0xff] (!%p391_p9) }
  0x12   : > { %394 = sbr.rel (%p391_p9) target bundleno = 2598 (0xa26), region = 72  ;;  %10366 = vset.pattern.permute.xlu1 (!%p391_p9), %v10855_v0  ;;  %10365 = vset.pattern.permute.xlu0 (!%p391_p9), %v10855_v0  ;;  %s10856_s30 = smov (!%p391_p9), 127   ;;  %v442_v43 = vld [vmem:[%s12919_s2] sm:$0xff] (!%p391_p9)  ;;  %v445_v44 = vld [vmem:[%s12919_s2 + $0x18] sm:$0xff] (!%p391_p9)  ;;  %vm1551_vm1 = vcmask (!%p391_p9), 261120   ;;  %vm4823_vm2 = vcmask (!%p391_p9), 1040384  }
  0x13   : > { %s12937_s1 = sld [smem:[#allocation7_spill]] (!%p391_p9)  ;;  %vm10859_vm3 = vmmov (!%p391_p9), 1   ;;  %vm10861_vm5 = vmmov (!%p391_p9), 0   ;;  %vm4806_vm6 = vcmask (!%p391_p9), 23552   ;;  %vm4811_vm7 = vcmask (!%p391_p9), 48128  }
  0x14   : > { %vm12428_vm4 = vmpackc.low (!%p391_p9), %vm4823_vm2, %vm10859_vm3  ;;  %vm4819_vm8 = vcmask (!%p391_p9), 72704   ;;  %vm7378_vm9 = vcmask (!%p391_p9), 253952  }
  0x19   : > { %s434_s20 = scalar_select %p433_p10, %s10956_s29, 1  ;;  %v11054_v35 = vld [vmem:[%s12937_s1] sm:$0xff]  ;;  %v11115_v57 = vld [vmem:[%s12937_s1 + $0x8] sm:$0xff]  ;;  %v11121_v60 = vld [vmem:[%s12937_s1 + $0x10] sm:$0xff] }
  0x1a   : > { %8745 = vmatprep.mubr.msk.f32.mxu1 %vm489_vm0, %v11054_v35  ;;  %8793 = vmatprep.mubr.msk.f32.mxu0 %vm489_vm0, %v11054_v35  ;;  %v11132_v63 = vld [vmem:[%s12937_s1 + $0x18] sm:$0xff] }
  0x1b   : > { %s10316_s21 = smul.u32 320, %s434_s20 }
  0x1d   : > { %s10988_s24 = scalar_lea.vmem %s12936_s0, %s10316_s21  ;;  %s10860_s0 = smov 3  }
  0x1e   : > { %v446_v1 = vld [vmem:[%s10988_s24] sm:$0xff]  ;;  %v7475_v2 = vld [vmem:[%s10988_s24 + $0x8] sm:$0xff]  ;;  %v7476_v3 = vld [vmem:[%s10988_s24 + $0x58] sm:$0xff]  ;;  %s10863_s21 = smov 6  }
  0x1f   : > { %458 = vrot.lane.b32.xlu0 %v446_v1, %s10856_s30  ;;  %466 = vrot.lane.b32.xlu1 %v7475_v2, %s10856_s30  ;;  %v10995_v4 = vpack.c.bf16 %v7476_v3, %v7475_v2  ;;  %v10998_v5 = vld [vmem:[%s10988_s24 + $0xa0] sm:$0xff]  ;;  %v11001_v6 = vld [vmem:[%s10988_s24 + $0xa8] sm:$0xff] }
  0x20   : > { %v7483_v7 = vld [vmem:[%s10988_s24 + $0x10] sm:$0xff]  ;;  %v7484_v8 = vld [vmem:[%s10988_s24 + $0x60] sm:$0xff]  ;;  %v7491_v10 = vld [vmem:[%s10988_s24 + $0x18] sm:$0xff] }
  0x21   : > { %v11005_v9 = vpack.c.bf16 %v7484_v8, %v7483_v7  ;;  %v7492_v11 = vld [vmem:[%s10988_s24 + $0x68] sm:$0xff]  ;;  %v7499_v13 = vld [vmem:[%s10988_s24 + $0x20] sm:$0xff]  ;;  %v7500_v14 = vld [vmem:[%s10988_s24 + $0x70] sm:$0xff] }
  0x22   : > { %v11009_v12 = vpack.c.bf16 %v7492_v11, %v7491_v10  ;;  %v11017_v15 = vpack.c.bf16 %v7500_v14, %v7499_v13  ;;  %v11020_v16 = vld [vmem:[%s10988_s24 + $0xb0] sm:$0xff]  ;;  %v7507_v17 = vld [vmem:[%s10988_s24 + $0x28] sm:$0xff]  ;;  %v7508_v18 = vld [vmem:[%s10988_s24 + $0x78] sm:$0xff] }
  0x23   : > { %462 = vrot.lane.b32.xlu0 %v10998_v5, %s10856_s30  ;;  %600 = vrot.lane.b32.xlu1 %v11001_v6, %s10856_s30  ;;  %v11025_v19 = vpack.c.bf16 %v7508_v18, %v7507_v17  ;;  %v7515_v20 = vld [vmem:[%s10988_s24 + $0x30] sm:$0xff]  ;;  %v7516_v21 = vld [vmem:[%s10988_s24 + $0x80] sm:$0xff] }
  0x24   : > { %9410 = vmatprep.subr.bf16.mxu0 %v11005_v9  ;;  %v11031_v22 = vld [vmem:[%s10988_s24 + $0xb8] sm:$0xff]  ;;  %v11033_v23 = vpack.c.bf16 %v7516_v21, %v7515_v20  ;;  %v7524_v25 = vld [vmem:[%s10988_s24 + $0x88] sm:$0xff]  ;;  %v7531_v27 = vld [vmem:[%s10988_s24 + $0x40] sm:$0xff] }
  0x25   : > { %9412 = vmatpush3.bf16.msra.mxu0 %v11005_v9  ;;  %v7523_v24 = vld [vmem:[%s10988_s24 + $0x38] sm:$0xff]  ;;  %v7532_v28 = vld [vmem:[%s10988_s24 + $0x90] sm:$0xff]  ;;  %v7539_v30 = vld [vmem:[%s10988_s24 + $0x48] sm:$0xff] }
  0x26   : > { %v11040_v26 = vpack.c.bf16 %v7524_v25, %v7523_v24  ;;  %v11044_v29 = vpack.c.bf16 %v7532_v28, %v7531_v27  ;;  %v7540_v31 = vld [vmem:[%s10988_s24 + $0x98] sm:$0xff]  ;;  %v7472_v32 = vld [vmem:[%s10988_s24 + $0x50] sm:$0xff]  ;;  %v11064_v36 = vld [vmem:[%s10988_s24 + $0xc0] sm:$0xff] }
  0x27   : > { %604 = vrot.lane.b32.xlu0 %v7483_v7, %s10856_s30  ;;  %705 = vrot.lane.b32.xlu1 %v11020_v16, %s10856_s30  ;;  %v11049_v33 = vpack.c.bf16 %v7540_v31, %v7539_v30  ;;  %v9377_v34 = vpack.c.bf16 %v7472_v32, %v446_v1  ;;  %v11070_v37 = vld [vmem:[%s10988_s24 + $0xc8] sm:$0xff]  ;;  %v11076_v38 = vld [vmem:[%s10988_s24 + $0xd0] sm:$0xff] }
  0x28   : > { %v11082_v39 = vld [vmem:[%s10988_s24 + $0xd8] sm:$0xff]  ;;  %v11088_v40 = vld [vmem:[%s10988_s24 + $0xe0] sm:$0xff]  ;;  %v7474_v48 = vld [vmem:[%s10988_s24 + $0xf0] sm:$0xff] }
  0x29   : > { %9378 = vmatprep.subr.bf16.mxu1 %v9377_v34  ;;  %v7490_v52 = vld [vmem:[%s10988_s24 + $0x100] sm:$0xff]  ;;  %v7482_v59 = vld [vmem:[%s10988_s24 + $0xf8] sm:$0xff]  ;;  %v7506_v3 = vld [vmem:[%s10988_s24 + $0x110] sm:$0xff] }
  0x2a   : > { %9380 = vmatpush3.bf16.msra.mxu1 %v9377_v34  ;;  %v7498_v8 = vld [vmem:[%s10988_s24 + $0x108] sm:$0xff]  ;;  %v7514_v21 = vld [vmem:[%s10988_s24 + $0x118] sm:$0xff] }
  0x2b   : > { %709 = vrot.lane.b32.xlu0 %v7491_v10, %s10856_s30  ;;  %810 = vrot.lane.b32.xlu1 %v11031_v22, %s10856_s30  ;;  %v7530_v32 = vld [vmem:[%s10988_s24 + $0x128] sm:$0xff] }
  0x2f   : > { %814 = vrot.lane.b32.xlu0 %v7499_v13, %s10856_s30  ;;  %915 = vrot.lane.b32.xlu1 %v11064_v36, %s10856_s30  ;;  %v7522_v13 = vld [vmem:[%s10988_s24 + $0x120] sm:$0xff] }
  0x33   : > { %1020 = vrot.lane.b32.xlu1 %v11070_v37, %s10856_s30  ;;  %919 = vrot.lane.b32.xlu0 %v7507_v17, %s10856_s30 }
  0x37   : > { %1125 = vrot.lane.b32.xlu1 %v11076_v38, %s10856_s30  ;;  %1024 = vrot.lane.b32.xlu0 %v7515_v20, %s10856_s30 }
  0x3b   : > { %1230 = vrot.lane.b32.xlu1 %v11082_v39, %s10856_s30  ;;  %1129 = vrot.lane.b32.xlu0 %v7523_v24, %s10856_s30 }
  0x3f   : > { %1335 = vrot.lane.b32.xlu1 %v11088_v40, %s10856_s30  ;;  %1234 = vrot.lane.b32.xlu0 %v7531_v27, %s10856_s30 }
  0x43   : > { %476 = vperm.xlu1 %10366, %v443_v41   ;;  %471 = vperm.xlu0 %10365, %v442_v43  }
  0x47   : > { %481 = vperm.xlu1 %10366, %v444_v42   ;;  %486 = vperm.xlu0 %10365, %v445_v44  }
  0x4b   : > { %1339 = vrot.lane.b32.xlu1 %v7539_v30, %s10856_s30 }
  0x91   : > { %v459_v45 = vpop.permute.xlu0 %458  ;;  %v467_v46 = vpop.permute.xlu1 %466 }
  0x92   : > { %v9381_v47 = vpack.c.bf16 %v10998_v5, %v459_v45  ;;  %v9397_v61 = vpack.c.bf16 %v11001_v6, %v467_v46 }
  0x94   : > { %9382 = vmatprep.subr.bf16.mxu1 %v9381_v47 }
  0x95   : > { %v463_v49 = vpop.permute.xlu0 %462  ;;  %9384 = vmatpush3.bf16.msra.mxu1 %v9381_v47  ;;  %v601_v50 = vpop.permute.xlu1 %600 }
  0x96   : > { %v9385_v51 = vpack.c.bf16 %v463_v49, %v7474_v48  ;;  %v9401_v0 = vpack.c.bf16 %v601_v50, %v7482_v59 }
  0x98   : > { %9386 = vmatprep.subr.bf16.mxu1 %v9385_v51 }
  0x99   : > { %v605_v53 = vpop.permute.xlu0 %604  ;;  %9388 = vmatpush3.bf16.msra.mxu1 %v9385_v51  ;;  %v706_v54 = vpop.permute.xlu1 %705 }
  0x9a   : > { %9390 = vmatprep.subr.bf16.mxu1 %v10995_v4  ;;  %v9413_v55 = vpack.c.bf16 %v11020_v16, %v605_v53  ;;  %v9417_v56 = vpack.c.bf16 %v706_v54, %v7490_v52 }
  0x9c   : > { %9414 = vmatprep.subr.bf16.mxu0 %v9413_v55 }
  0x9d   : > { %9392 = vmatpush3.bf16.msra.mxu1 %v10995_v4  ;;  %9416 = vmatpush3.bf16.msra.mxu0 %v9413_v55  ;;  %v710_v58 = vpop.permute.xlu0 %709  ;;  %v811_v62 = vpop.permute.xlu1 %810 }
  0x9e   : > { %8743 = vmatprep.subr.mxu1 %v467_v46  ;;  %9418 = vmatprep.subr.bf16.mxu0 %v9417_v56  ;;  %v9429_v6 = vpack.c.bf16 %v11031_v22, %v710_v58  ;;  %v9433_v10 = vpack.c.bf16 %v811_v62, %v7498_v8 }
  0xa1   : > { %8744 = vmatpush3.msra.mxu1 %v467_v46  ;;  %9420 = vmatpush3.bf16.msra.mxu0 %v9417_v56  ;;  %v11137_v1 = vpop.permute.xlu0 %814 }
  0xa2   : > { %8746 = vmatmul.mubr.msk.f32.vlgmr.msra.gmra.mrb[0].mxu1 %vm489_vm0, %v11115_v57  ;;  %9394 = vmatprep.subr.bf16.mxu1 %v10995_v4  ;;  %v9445_v2 = vpack.c.bf16 %v11064_v36, %v11137_v1 }
  0xa3   : > { %9396 = vmatpush3.bf16.msra.mxu1 %v10995_v4  ;;  %9422 = vmatprep.subr.bf16.mxu0 %v11009_v12  ;;  %v916_v4 = vpop.permute.xlu1 %915 }
  0xa4   : > { %9398 = vmatprep.subr.bf16.mxu1 %v9397_v61  ;;  %8748 = vmatprep.mubr.msk.f32.mxu1 %vm489_vm0, %v11121_v60  ;;  %v9449_v5 = vpack.c.bf16 %v916_v4, %v7506_v3 }
  0xa5   : > { %9424 = vmatpush3.bf16.msra.mxu0 %v11009_v12  ;;  %v920_v7 = vpop.permute.xlu0 %919 }
  0xa6   : > { %8791 = vmatprep.subr.mxu0 %v710_v58  ;;  %8749 = vmatmul.mubr.msk.f32.gmra.mrb[2].mxu1 %vm489_vm0, %v11132_v63  ;;  %v9461_v18 = vpack.c.bf16 %v11070_v37, %v920_v7 }
  0xa7   : > { %9400 = vmatpush3.bf16.msra.mxu1 %v9397_v61  ;;  %8769 = vmatprep.mubr.msk.f32.mxu1 %vm489_vm0, %v11054_v35 }
  0xa8   : > { %9402 = vmatprep.subr.bf16.mxu1 %v9401_v0 }
  0xa9   : > { %8792 = vmatpush3.msra.mxu0 %v710_v58  ;;  %v11170_v11 = vpop.permute.xlu0 %1024 }
  0xaa   : > { %8794 = vmatmul.mubr.msk.f32.vlgmr.msra.gmra.mrb[0].mxu0 %vm489_vm0, %v11115_v57  ;;  %9442 = vmatprep.subr.bf16.mxu0 %v11017_v15 }
  0xab   : > { %9444 = vmatpush3.bf16.msra.mxu0 %v11017_v15  ;;  %9404 = vmatpush3.bf16.msra.mxu1 %v9401_v0 }
  0xac   : > { %8796 = vmatprep.mubr.msk.f32.mxu0 %vm489_vm0, %v11121_v60  ;;  %9406 = vmatprep.subr.bf16.mxu1 %v11005_v9 }
  0xad   : > { %9446 = vmatprep.subr.bf16.mxu0 %v9445_v2  ;;  %v1130_v20 = vpop.permute.xlu0 %1129 }
  0xae   : > { %8797 = vmatmul.mubr.msk.f32.gmra.mrb[2].mxu0 %vm489_vm0, %v11132_v63  ;;  %v9493_v31 = vpack.c.bf16 %v11082_v39, %v1130_v20 }
  0xaf   : > { %9408 = vmatpush3.bf16.msra.mxu1 %v11005_v9  ;;  %9448 = vmatpush3.bf16.msra.mxu0 %v9445_v2  ;;  %v1021_v9 = vpop.permute.xlu1 %1020 }
  0xb0   : > { %8767 = vmatprep.subr.mxu1 %v605_v53  ;;  %9450 = vmatprep.subr.bf16.mxu0 %v9449_v5  ;;  %v9465_v22 = vpack.c.bf16 %v1021_v9, %v7514_v21 }
  0xb1   : > { %8841 = vmatprep.mubr.msk.f32.mxu0 %vm489_vm0, %v11054_v35  ;;  %v1235_v24 = vpop.permute.xlu0 %1234 }
  0xb2   : > { %v9509_v25 = vpack.c.bf16 %v11088_v40, %v1235_v24 }
  0xb3   : > { %8768 = vmatpush3.msra.mxu1 %v605_v53  ;;  %9452 = vmatpush3.bf16.msra.mxu0 %v9449_v5  ;;  %v1126_v14 = vpop.permute.xlu1 %1125 }
  0xb4   : > { %8770 = vmatmul.mubr.msk.f32.vlgmr.msra.gmra.mrb[4].mxu1 %vm489_vm0, %v11115_v57  ;;  %9426 = vmatprep.subr.bf16.mxu1 %v11009_v12  ;;  %v9481_v16 = vpack.c.bf16 %v1126_v14, %v7522_v13 }
  0xb5   : > { %9428 = vmatpush3.bf16.msra.mxu1 %v11009_v12  ;;  %9454 = vmatprep.subr.bf16.mxu0 %v11025_v19  ;;  %v9477_v12 = vpack.c.bf16 %v11076_v38, %v11170_v11 }
  0xb6   : > { %8772 = vmatprep.mubr.msk.f32.mxu1 %vm489_vm0, %v11121_v60  ;;  %9430 = vmatprep.subr.bf16.mxu1 %v9429_v6 }
  0xb7   : > { %9456 = vmatpush3.bf16.msra.mxu0 %v11025_v19  ;;  %v1231_v17 = vpop.permute.xlu1 %1230 }
  0xb8   : > { %8773 = vmatmul.mubr.msk.f32.gmra.mrb[6].mxu1 %vm489_vm0, %v11132_v63  ;;  %8839 = vmatprep.subr.mxu0 %v920_v7  ;;  %v9497_v34 = vpack.c.bf16 %v1231_v17, %v7530_v32 }
  0xb9   : > { %9432 = vmatpush3.bf16.msra.mxu1 %v9429_v6  ;;  %8817 = vmatprep.mubr.msk.f32.mxu1 %vm489_vm0, %v11054_v35 }
  0xba   : > { %9434 = vmatprep.subr.bf16.mxu1 %v9433_v10 }
  0xbb   : > { %8840 = vmatpush3.msra.mxu0 %v920_v7 }
  0xbc   : > { %8842 = vmatmul.mubr.msk.f32.vlgmr.msra.gmra.mrb[4].mxu0 %vm489_vm0, %v11115_v57  ;;  %9474 = vmatprep.subr.bf16.mxu0 %v11033_v23 }
  0xbd   : > { %9476 = vmatpush3.bf16.msra.mxu0 %v11033_v23  ;;  %9436 = vmatpush3.bf16.msra.mxu1 %v9433_v10 }
  0xbe   : > { %8844 = vmatprep.mubr.msk.f32.mxu0 %vm489_vm0, %v11121_v60  ;;  %9438 = vmatprep.subr.bf16.mxu1 %v11017_v15 }
  0xbf   : > { %9478 = vmatprep.subr.bf16.mxu0 %v9477_v12 }
  0xc0   : > { %8845 = vmatmul.mubr.msk.f32.gmra.mrb[6].mxu0 %vm489_vm0, %v11132_v63 }
  0xc1   : > { %9440 = vmatpush3.bf16.msra.mxu1 %v11017_v15  ;;  %9480 = vmatpush3.bf16.msra.mxu0 %v9477_v12  ;;  %v1336_v15 = vpop.permute.xlu1 %1335 }
  0xc2   : > { %8815 = vmatprep.subr.mxu1 %v11137_v1  ;;  %9482 = vmatprep.subr.bf16.mxu0 %v9481_v16 }
  0xc3   : > { %8889 = vmatprep.mubr.msk.f32.mxu0 %vm489_vm0, %v11054_v35 }
  0xc5   : > { %8816 = vmatpush3.msra.mxu1 %v11137_v1  ;;  %9484 = vmatpush3.bf16.msra.mxu0 %v9481_v16  ;;  %v11207_v27 = vpop.permute.xlu1 %476 }
  0xc6   : > { %8818 = vmatmul.mubr.msk.f32.vlgmr.msra.gmra.mrb[8].mxu1 %vm489_vm0, %v11115_v57  ;;  %9458 = vmatprep.subr.bf16.mxu1 %v11025_v19 }
  0xc7   : > { %9460 = vmatpush3.bf16.msra.mxu1 %v11025_v19  ;;  %9486 = vmatprep.subr.bf16.mxu0 %v11040_v26  ;;  %v7538_v19 = vld [vmem:[%s10988_s24 + $0x130] sm:$0xff]  ;;  %s10857_s24 = smov 126  }
  0xc8   : > { %8820 = vmatprep.mubr.msk.f32.mxu1 %vm489_vm0, %v11121_v60  ;;  %9462 = vmatprep.subr.bf16.mxu1 %v9461_v18  ;;  %v9513_v28 = vpack.c.bf16 %v1336_v15, %v7538_v19 }
  0xc9   : > { %9488 = vmatpush3.bf16.msra.mxu0 %v11040_v26  ;;  %v11219_v30 = vpop.permute.xlu1 %481 }
  0xca   : > { %8821 = vmatmul.mubr.msk.f32.gmra.mrb[10].mxu1 %vm489_vm0, %v11132_v63  ;;  %8887 = vmatprep.subr.mxu0 %v1130_v20 }
  0xcb   : > { %9464 = vmatpush3.bf16.msra.mxu1 %v9461_v18  ;;  %8865 = vmatprep.mubr.msk.f32.mxu1 %vm489_vm0, %v11054_v35 }
  0xcc   : > { %9466 = vmatprep.subr.bf16.mxu1 %v9465_v22 }
  0xcd   : > { %8888 = vmatpush3.msra.mxu0 %v1130_v20 }
  0xce   : > { %8890 = vmatmul.mubr.msk.f32.vlgmr.msra.gmra.mrb[8].mxu0 %vm489_vm0, %v11115_v57  ;;  %9506 = vmatprep.subr.bf16.mxu0 %v11044_v29 }
  0xcf   : > { %9508 = vmatpush3.bf16.msra.mxu0 %v11044_v29  ;;  %9468 = vmatpush3.bf16.msra.mxu1 %v9465_v22 }
  0xd0   : > { %8892 = vmatprep.mubr.msk.f32.mxu0 %vm489_vm0, %v11121_v60  ;;  %9470 = vmatprep.subr.bf16.mxu1 %v11033_v23 }
  0xd1   : > { %9510 = vmatprep.subr.bf16.mxu0 %v9509_v25 }
  0xd2   : > { %8893 = vmatmul.mubr.msk.f32.gmra.mrb[10].mxu0 %vm489_vm0, %v11132_v63 }
  0xd3   : > { %9472 = vmatpush3.bf16.msra.mxu1 %v11033_v23  ;;  %9512 = vmatpush3.bf16.msra.mxu0 %v9509_v25  ;;  %v1340_v23 = vpop.permute.xlu1 %1339 }
  0xd4   : > { %8863 = vmatprep.subr.mxu1 %v11170_v11  ;;  %9514 = vmatprep.subr.bf16.mxu0 %v9513_v28 }
  0xd5   : > { %8937 = vmatprep.mubr.msk.f32.mxu0 %vm489_vm0, %v11054_v35 }
  0xd7   : > { %8864 = vmatpush3.msra.mxu1 %v11170_v11  ;;  %9516 = vmatpush3.bf16.msra.mxu0 %v9513_v28 }
  0xd8   : > { %8866 = vmatmul.mubr.msk.f32.vlgmr.msra.gmra.mrb[12].mxu1 %vm489_vm0, %v11115_v57  ;;  %9490 = vmatprep.subr.bf16.mxu1 %v11040_v26 }
  0xd9   : > { %9492 = vmatpush3.bf16.msra.mxu1 %v11040_v26  ;;  %9518 = vmatprep.subr.bf16.mxu0 %v11049_v33  ;;  %v11253_v26 = vpop.permute.xlu0 %471 }
  0xda   : > { %8868 = vmatprep.mubr.msk.f32.mxu1 %vm489_vm0, %v11121_v60  ;;  %9494 = vmatprep.subr.bf16.mxu1 %v9493_v31 }
  0xdb   : > { %9520 = vmatpush3.bf16.msra.mxu0 %v11049_v33 }
  0xdc   : > { %8869 = vmatmul.mubr.msk.f32.gmra.mrb[14].mxu1 %vm489_vm0, %v11132_v63  ;;  %8935 = vmatprep.subr.mxu0 %v1340_v23 }
  0xdd   : > { %9496 = vmatpush3.bf16.msra.mxu1 %v9493_v31  ;;  %8913 = vmatprep.mubr.msk.f32.mxu1 %vm489_vm0, %v11054_v35 }
  0xde   : > { %9498 = vmatprep.subr.bf16.mxu1 %v9497_v34 }
  0xdf   : > { %8936 = vmatpush3.msra.mxu0 %v1340_v23 }
  0xe0   : > { %8938 = vmatmul.mubr.msk.f32.vlgmr.msra.gmra.mrb[12].mxu0 %vm489_vm0, %v11115_v57 }
  0xe1   : > { %9500 = vmatpush3.bf16.msra.mxu1 %v9497_v34  ;;  %8940 = vmatprep.mubr.msk.f32.mxu0 %vm489_vm0, %v11121_v60 }
  0xe2   : > { %9502 = vmatprep.subr.bf16.mxu1 %v11044_v29 }
  0xe4   : > { %8941 = vmatmul.mubr.msk.f32.gmra.mrb[14].mxu0 %vm489_vm0, %v11132_v63 }
  0xe5   : > { %9504 = vmatpush3.bf16.msra.mxu1 %v11044_v29  ;;  %v11257_v29 = vpop.permute.xlu0 %486 }
  0xe6   : > { %8911 = vmatprep.subr.mxu1 %v1235_v24 }
  0xe9   : > { %8912 = vmatpush3.msra.mxu1 %v1235_v24 }
  0xea   : > { %8914 = vmatmul.mubr.msk.f32.vlgmr.msra.gmra.mrb[16].mxu1 %vm489_vm0, %v11115_v57 }
  0xeb   : > { %8916 = vmatprep.mubr.msk.f32.mxu1 %vm489_vm0, %v11121_v60 }
  0xee   : > { %8917 = vmatmul.mubr.msk.f32.gmra.mrb[18].mxu1 %vm489_vm0, %v11132_v63 }
 0x175   : > { %v8747_v33 = vpop.f32.mrb[0].mxu1 }
 0x176   : > { %v574_v35 = vadd.f32 %v8747_v33, %v11207_v27  ;;  %v568_v36 = vpop.f32.mrb[1].mxu1 }
 0x177   : > { %v569_v37 = vadd.f32 %v568_v36, %v11253_v26 }
 0x178   : > { %v588_v38 = vmax.f32 %v574_v35, 0.0 }
 0x179   : > { %v587_v39 = vmax.f32 %v569_v37, 0.0  ;;  %v8750_v40 = vpop.f32.mrb[2].mxu1 }
 0x17a   : > { %v578_v41 = vpop.f32.mrb[3].mxu1  ;;  %v584_v42 = vadd.f32 %v8750_v40, %v11257_v29 }
 0x17b   : > { %v11260_v43 = vpack.c.bf16 %v588_v38, %v587_v39  ;;  %v579_v44 = vadd.f32 %v578_v41, %v11219_v30  ;;  %v11263_v45 = vpack.i.bf16 %v588_v38, %v587_v39 }
 0x17c   : > { %v590_v46 = vmax.f32 %v584_v42, 0.0 }
 0x17d   : > { %v8795_v47 = vpop.f32.mrb[0].mxu0  ;;  %v589_v48 = vmax.f32 %v579_v44, 0.0 }
 0x17e   : > { %v784_v49 = vadd.f32 %v8795_v47, %v11207_v27  ;;  %v778_v50 = vpop.f32.mrb[1].mxu0 }
 0x17f   : > { %v779_v51 = vadd.f32 %v778_v50, %v11253_v26  ;;  %v11267_v52 = vpack.c.bf16 %v590_v46, %v589_v48  ;;  %v11269_v53 = vpack.i.bf16 %v590_v46, %v589_v48 }
 0x180   : > { %v798_v54 = vmax.f32 %v784_v49, 0.0 }
 0x181   : > { %v797_v55 = vmax.f32 %v779_v51, 0.0  ;;  %v8798_v56 = vpop.f32.mrb[2].mxu0 }
 0x182   : > { %v788_v57 = vpop.f32.mrb[3].mxu0  ;;  %v794_v58 = vadd.f32 %v8798_v56, %v11257_v29 }
 0x183   : > { %v789_v59 = vadd.f32 %v788_v57, %v11219_v30  ;;  %v11273_v60 = vpack.i.bf16 %v798_v54, %v797_v55  ;;  %v11275_v61 = vpack.c.bf16 %v798_v54, %v797_v55 }
 0x184   : > { %v800_v62 = vmax.f32 %v794_v58, 0.0 }
 0x185   : > { %v799_v63 = vmax.f32 %v789_v59, 0.0 }
 0x187   : > { %v8771_v0 = vpop.f32.mrb[4].mxu1  ;;  %v11277_v1 = vpack.i.bf16 %v800_v62, %v799_v63  ;;  %v11279_v2 = vpack.c.bf16 %v800_v62, %v799_v63 }
 0x188   : > { %v679_v3 = vadd.f32 %v8771_v0, %v11207_v27  ;;  %v673_v4 = vpop.f32.mrb[5].mxu1 }
 0x189   : > { %v674_v5 = vadd.f32 %v673_v4, %v11253_v26 }
 0x18a   : > { %v693_v6 = vmax.f32 %v679_v3, 0.0 }
 0x18b   : > { %v692_v7 = vmax.f32 %v674_v5, 0.0  ;;  %v8774_v8 = vpop.f32.mrb[6].mxu1 }
 0x18c   : > { %v689_v9 = vadd.f32 %v8774_v8, %v11257_v29  ;;  %v683_v10 = vpop.f32.mrb[7].mxu1 }
 0x18d   : > { %v11284_v11 = vpack.c.bf16 %v693_v6, %v692_v7  ;;  %v684_v12 = vadd.f32 %v683_v10, %v11219_v30  ;;  %v10367_v13 = vpack.i.bf16 %v693_v6, %v692_v7 }
 0x18e   : > { %v695_v14 = vmax.f32 %v689_v9, 0.0  ;;  %v11345_v9 = vld [vmem:[%s12920_s3 + $0x10] sm:$0xff] }
 0x18f   : > { %v694_v16 = vmax.f32 %v684_v12, 0.0  ;;  %v8843_v17 = vpop.f32.mrb[4].mxu0  ;;  %10368 = vrot.lane.b32.xlu0 %v10367_v13, %s10856_s30  ;;  %8951 = vmatprep.mubr.msk.f32.mxu0 %vm1551_vm1, %v11345_v9 }
 0x190   : > { %v994_v18 = vadd.f32 %v8843_v17, %v11207_v27  ;;  %v988_v20 = vpop.f32.mrb[5].mxu0 }
 0x191   : > { %v11289_v21 = vpack.c.bf16 %v695_v14, %v694_v16  ;;  %v989_v15 = vadd.f32 %v988_v20, %v11253_v26  ;;  %v10372_v22 = vpack.i.bf16 %v695_v14, %v694_v16 }
 0x192   : > { %v1008_v24 = vmax.f32 %v994_v18, 0.0 }
 0x193   : > { %v1007_v19 = vmax.f32 %v989_v15, 0.0  ;;  %v8846_v25 = vpop.f32.mrb[6].mxu0  ;;  %10373 = vrot.lane.b32.xlu1 %v10372_v22, %s10856_s30  ;;  %10378 = vrot.lane.b32.xlu0 %v10367_v13, %s10857_s24 }
 0x194   : > { %v1004_v28 = vadd.f32 %v8846_v25, %v11257_v29  ;;  %v998_v31 = vpop.f32.mrb[7].mxu0 }
 0x195   : > { %v11295_v32 = vpack.c.bf16 %v1008_v24, %v1007_v19  ;;  %v999_v23 = vadd.f32 %v998_v31, %v11219_v30  ;;  %v11298_v34 = vpack.i.bf16 %v1008_v24, %v1007_v19 }
 0x196   : > { %v1010_v33 = vmax.f32 %v1004_v28, 0.0 }
 0x197   : > { %v1009_v35 = vmax.f32 %v999_v23, 0.0  ;;  %10388 = vrot.lane.b32.xlu0 %v10372_v22, %s10857_s24  ;;  %10383 = vrot.lane.b32.xlu1 %v11263_v45, %s10856_s30 }
 0x199   : > { %v11303_v36 = vpack.c.bf16 %v1010_v33, %v1009_v35  ;;  %v8819_v37 = vpop.f32.mrb[8].mxu1  ;;  %v11305_v38 = vpack.i.bf16 %v1010_v33, %v1009_v35 }
 0x19a   : > { %v889_v39 = vadd.f32 %v8819_v37, %v11207_v27  ;;  %v883_v40 = vpop.f32.mrb[9].mxu1 }
 0x19b   : > { %v884_v41 = vadd.f32 %v883_v40, %v11253_v26  ;;  %10398 = vrot.lane.b32.xlu0 %v11263_v45, %s10857_s24  ;;  %10393 = vrot.lane.b32.xlu1 %v11269_v53, %s10856_s30 }
 0x19c   : > { %v903_v42 = vmax.f32 %v889_v39, 0.0 }
 0x19d   : > { %v902_v44 = vmax.f32 %v884_v41, 0.0  ;;  %v8822_v46 = vpop.f32.mrb[10].mxu1 }
 0x19e   : > { %v899_v47 = vadd.f32 %v8822_v46, %v11257_v29  ;;  %v893_v48 = vpop.f32.mrb[11].mxu1 }
 0x19f   : > { %v11314_v49 = vpack.c.bf16 %v903_v42, %v902_v44  ;;  %v894_v50 = vadd.f32 %v893_v48, %v11219_v30  ;;  %10408 = vrot.lane.b32.xlu0 %v11273_v60, %s10856_s30  ;;  %10403 = vrot.lane.b32.xlu1 %v11269_v53, %s10857_s24  ;;  %v10427_v45 = vpack.i.bf16 %v903_v42, %v902_v44  ;;  %v11332_v53 = vld [vmem:[%s12920_s3 + $0x8] sm:$0xff] }
 0x1a0   : > { %v905_v51 = vmax.f32 %v899_v47, 0.0  ;;  %1628 = vmatprep.mubr.f32.mxu1 %v11332_v53 }
 0x1a1   : > { %v904_v54 = vmax.f32 %v894_v50, 0.0  ;;  %v8891_v55 = vpop.f32.mrb[8].mxu0 }
 0x1a2   : > { %v1204_v56 = vadd.f32 %v8891_v55, %v11207_v27  ;;  %v1198_v57 = vpop.f32.mrb[9].mxu0 }
 0x1a3   : > { %v11322_v58 = vpack.c.bf16 %v905_v51, %v904_v54  ;;  %v1199_v59 = vadd.f32 %v1198_v57, %v11253_v26  ;;  %10418 = vrot.lane.b32.xlu0 %v11273_v60, %s10857_s24  ;;  %10413 = vrot.lane.b32.xlu1 %v11277_v1, %s10856_s30  ;;  %v10432_v62 = vpack.i.bf16 %v905_v51, %v904_v54 }
 0x1a4   : > { %v1218_v63 = vmax.f32 %v1204_v56, 0.0 }
 0x1a5   : > { %v1217_v0 = vmax.f32 %v1199_v59, 0.0  ;;  %v8894_v3 = vpop.f32.mrb[10].mxu0 }
 0x1a6   : > { %v1214_v4 = vadd.f32 %v8894_v3, %v11257_v29  ;;  %v1208_v5 = vpop.f32.mrb[11].mxu0 }
 0x1a7   : > { %v11336_v6 = vpack.c.bf16 %v1218_v63, %v1217_v0  ;;  %v1209_v60 = vadd.f32 %v1208_v5, %v11219_v30  ;;  %10428 = vrot.lane.b32.xlu0 %v10427_v45, %s10856_s30  ;;  %10423 = vrot.lane.b32.xlu1 %v11277_v1, %s10857_s24  ;;  %v10487_v7 = vpack.i.bf16 %v1218_v63, %v1217_v0 }
 0x1a8   : > { %v1220_v8 = vmax.f32 %v1214_v4, 0.0 }
 0x1a9   : > { %v1219_v10 = vmax.f32 %v1209_v60, 0.0 }
 0x1ab   : > { %v11349_v12 = vpack.c.bf16 %v1220_v8, %v1219_v10  ;;  %v8867_v13 = vpop.f32.mrb[12].mxu1  ;;  %10438 = vrot.lane.b32.xlu0 %v10427_v45, %s10857_s24  ;;  %10433 = vrot.lane.b32.xlu1 %v10432_v62, %s10856_s30  ;;  %v10497_v1 = vpack.i.bf16 %v1220_v8, %v1219_v10 }
 0x1ac   : > { %v1099_v14 = vadd.f32 %v8867_v13, %v11207_v27  ;;  %v1093_v16 = vpop.f32.mrb[13].mxu1 }
 0x1ad   : > { %v1094_v17 = vadd.f32 %v1093_v16, %v11253_v26 }
 0x1ae   : > { %v1113_v18 = vmax.f32 %v1099_v14, 0.0 }
 0x1af   : > { %v1112_v20 = vmax.f32 %v1094_v17, 0.0  ;;  %v8870_v15 = vpop.f32.mrb[14].mxu1  ;;  %10448 = vrot.lane.b32.xlu0 %v11298_v34, %s10856_s30  ;;  %10443 = vrot.lane.b32.xlu1 %v10432_v62, %s10857_s24 }
 0x1b0   : > { %v1109_v22 = vadd.f32 %v8870_v15, %v11257_v29  ;;  %v1103_v24 = vpop.f32.mrb[15].mxu1 }
 0x1b1   : > { %v1104_v19 = vadd.f32 %v1103_v24, %v11219_v30  ;;  %v10467_v25 = vpack.i.bf16 %v1113_v18, %v1112_v20  ;;  %v11360_v28 = vpack.c.bf16 %v1113_v18, %v1112_v20 }
 0x1b2   : > { %v1115_v31 = vmax.f32 %v1109_v22, 0.0 }
 0x1b3   : > { %v1114_v23 = vmax.f32 %v1104_v19, 0.0  ;;  %v8939_v33 = vpop.f32.mrb[12].mxu0  ;;  %10458 = vrot.lane.b32.xlu0 %v11305_v38, %s10856_s30  ;;  %10453 = vrot.lane.b32.xlu1 %v11298_v34, %s10857_s24 }
 0x1b4   : > { %v1414_v35 = vadd.f32 %v8939_v33, %v11207_v27  ;;  %v1408_v37 = vpop.f32.mrb[13].mxu0 }
 0x1b5   : > { %v1409_v39 = vadd.f32 %v1408_v37, %v11253_v26  ;;  %v10472_v40 = vpack.i.bf16 %v1115_v31, %v1114_v23  ;;  %v11368_v41 = vpack.c.bf16 %v1115_v31, %v1114_v23 }
 0x1b6   : > { %v1428_v42 = vmax.f32 %v1414_v35, 0.0 }
 0x1b7   : > { %v1427_v44 = vmax.f32 %v1409_v39, 0.0  ;;  %v8942_v46 = vpop.f32.mrb[14].mxu0  ;;  %10468 = vrot.lane.b32.xlu0 %v10467_v25, %s10857_s24  ;;  %10463 = vrot.lane.b32.xlu1 %v11305_v38, %s10857_s24 }
 0x1b8   : > { %v1424_v47 = vadd.f32 %v8942_v46, %v11257_v29  ;;  %v1418_v48 = vpop.f32.mrb[15].mxu0 }
 0x1b9   : > { %v1419_v34 = vadd.f32 %v1418_v48, %v11219_v30  ;;  %v10527_v50 = vpack.i.bf16 %v1428_v42, %v1427_v44  ;;  %v11375_v45 = vpack.c.bf16 %v1428_v42, %v1427_v44 }
 0x1ba   : > { %v1430_v51 = vmax.f32 %v1424_v47, 0.0 }
 0x1bb   : > { %v1429_v54 = vmax.f32 %v1419_v34, 0.0  ;;  %10478 = vrot.lane.b32.xlu0 %v10467_v25, %s10856_s30  ;;  %10473 = vrot.lane.b32.xlu1 %v10472_v40, %s10857_s24 }
 0x1bd   : > { %v8915_v55 = vpop.f32.mrb[16].mxu1  ;;  %v10532_v56 = vpack.i.bf16 %v1430_v51, %v1429_v54  ;;  %v11379_v57 = vpack.c.bf16 %v1430_v51, %v1429_v54 }
 0x1be   : > { %v1309_v38 = vadd.f32 %v8915_v55, %v11207_v27  ;;  %v1303_v59 = vpop.f32.mrb[17].mxu1 }
 0x1bf   : > { %v1304_v62 = vadd.f32 %v1303_v59, %v11253_v26  ;;  %10488 = vrot.lane.b32.xlu0 %v10487_v7, %s10856_s30  ;;  %10483 = vrot.lane.b32.xlu1 %v10472_v40, %s10856_s30 }
 0x1c0   : > { %v1323_v63 = vmax.f32 %v1309_v38, 0.0 }
 0x1c1   : > { %v1322_v0 = vmax.f32 %v1304_v62, 0.0  ;;  %v8918_v3 = vpop.f32.mrb[18].mxu1 }
 0x1c2   : > { %v1319_v4 = vadd.f32 %v8918_v3, %v11257_v29  ;;  %v1313_v5 = vpop.f32.mrb[19].mxu1  ;;  %v1445_v29 = vld [vmem:[%s12921_s4 + $0x10] sm:$0xff] }
 0x1c3   : > { %v1314_v60 = vadd.f32 %v1313_v5, %v11219_v30  ;;  %10498 = vrot.lane.b32.xlu0 %v10497_v1, %s10856_s30  ;;  %10493 = vrot.lane.b32.xlu1 %v10487_v7, %s10857_s24  ;;  %v10507_v27 = vpack.i.bf16 %v1323_v63, %v1322_v0  ;;  %v11389_v10 = vpack.c.bf16 %v1323_v63, %v1322_v0  ;;  %v1443_v30 = vld [vmem:[%s12921_s4] sm:$0xff]  ;;  %v1444_v7 = vld [vmem:[%s12921_s4 + $0x8] sm:$0xff] }
 0x1c4   : > { %v1325_v8 = vmax.f32 %v1319_v4, 0.0 }
 0x1c5   : > { %v1324_v26 = vmax.f32 %v1314_v60, 0.0 }
 0x1c7   : > { %10508 = vrot.lane.b32.xlu0 %v10507_v27, %s10856_s30  ;;  %10503 = vrot.lane.b32.xlu1 %v10497_v1, %s10857_s24  ;;  %v10517_v13 = vpack.i.bf16 %v1325_v8, %v1324_v26  ;;  %v11393_v14 = vpack.c.bf16 %v1325_v8, %v1324_v26  ;;  %v1446_v1 = vld [vmem:[%s12921_s4 + $0x18] sm:$0xff] }
 0x1cb   : > { %10518 = vrot.lane.b32.xlu0 %v10517_v13, %s10856_s30  ;;  %10513 = vrot.lane.b32.xlu1 %v10507_v27, %s10857_s24 }
 0x1cf   : > { %10528 = vrot.lane.b32.xlu0 %v10527_v50, %s10856_s30  ;;  %10523 = vrot.lane.b32.xlu1 %v10517_v13, %s10857_s24 }
 0x1d3   : > { %10538 = vrot.lane.b32.xlu0 %v10527_v50, %s10857_s24  ;;  %10533 = vrot.lane.b32.xlu1 %v10532_v56, %s10856_s30 }
 0x1d7   : > { %1533 = vperm.xlu0 %10365, %v1443_v30   ;;  %10543 = vrot.lane.b32.xlu1 %v10532_v56, %s10857_s24 }
 0x1db   : > { %1543 = vperm.xlu0 %10365, %v1445_v29   ;;  %1538 = vperm.xlu1 %10366, %v1444_v7  }
 0x1df   : > { %1548 = vperm.xlu1 %10366, %v1446_v1  }
 0x201   : > { %v10369_v16 = vpop.permute.xlu0 %10368 }
 0x202   : > { %v10371_v17 = vunpack.i.h.bf16 %v10369_v16  ;;  %v10370_v18 = vunpack.i.l.bf16 %v10369_v16 }
 0x204   : > { %v11414_v20 = vpack.c.bf16 %v10371_v17, %v10370_v18 }
 0x205   : > { %v10374_v15 = vpop.permute.xlu1 %10373  ;;  %v10379_v22 = vpop.permute.xlu0 %10378 }
 0x206   : > { %v10376_v24 = vunpack.i.h.bf16 %v10374_v15  ;;  %v10375_v19 = vunpack.i.l.bf16 %v10374_v15  ;;  %v10381_v25 = vunpack.i.h.bf16 %v10379_v22  ;;  %v10380_v31 = vunpack.i.l.bf16 %v10379_v22  ;;  %9522 = vmatprep.subr.bf16.mxu1 %v11414_v20 }
 0x207   : > { %9524 = vmatpush3.bf16.msra.mxu1 %v11260_v43 }
 0x208   : > { %v11418_v23 = vpack.c.bf16 %v10376_v24, %v10375_v19  ;;  %v11420_v37 = vpack.c.bf16 %v10381_v25, %v10380_v31  ;;  %v11453_v24 = vld [vmem:[%s12920_s3 + $0x28] sm:$0xff]  ;;  %v11459_v19 = vld [vmem:[%s12920_s3 + $0x40] sm:$0xff] }
 0x209   : > { %v10389_v33 = vpop.permute.xlu0 %10388  ;;  %v10384_v35 = vpop.permute.xlu1 %10383  ;;  %v11469_v31 = vld [vmem:[%s12920_s3] sm:$0xff] }
 0x20a   : > { %v10391_v39 = vunpack.i.h.bf16 %v10389_v33  ;;  %v10390_v40 = vunpack.i.l.bf16 %v10389_v33  ;;  %v10386_v42 = vunpack.i.h.bf16 %v10384_v35  ;;  %v10385_v44 = vunpack.i.l.bf16 %v10384_v35  ;;  %9526 = vmatprep.subr.bf16.mxu1 %v11418_v23  ;;  %v11476_v33 = vld [vmem:[%s12920_s3 + $0x58] sm:$0xff]  ;;  %v11482_v35 = vld [vmem:[%s12920_s3 + $0x20] sm:$0xff] }
 0x20b   : > { %9528 = vmatpush3.bf16.msra.mxu1 %v11267_v52 }
 0x20c   : > { %v9531_v46 = vpack.c.bf16 %v10386_v42, %v10385_v44  ;;  %9530 = vmatprep.subr.bf16.mxu1 %v11420_v37  ;;  %v11425_v50 = vpack.c.bf16 %v10391_v39, %v10390_v40 }
 0x20d   : > { %v10399_v47 = vpop.permute.xlu0 %10398  ;;  %v10394_v48 = vpop.permute.xlu1 %10393 }
 0x20e   : > { %v10396_v43 = vunpack.i.h.bf16 %v10394_v48  ;;  %v10395_v34 = vunpack.i.l.bf16 %v10394_v48  ;;  %v10401_v51 = vunpack.i.h.bf16 %v10399_v47  ;;  %v10400_v54 = vunpack.i.l.bf16 %v10399_v47 }
 0x20f   : > { %9532 = vmatpush3.bf16.msra.mxu1 %v9531_v46  ;;  %v11492_v46 = vld [vmem:[%s12920_s3 + $0x18] sm:$0xff] }
 0x210   : > { %v9535_v55 = vpack.c.bf16 %v10396_v43, %v10395_v34  ;;  %9534 = vmatprep.subr.bf16.mxu1 %v11425_v50  ;;  %v9539_v59 = vpack.c.bf16 %v10401_v51, %v10400_v54  ;;  %v11502_v43 = vld [vmem:[%s12920_s3 + $0x38] sm:$0xff] }
 0x211   : > { %v10409_v56 = vpop.permute.xlu0 %10408  ;;  %v10404_v38 = vpop.permute.xlu1 %10403 }
 0x212   : > { %v10411_v52 = vunpack.i.h.bf16 %v10409_v56  ;;  %v10410_v62 = vunpack.i.l.bf16 %v10409_v56  ;;  %v10406_v63 = vunpack.i.h.bf16 %v10404_v38  ;;  %v10405_v0 = vunpack.i.l.bf16 %v10404_v38  ;;  %v11511_v56 = vld [vmem:[%s12920_s3 + $0x30] sm:$0xff] }
 0x213   : > { %9536 = vmatpush3.bf16.msra.mxu1 %v9535_v55 }
 0x214   : > { %9538 = vmatprep.subr.bf16.mxu1 %v11275_v61  ;;  %v11432_v8 = vpack.c.bf16 %v10411_v52, %v10410_v62  ;;  %v9543_v26 = vpack.c.bf16 %v10406_v63, %v10405_v0  ;;  %v11531_v63 = vld [vmem:[%s12920_s3 + $0x48] sm:$0xff] }
 0x215   : > { %v10419_v3 = vpop.permute.xlu0 %10418  ;;  %v10414_v4 = vpop.permute.xlu1 %10413 }
 0x216   : > { %v10421_v5 = vunpack.i.h.bf16 %v10419_v3  ;;  %v10420_v60 = vunpack.i.l.bf16 %v10419_v3  ;;  %v10416_v29 = vunpack.i.h.bf16 %v10414_v4  ;;  %v10415_v7 = vunpack.i.l.bf16 %v10414_v4 }
 0x217   : > { %9540 = vmatpush3.bf16.msra.mxu1 %v9539_v59 }
 0x218   : > { %v11429_v27 = vpack.c.bf16 %v10421_v5, %v10420_v60  ;;  %9542 = vmatprep.subr.bf16.mxu1 %v11279_v2  ;;  %v11443_v15 = vpack.c.bf16 %v10416_v29, %v10415_v7 }
 0x219   : > { %v11434_v13 = vpop.permute.xlu0 %10428  ;;  %v10424_v30 = vpop.permute.xlu1 %10423 }
 0x21a   : > { %v10426_v1 = vunpack.i.h.bf16 %v10424_v30  ;;  %v10425_v16 = vunpack.i.l.bf16 %v10424_v30  ;;  %9554 = vmatprep.subr.bf16.mxu0 %v11429_v27  ;;  %v10430_v3 = vunpack.i.l.bf16 %v11434_v13 }
 0x21b   : > { %9544 = vmatpush3.bf16.msra.mxu1 %v9543_v26  ;;  %9556 = vmatpush3.bf16.msra.mxu0 %v11429_v27 }
 0x21c   : > { %v11438_v17 = vpack.c.bf16 %v10426_v1, %v10425_v16  ;;  %9546 = vmatprep.subr.bf16.mxu1 %v11432_v8 }
 0x21d   : > { %v11441_v18 = vpop.permute.xlu1 %10433  ;;  %v11446_v22 = vpop.permute.xlu0 %10438 }
 0x21e   : > { %9558 = vmatprep.subr.bf16.mxu0 %v11438_v17  ;;  %v10436_v4 = vunpack.i.h.bf16 %v11441_v18  ;;  %v10435_v5 = vunpack.i.l.bf16 %v11441_v18 }
 0x21f   : > { %9548 = vmatpush3.bf16.msra.mxu1 %v11284_v11  ;;  %9560 = vmatpush3.bf16.msra.mxu0 %v11438_v17 }
 0x220   : > { %9550 = vmatprep.subr.bf16.mxu1 %v11443_v15  ;;  %v9589_v30 = vpack.c.bf16 %v10436_v4, %v10435_v5 }
 0x221   : > { %v11461_v25 = vpop.permute.xlu1 %10443  ;;  %v10449_v39 = vpop.permute.xlu0 %10448 }
 0x222   : > { %8952 = vmatmul.mubr.msk.f32.vlgmr.msra.gmra.mrb[16].mxu0 %vm1551_vm1, %v11453_v24  ;;  %v10450_v34 = vunpack.i.l.bf16 %v10449_v39  ;;  %v10445_v16 = vunpack.i.l.bf16 %v11461_v25 }
 0x223   : > { %9552 = vmatpush3.bf16.msra.mxu1 %v11289_v21  ;;  %8954 = vmatprep.mubr.msk.f32.mxu0 %vm1551_vm1, %v11459_v19 }
 0x224   : > { %9562 = vmatprep.subr.bf16.mxu1 %v11432_v8 }
 0x225   : > { %v10454_v40 = vpop.permute.xlu1 %10453  ;;  %v10459_v55 = vpop.permute.xlu0 %10458 }
 0x226   : > { %v10456_v42 = vunpack.i.h.bf16 %v10454_v40  ;;  %v10455_v44 = vunpack.i.l.bf16 %v10454_v40  ;;  %1629 = vmatmul.mubr.f32.vlgmr.msra.gmra.mrb[20].mxu1 %v11469_v31  ;;  %8955 = vmatmul.mubr.msk.f32.gmra.mrb[18].mxu0 %vm1551_vm1, %v11476_v33  ;;  %v10461_v52 = vunpack.i.h.bf16 %v10459_v55  ;;  %v10460_v62 = vunpack.i.l.bf16 %v10459_v55 }
 0x227   : > { %9564 = vmatpush3.bf16.msra.mxu1 %v11284_v11  ;;  %1633 = vmatprep.mubr.f32.mxu1 %v11482_v35  ;;  %v10451_v11 = vunpack.i.h.bf16 %v10449_v39 }
 0x228   : > { %v11494_v47 = vpack.c.bf16 %v10456_v42, %v10455_v44  ;;  %9566 = vmatprep.subr.bf16.mxu1 %v11443_v15  ;;  %8979 = vmatprep.mubr.msk.f32.mxu0 %vm1551_vm1, %v11345_v9  ;;  %v11536_v0 = vpack.c.bf16 %v10461_v52, %v10460_v62 }
 0x229   : > { %v10464_v48 = vpop.permute.xlu1 %10463  ;;  %v11517_v59 = vpack.c.bf16 %v10451_v11, %v10450_v34  ;;  %v11558_v60 = vpop.permute.xlu0 %10468 }
 0x22a   : > { %v10466_v51 = vunpack.i.h.bf16 %v10464_v48  ;;  %v10465_v54 = vunpack.i.l.bf16 %v10464_v48  ;;  %1634 = vmatmul.mubr.f32.gmra.mrb[22].mxu1 %v11492_v46  ;;  %9634 = vmatprep.subr.bf16.mxu0 %v11494_v47 }
 0x22b   : > { %9568 = vmatpush3.bf16.msra.mxu1 %v11289_v21  ;;  %9636 = vmatpush3.bf16.msra.mxu0 %v11494_v47  ;;  %v11524_v21 = vld [vmem:[%s12920_s3 + $0x50] sm:$0xff] }
 0x22c   : > { %v11513_v38 = vpack.c.bf16 %v10466_v51, %v10465_v54  ;;  %9570 = vmatprep.subr.bf16.mxu1 %v11429_v27  ;;  %1638 = vmatprep.mubr.f32.mxu1 %v11502_v43 }
 0x22d   : > { %v11560_v26 = vpop.permute.xlu1 %10473  ;;  %v10479_v29 = vpop.permute.xlu0 %10478 }
 0x22e   : > { %1639 = vmatmul.mubr.f32.gmra.mrb[24].mxu1 %v11511_v56  ;;  %9638 = vmatprep.subr.bf16.mxu0 %v11513_v38  ;;  %v10481_v18 = vunpack.i.h.bf16 %v10479_v29  ;;  %v10480_v39 = vunpack.i.l.bf16 %v10479_v29 }
 0x22f   : > { %9572 = vmatpush3.bf16.msra.mxu1 %v11414_v20  ;;  %9640 = vmatpush3.bf16.msra.mxu0 %v11513_v38  ;;  %v10431_v20 = vunpack.i.h.bf16 %v11434_v13  ;;  %v10440_v13 = vunpack.i.l.bf16 %v11446_v22 }
 0x230   : > { %9574 = vmatprep.subr.bf16.mxu1 %v11438_v17  ;;  %9642 = vmatprep.subr.bf16.mxu0 %v11517_v59  ;;  %v11573_v42 = vpack.c.bf16 %v10481_v18, %v10480_v39 }
 0x231   : > { %1643 = vmatprep.mubr.f32.mxu1 %v11524_v21  ;;  %v10484_v7 = vpop.permute.xlu1 %10483  ;;  %v10489_v62 = vpop.permute.xlu0 %10488 }
 0x232   : > { %1644 = vmatmul.mubr.f32.gmra.mrb[26].mxu1 %v11531_v63  ;;  %8980 = vmatmul.mubr.msk.f32.vlgmr.msra.gmra.mrb[20].mxu0 %vm1551_vm1, %v11453_v24  ;;  %v10486_v44 = vunpack.i.h.bf16 %v10484_v7  ;;  %v10485_v48 = vunpack.i.l.bf16 %v10484_v7  ;;  %v10476_v7 = vunpack.i.h.bf16 %v11560_v26 }
 0x233   : > { %9576 = vmatpush3.bf16.msra.mxu1 %v11418_v23  ;;  %9644 = vmatpush3.bf16.msra.mxu0 %v11314_v49  ;;  %v9585_v23 = vpack.c.bf16 %v10431_v20, %v10430_v3  ;;  %v10491_v20 = vunpack.i.h.bf16 %v10489_v62  ;;  %v10490_v3 = vunpack.i.l.bf16 %v10489_v62 }
 0x234   : > { %9578 = vmatprep.subr.bf16.mxu1 %v11314_v49  ;;  %9646 = vmatprep.subr.bf16.mxu0 %v11536_v0 }
 0x235   : > { %1830 = vmatprep.mubr.f32.mxu1 %v11332_v53  ;;  %8982 = vmatprep.mubr.msk.f32.mxu0 %vm1551_vm1, %v11459_v19  ;;  %v10494_v40 = vpop.permute.xlu1 %10493  ;;  %v11599_v4 = vpack.c.bf16 %v10491_v20, %v10490_v3  ;;  %v10499_v5 = vpop.permute.xlu0 %10498 }
 0x236   : > { %8983 = vmatmul.mubr.msk.f32.gmra.mrb[22].mxu0 %vm1551_vm1, %v11476_v33  ;;  %v10496_v11 = vunpack.i.h.bf16 %v10494_v40  ;;  %v10495_v34 = vunpack.i.l.bf16 %v10494_v40 }
 0x237   : > { %9580 = vmatpush3.bf16.msra.mxu1 %v11420_v37  ;;  %9648 = vmatpush3.bf16.msra.mxu0 %v11322_v58  ;;  %v10441_v37 = vunpack.i.h.bf16 %v11446_v22 }
 0x238   : > { %9582 = vmatprep.subr.bf16.mxu1 %v11322_v58  ;;  %9650 = vmatprep.subr.bf16.mxu0 %v11494_v47  ;;  %v11584_v54 = vpack.c.bf16 %v10496_v11, %v10495_v34 }
 0x239   : > { %2234 = vmatprep.mubr.f32.mxu0 %v11332_v53  ;;  %v9593_v1 = vpack.c.bf16 %v10441_v37, %v10440_v13  ;;  %v10504_v51 = vpop.permute.xlu1 %10503  ;;  %v10500_v37 = vunpack.i.l.bf16 %v10499_v5 }
 0x23a   : > { %v10506_v55 = vunpack.i.h.bf16 %v10504_v51  ;;  %v10505_v52 = vunpack.i.l.bf16 %v10504_v51 }
 0x23b   : > { %9584 = vmatpush3.bf16.msra.mxu1 %v11425_v50  ;;  %9652 = vmatpush3.bf16.msra.mxu0 %v9585_v23  ;;  %v10446_v50 = vunpack.i.h.bf16 %v11461_v25  ;;  %v11578_v25 = vpack.c.bf16 %v10486_v44, %v10485_v48 }
 0x23c   : > { %9586 = vmatprep.subr.bf16.mxu1 %v9585_v23  ;;  %9654 = vmatprep.subr.bf16.mxu0 %v11513_v38 }
 0x23d   : > { %v9597_v22 = vpack.c.bf16 %v10446_v50, %v10445_v16 }
 0x23f   : > { %9588 = vmatpush3.bf16.msra.mxu1 %v11275_v61  ;;  %9656 = vmatpush3.bf16.msra.mxu0 %v9589_v30 }
 0x240   : > { %9590 = vmatprep.subr.bf16.mxu1 %v9589_v30  ;;  %9658 = vmatprep.subr.bf16.mxu0 %v11360_v28 }
 0x243   : > { %9592 = vmatpush3.bf16.msra.mxu1 %v11279_v2  ;;  %9660 = vmatpush3.bf16.msra.mxu0 %v9593_v1 }
 0x244   : > { %9594 = vmatprep.subr.bf16.mxu1 %v9593_v1  ;;  %9662 = vmatprep.subr.bf16.mxu0 %v11368_v41 }
 0x246   : > { %1831 = vmatmul.mubr.f32.vlgmr.msra.gmra.mrb[28].mxu1 %v11469_v31 }
 0x247   : > { %9596 = vmatpush3.bf16.msra.mxu1 %v9593_v1  ;;  %9664 = vmatpush3.bf16.msra.mxu0 %v9597_v22 }
 0x248   : > { %9598 = vmatprep.subr.bf16.mxu1 %v9597_v22  ;;  %9666 = vmatprep.subr.bf16.mxu0 %v11573_v42 }
 0x249   : > { %1835 = vmatprep.mubr.f32.mxu1 %v11482_v35 }
 0x24a   : > { %1836 = vmatmul.mubr.f32.gmra.mrb[30].mxu1 %v11492_v46 }
 0x24b   : > { %9600 = vmatpush3.bf16.msra.mxu1 %v9597_v22  ;;  %9668 = vmatpush3.bf16.msra.mxu0 %v11295_v32 }
 0x24c   : > { %9602 = vmatprep.subr.bf16.mxu1 %v9585_v23  ;;  %9670 = vmatprep.subr.bf16.mxu0 %v11578_v25  ;;  %v11590_v23 = vpack.c.bf16 %v10506_v55, %v10505_v52 }
 0x24d   : > { %1840 = vmatprep.mubr.f32.mxu1 %v11502_v43 }
 0x24e   : > { %1841 = vmatmul.mubr.f32.gmra.mrb[32].mxu1 %v11511_v56 }
 0x24f   : > { %9672 = vmatpush3.bf16.msra.mxu0 %v11303_v36  ;;  %1845 = vmatprep.mubr.f32.mxu1 %v11524_v21 }
 0x250   : > { %9714 = vmatprep.subr.bf16.mxu0 %v11584_v54 }
 0x252   : > { %1846 = vmatmul.mubr.f32.gmra.mrb[34].mxu1 %v11531_v63  ;;  %2235 = vmatmul.mubr.f32.vlgmr.msra.gmra.mrb[24].mxu0 %v11469_v31 }
 0x253   : > { %9716 = vmatpush3.bf16.msra.mxu0 %v11584_v54  ;;  %8965 = vmatprep.mubr.msk.f32.mxu1 %vm1551_vm1, %v11345_v9 }
 0x254   : > { %9718 = vmatprep.subr.bf16.mxu0 %v11590_v23  ;;  %2239 = vmatprep.mubr.f32.mxu0 %v11482_v35 }
 0x256   : > { %8966 = vmatmul.mubr.msk.f32.vlgmr.msra.gmra.mrb[36].mxu1 %vm1551_vm1, %v11453_v24  ;;  %2240 = vmatmul.mubr.f32.gmra.mrb[26].mxu0 %v11492_v46 }
 0x257   : > { %9604 = vmatpush3.bf16.msra.mxu1 %v11275_v61  ;;  %9720 = vmatpush3.bf16.msra.mxu0 %v11590_v23  ;;  %v10501_v61 = vunpack.i.h.bf16 %v10499_v5 }
 0x258   : > { %9606 = vmatprep.subr.bf16.mxu1 %v9589_v30  ;;  %9722 = vmatprep.subr.bf16.mxu0 %v11599_v4  ;;  %v10470_v30 = vunpack.i.l.bf16 %v11558_v60 }
 0x259   : > { %8968 = vmatprep.mubr.msk.f32.mxu1 %vm1551_vm1, %v11459_v19  ;;  %2244 = vmatprep.mubr.f32.mxu0 %v11502_v43  ;;  %v11620_v13 = vpack.c.bf16 %v10501_v61, %v10500_v37 }
 0x25a   : > { %8969 = vmatmul.mubr.msk.f32.gmra.mrb[38].mxu1 %vm1551_vm1, %v11476_v33  ;;  %2245 = vmatmul.mubr.f32.gmra.mrb[28].mxu0 %v11511_v56 }
 0x25b   : > { %9608 = vmatpush3.bf16.msra.mxu1 %v11279_v2  ;;  %2249 = vmatprep.mubr.f32.mxu0 %v11524_v21  ;;  %v10509_v2 = vpop.permute.xlu0 %10508 }
 0x25c   : > { %9610 = vmatprep.subr.bf16.mxu1 %v9593_v1  ;;  %2032 = vmatprep.mubr.f32.mxu1 %v11332_v53  ;;  %v10475_v1 = vunpack.i.l.bf16 %v11560_v26  ;;  %v10511_v16 = vunpack.i.h.bf16 %v10509_v2  ;;  %v10510_v18 = vunpack.i.l.bf16 %v10509_v2 }
 0x25e   : > { %2250 = vmatmul.mubr.f32.gmra.mrb[30].mxu0 %v11531_v63  ;;  %v11659_v39 = vpack.c.bf16 %v10511_v16, %v10510_v18 }
 0x25f   : > { %9612 = vmatpush3.bf16.msra.mxu1 %v11432_v8  ;;  %9007 = vmatprep.mubr.msk.f32.mxu0 %vm1551_vm1, %v11345_v9  ;;  %v11636_v8 = vpop.permute.xlu1 %10513 }
 0x260   : > { %9614 = vmatprep.subr.bf16.mxu1 %v9597_v22 }
 0x262   : > { %9008 = vmatmul.mubr.msk.f32.vlgmr.msra.gmra.mrb[32].mxu0 %vm1551_vm1, %v11453_v24 }
 0x263   : > { %9616 = vmatpush3.bf16.msra.mxu1 %v11443_v15  ;;  %9724 = vmatpush3.bf16.msra.mxu0 %v11360_v28  ;;  %v10519_v15 = vpop.permute.xlu0 %10518  ;;  %v11645_v29 = vpop.permute.xlu1 %10523 }
 0x264   : > { %9618 = vmatprep.subr.bf16.mxu1 %v11295_v32  ;;  %9726 = vmatprep.subr.bf16.mxu0 %v11620_v13  ;;  %v10521_v22 = vunpack.i.h.bf16 %v10519_v15  ;;  %v10520_v40 = vunpack.i.l.bf16 %v10519_v15 }
 0x265   : > { %9010 = vmatprep.mubr.msk.f32.mxu0 %vm1551_vm1, %v11459_v19 }
 0x266   : > { %9011 = vmatmul.mubr.msk.f32.gmra.mrb[34].mxu0 %vm1551_vm1, %v11476_v33 }
 0x267   : > { %9620 = vmatpush3.bf16.msra.mxu1 %v11429_v27  ;;  %9728 = vmatpush3.bf16.msra.mxu0 %v11368_v41  ;;  %v10471_v27 = vunpack.i.h.bf16 %v11558_v60  ;;  %v11653_v50 = vpop.permute.xlu0 %10528  ;;  %v11657_v60 = vpop.permute.xlu1 %10533 }
 0x268   : > { %9622 = vmatprep.subr.bf16.mxu1 %v11303_v36  ;;  %9730 = vmatprep.subr.bf16.mxu0 %v11584_v54 }
 0x269   : > { %2638 = vmatprep.mubr.f32.mxu0 %v11332_v53 }
 0x26b   : > { %9624 = vmatpush3.bf16.msra.mxu1 %v11438_v17  ;;  %9732 = vmatpush3.bf16.msra.mxu0 %v11573_v42  ;;  %v9673_v17 = vpack.c.bf16 %v10471_v27, %v10470_v30  ;;  %v10539_v26 = vpop.permute.xlu0 %10538  ;;  %v10544_v11 = vpop.permute.xlu1 %10543 }
 0x26c   : > { %9626 = vmatprep.subr.bf16.mxu1 %v11517_v59  ;;  %9734 = vmatprep.subr.bf16.mxu0 %v11590_v23  ;;  %v10541_v44 = vunpack.i.h.bf16 %v10539_v26  ;;  %v10540_v48 = vunpack.i.l.bf16 %v10539_v26  ;;  %v10546_v51 = vunpack.i.h.bf16 %v10544_v11  ;;  %v10545_v55 = vunpack.i.l.bf16 %v10544_v11 }
 0x26e   : > { %v9793_v34 = vpack.c.bf16 %v10541_v44, %v10540_v48  ;;  %v9797_v52 = vpack.c.bf16 %v10546_v51, %v10545_v55 }
 0x26f   : > { %9628 = vmatpush3.bf16.msra.mxu1 %v11314_v49  ;;  %9736 = vmatpush3.bf16.msra.mxu0 %v11578_v25  ;;  %v9677_v49 = vpack.c.bf16 %v10476_v7, %v10475_v1 }
 0x270   : > { %9630 = vmatprep.subr.bf16.mxu1 %v11536_v0  ;;  %9738 = vmatprep.subr.bf16.mxu0 %v11389_v10 }
 0x273   : > { %9632 = vmatpush3.bf16.msra.mxu1 %v11322_v58  ;;  %9740 = vmatpush3.bf16.msra.mxu0 %v9673_v17  ;;  %v11664_v58 = vpack.c.bf16 %v10521_v22, %v10520_v40 }
 0x274   : > { %9674 = vmatprep.subr.bf16.mxu1 %v9673_v17  ;;  %9742 = vmatprep.subr.bf16.mxu0 %v11393_v14 }
 0x276   : > { %2033 = vmatmul.mubr.f32.vlgmr.msra.gmra.mrb[40].mxu1 %v11469_v31 }
 0x277   : > { %9676 = vmatpush3.bf16.msra.mxu1 %v9673_v17  ;;  %9744 = vmatpush3.bf16.msra.mxu0 %v9677_v49 }
 0x278   : > { %9678 = vmatprep.subr.bf16.mxu1 %v9677_v49  ;;  %9746 = vmatprep.subr.bf16.mxu0 %v11659_v39 }
 0x279   : > { %2037 = vmatprep.mubr.f32.mxu1 %v11482_v35 }
 0x27a   : > { %2038 = vmatmul.mubr.f32.gmra.mrb[42].mxu1 %v11492_v46 }
 0x27b   : > { %9680 = vmatpush3.bf16.msra.mxu1 %v9677_v49  ;;  %9748 = vmatpush3.bf16.msra.mxu0 %v11336_v6 }
 0x27c   : > { %9682 = vmatprep.subr.bf16.mxu1 %v11573_v42  ;;  %9750 = vmatprep.subr.bf16.mxu0 %v11664_v58  ;;  %v10525_v42 = vunpack.i.l.bf16 %v11645_v29 }
 0x27d   : > { %2042 = vmatprep.mubr.f32.mxu1 %v11502_v43 }
 0x27e   : > { %2043 = vmatmul.mubr.f32.gmra.mrb[44].mxu1 %v11511_v56 }
 0x27f   : > { %9752 = vmatpush3.bf16.msra.mxu0 %v11349_v12  ;;  %2047 = vmatprep.mubr.f32.mxu1 %v11524_v21 }
 0x280   : > { %9794 = vmatprep.subr.bf16.mxu0 %v9793_v34 }
 0x282   : > { %2048 = vmatmul.mubr.f32.gmra.mrb[46].mxu1 %v11531_v63  ;;  %2639 = vmatmul.mubr.f32.vlgmr.msra.gmra.mrb[36].mxu0 %v11469_v31 }
 0x283   : > { %9796 = vmatpush3.bf16.msra.mxu0 %v9793_v34  ;;  %8993 = vmatprep.mubr.msk.f32.mxu1 %vm1551_vm1, %v11345_v9 }
 0x284   : > { %9798 = vmatprep.subr.bf16.mxu0 %v9797_v52  ;;  %2643 = vmatprep.mubr.f32.mxu0 %v11482_v35 }
 0x286   : > { %8994 = vmatmul.mubr.msk.f32.vlgmr.msra.gmra.mrb[48].mxu1 %vm1551_vm1, %v11453_v24  ;;  %2644 = vmatmul.mubr.f32.gmra.mrb[38].mxu0 %v11492_v46 }
 0x287   : > { %9684 = vmatpush3.bf16.msra.mxu1 %v11295_v32  ;;  %9800 = vmatpush3.bf16.msra.mxu0 %v9797_v52  ;;  %v10516_v32 = vunpack.i.h.bf16 %v11636_v8 }
 0x288   : > { %9686 = vmatprep.subr.bf16.mxu1 %v11578_v25  ;;  %8996 = vmatprep.mubr.msk.f32.mxu1 %vm1551_vm1, %v11459_v19 }
 0x289   : > { %2648 = vmatprep.mubr.f32.mxu0 %v11502_v43 }
 0x28a   : > { %8997 = vmatmul.mubr.msk.f32.gmra.mrb[50].mxu1 %vm1551_vm1, %v11476_v33  ;;  %2649 = vmatmul.mubr.f32.gmra.mrb[40].mxu0 %v11511_v56 }
 0x28b   : > { %9688 = vmatpush3.bf16.msra.mxu1 %v11303_v36  ;;  %2653 = vmatprep.mubr.f32.mxu0 %v11524_v21  ;;  %v10515_v36 = vunpack.i.l.bf16 %v11636_v8 }
 0x28c   : > { %9690 = vmatprep.subr.bf16.mxu1 %v9673_v17  ;;  %2436 = vmatprep.mubr.f32.mxu1 %v11332_v53 }
 0x28e   : > { %2654 = vmatmul.mubr.f32.gmra.mrb[42].mxu0 %v11531_v63 }
 0x28f   : > { %9692 = vmatpush3.bf16.msra.mxu1 %v11517_v59  ;;  %9035 = vmatprep.mubr.msk.f32.mxu0 %vm1551_vm1, %v11345_v9  ;;  %v9753_v59 = vpack.c.bf16 %v10516_v32, %v10515_v36 }
 0x290   : > { %9694 = vmatprep.subr.bf16.mxu1 %v9677_v49 }
 0x292   : > { %9036 = vmatmul.mubr.msk.f32.vlgmr.msra.gmra.mrb[44].mxu0 %vm1551_vm1, %v11453_v24 }
 0x293   : > { %9696 = vmatpush3.bf16.msra.mxu1 %v11536_v0  ;;  %9038 = vmatprep.mubr.msk.f32.mxu0 %vm1551_vm1, %v11459_v19  ;;  %v10526_v0 = vunpack.i.h.bf16 %v11645_v29 }
 0x294   : > { %9698 = vmatprep.subr.bf16.mxu1 %v11336_v6 }
 0x296   : > { %9039 = vmatmul.mubr.msk.f32.gmra.mrb[46].mxu0 %vm1551_vm1, %v11476_v33 }
 0x297   : > { %9700 = vmatpush3.bf16.msra.mxu1 %v11494_v47  ;;  %v9757_v47 = vpack.c.bf16 %v10526_v0, %v10525_v42 }
 0x298   : > { %9702 = vmatprep.subr.bf16.mxu1 %v11349_v12 }
 0x29b   : > { %9704 = vmatpush3.bf16.msra.mxu1 %v11513_v38 }
 0x29c   : > { %9706 = vmatprep.subr.bf16.mxu1 %v11599_v4 }
 0x29f   : > { %9708 = vmatpush3.bf16.msra.mxu1 %v11360_v28 }
 0x2a0   : > { %9710 = vmatprep.subr.bf16.mxu1 %v11620_v13 }
 0x2a3   : > { %9712 = vmatpush3.bf16.msra.mxu1 %v11368_v41 }
 0x2a4   : > { %9754 = vmatprep.subr.bf16.mxu1 %v9753_v59 }
 0x2a6   : > { %2437 = vmatmul.mubr.f32.vlgmr.msra.gmra.mrb[52].mxu1 %v11469_v31 }
 0x2a7   : > { %9756 = vmatpush3.bf16.msra.mxu1 %v9753_v59  ;;  %2441 = vmatprep.mubr.f32.mxu1 %v11482_v35 }
 0x2a8   : > { %9758 = vmatprep.subr.bf16.mxu1 %v9757_v47 }
 0x2aa   : > { %2442 = vmatmul.mubr.f32.gmra.mrb[54].mxu1 %v11492_v46 }
 0x2ab   : > { %9760 = vmatpush3.bf16.msra.mxu1 %v9757_v47  ;;  %2446 = vmatprep.mubr.f32.mxu1 %v11502_v43 }
 0x2ac   : > { %9762 = vmatprep.subr.bf16.mxu1 %v11659_v39 }
 0x2ae   : > { %2447 = vmatmul.mubr.f32.gmra.mrb[56].mxu1 %v11511_v56 }
 0x2af   : > { %2451 = vmatprep.mubr.f32.mxu1 %v11524_v21 }
 0x2b2   : > { %2452 = vmatmul.mubr.f32.gmra.mrb[58].mxu1 %v11531_v63 }
 0x2b3   : > { %9021 = vmatprep.mubr.msk.f32.mxu1 %vm1551_vm1, %v11345_v9  ;;  %v10530_v9 = vunpack.i.l.bf16 %v11653_v50 }
 0x2b6   : > { %9022 = vmatmul.mubr.msk.f32.vlgmr.msra.gmra.mrb[60].mxu1 %vm1551_vm1, %v11453_v24 }
 0x2b7   : > { %9764 = vmatpush3.bf16.msra.mxu1 %v11336_v6  ;;  %9024 = vmatprep.mubr.msk.f32.mxu1 %vm1551_vm1, %v11459_v19  ;;  %v10531_v6 = vunpack.i.h.bf16 %v11653_v50 }
 0x2b8   : > { %9766 = vmatprep.subr.bf16.mxu1 %v11664_v58 }
 0x2b9   : > { %v9785_v28 = vpack.c.bf16 %v10531_v6, %v10530_v9 }
 0x2ba   : > { %9025 = vmatmul.mubr.msk.f32.gmra.mrb[62].mxu1 %vm1551_vm1, %v11476_v33 }
 0x2bb   : > { %9768 = vmatpush3.bf16.msra.mxu1 %v11349_v12  ;;  %2840 = vmatprep.mubr.f32.mxu1 %v11332_v53  ;;  %v10536_v12 = vunpack.i.h.bf16 %v11657_v60  ;;  %v10535_v53 = vunpack.i.l.bf16 %v11657_v60 }
 0x2bc   : > { %9770 = vmatprep.subr.bf16.mxu1 %v9753_v59 }
 0x2bd   : > { %v9789_v41 = vpack.c.bf16 %v10536_v12, %v10535_v53 }
 0x2bf   : > { %9772 = vmatpush3.bf16.msra.mxu1 %v11599_v4 }
 0x2c0   : > { %9774 = vmatprep.subr.bf16.mxu1 %v9757_v47 }
 0x2c3   : > { %9776 = vmatpush3.bf16.msra.mxu1 %v11620_v13 }
 0x2c4   : > { %9778 = vmatprep.subr.bf16.mxu1 %v11375_v45 }
 0x2c7   : > { %9780 = vmatpush3.bf16.msra.mxu1 %v11584_v54 }
 0x2c8   : > { %9782 = vmatprep.subr.bf16.mxu1 %v11379_v57 }
 0x2cb   : > { %9784 = vmatpush3.bf16.msra.mxu1 %v11590_v23 }
 0x2cc   : > { %9786 = vmatprep.subr.bf16.mxu1 %v9785_v28 }
 0x2cf   : > { %9788 = vmatpush3.bf16.msra.mxu1 %v11389_v10 }
 0x2d0   : > { %9790 = vmatprep.subr.bf16.mxu1 %v9789_v41 }
 0x2d3   : > { %9792 = vmatpush3.bf16.msra.mxu1 %v11393_v14 }
 0x2d6   : > { %2841 = vmatmul.mubr.f32.vlgmr.msra.gmra.mrb[64].mxu1 %v11469_v31  ;;  %v11755_v31 = vpop.permute.xlu0 %1533 }
 0x2d7   : > { %2845 = vmatprep.mubr.f32.mxu1 %v11482_v35 }
 0x2da   : > { %2846 = vmatmul.mubr.f32.gmra.mrb[66].mxu1 %v11492_v46  ;;  %v11761_v3 = vpop.permute.xlu0 %1543 }
 0x2db   : > { %2850 = vmatprep.mubr.f32.mxu1 %v11502_v43 }
 0x2de   : > { %2851 = vmatmul.mubr.f32.gmra.mrb[68].mxu1 %v11511_v56  ;;  %v11758_v56 = vpop.permute.xlu1 %1538 }
 0x2df   : > { %2855 = vmatprep.mubr.f32.mxu1 %v11524_v21 }
 0x2e2   : > { %2856 = vmatmul.mubr.f32.gmra.mrb[70].mxu1 %v11531_v63  ;;  %v11772_v29 = vpop.permute.xlu1 %1548 }
 0x2f5   : > { %v8953_v45 = vpop.f32.mrb[16].mxu0 }
 0x2f6   : > { %v1715_v57 = vpop.f32.mrb[17].mxu0 }
 0x2f9   : > { %v7883_v10 = vpop.f32.mrb[20].mxu1  ;;  %v8956_v24 = vpop.f32.mrb[18].mxu0 }
 0x2fa   : > { %v7884_v19 = vpop.f32.mrb[21].mxu1  ;;  %v1725_v14 = vpop.f32.mrb[19].mxu0 }
 0x2fb   : > { %v7885_v33 = vadd.f32 %v7884_v19, %v7883_v10 }
 0x2fd   : > { %v7886_v35 = vpop.f32.mrb[22].mxu1  ;;  %v1631_v46 = vadd.f32 %v7885_v33, %v11755_v31 }
 0x2fe   : > { %v7887_v38 = vpop.f32.mrb[23].mxu1 }
 0x2ff   : > { %v7888_v43 = vadd.f32 %v7887_v38, %v7886_v35  ;;  %v1716_v25 = vadd.f32 %v1715_v57, %v1631_v46 }
 0x301   : > { %v1636_v21 = vadd.f32 %v7888_v43, %v11758_v56  ;;  %v7889_v63 = vpop.f32.mrb[24].mxu1  ;;  %v1734_v4 = vmax.f32 %v1716_v25, 0.0 }
 0x302   : > { %v7890_v54 = vpop.f32.mrb[25].mxu1 }
 0x303   : > { %v1721_v62 = vadd.f32 %v8953_v45, %v1636_v21  ;;  %v7891_v20 = vadd.f32 %v7890_v54, %v7889_v63 }
 0x305   : > { %v1735_v23 = vmax.f32 %v1721_v62, 0.0  ;;  %v7892_v5 = vpop.f32.mrb[26].mxu1  ;;  %v1641_v61 = vadd.f32 %v7891_v20, %v11761_v3  ;;  %v11764_v37 = vpop.f32.mrb[20].mxu0 }
 0x306   : > { %v7893_v13 = vpop.f32.mrb[27].mxu1  ;;  %v11766_v2 = vpop.f32.mrb[21].mxu0 }
 0x307   : > { %v11768_v8 = vpack.c.bf16 %v1735_v23, %v1734_v4  ;;  %v7894_v15 = vadd.f32 %v7893_v13, %v7892_v5  ;;  %v1726_v27 = vadd.f32 %v1725_v14, %v1641_v61  ;;  %v11770_v30 = vpack.i.bf16 %v1735_v23, %v1734_v4 }
 0x309   : > { %v1646_v17 = vadd.f32 %v7894_v15, %v11772_v29  ;;  %v11775_v7 = vpop.f32.mrb[22].mxu0  ;;  %v1736_v18 = vmax.f32 %v1726_v27, 0.0 }
 0x30a   : > { %v11777_v1 = vpop.f32.mrb[23].mxu0 }
 0x30b   : > { %v1731_v50 = vadd.f32 %v8956_v24, %v1646_v17 }
 0x30d   : > { %v1737_v16 = vmax.f32 %v1731_v50, 0.0 }
 0x30f   : > { %v11779_v49 = vpack.c.bf16 %v1737_v16, %v1736_v18  ;;  %v11781_v60 = vpack.i.bf16 %v1737_v16, %v1736_v18 }
 0x319   : > { %v7935_v39 = vpop.f32.mrb[28].mxu1 }
 0x31a   : > { %v7936_v22 = vpop.f32.mrb[29].mxu1 }
 0x31b   : > { %v7937_v40 = vadd.f32 %v7936_v22, %v7935_v39 }
 0x31d   : > { %v7938_v26 = vpop.f32.mrb[30].mxu1  ;;  %v1833_v6 = vadd.f32 %v7937_v40, %v11755_v31 }
 0x31e   : > { %v7939_v58 = vpop.f32.mrb[31].mxu1 }
 0x31f   : > { %v7940_v44 = vadd.f32 %v7939_v58, %v7938_v26 }
 0x321   : > { %v7941_v48 = vpop.f32.mrb[32].mxu1  ;;  %v1838_v0 = vadd.f32 %v7940_v44, %v11758_v56 }
 0x322   : > { %v7942_v11 = vpop.f32.mrb[33].mxu1 }
 0x323   : > { %v7943_v34 = vadd.f32 %v7942_v11, %v7941_v48 }
 0x325   : > { %v7944_v51 = vpop.f32.mrb[34].mxu1  ;;  %v8039_v55 = vpop.f32.mrb[24].mxu0  ;;  %v1843_v14 = vadd.f32 %v7943_v34, %v11761_v3 }
 0x326   : > { %v7945_v52 = vpop.f32.mrb[35].mxu1  ;;  %v8040_v32 = vpop.f32.mrb[25].mxu0 }
 0x327   : > { %v7946_v36 = vadd.f32 %v7945_v52, %v7944_v51  ;;  %v11783_v59 = vadd.f32 %v8040_v32, %v8039_v55 }
 0x329   : > { %v8967_v42 = vpop.f32.mrb[36].mxu1  ;;  %v8042_v47 = vpop.f32.mrb[26].mxu0  ;;  %v1848_v57 = vadd.f32 %v7946_v36, %v11772_v29 }
 0x32a   : > { %v1923_v9 = vadd.f32 %v8967_v42, %v1838_v0  ;;  %v1917_v28 = vpop.f32.mrb[37].mxu1  ;;  %v8043_v12 = vpop.f32.mrb[27].mxu0 }
 0x32b   : > { %v1918_v53 = vadd.f32 %v1917_v28, %v1833_v6  ;;  %v8044_v41 = vadd.f32 %v8043_v12, %v8042_v47 }
 0x32c   : > { %v1937_v45 = vmax.f32 %v1923_v9, 0.0 }
 0x32d   : > { %v1936_v10 = vmax.f32 %v1918_v53, 0.0  ;;  %v8970_v24 = vpop.f32.mrb[38].mxu1  ;;  %v8045_v19 = vpop.f32.mrb[28].mxu0  ;;  %v2242_v28 = vadd.f32 %v8044_v41, %v11758_v56 }
 0x32e   : > { %v1933_v33 = vadd.f32 %v8970_v24, %v1848_v57  ;;  %v1927_v35 = vpop.f32.mrb[39].mxu1  ;;  %v8046_v46 = vpop.f32.mrb[29].mxu0  ;;  %v2237_v57 = vadd.f32 %v11783_v59, %v11755_v31 }
 0x32f   : > { %v11789_v38 = vpack.c.bf16 %v1937_v45, %v1936_v10  ;;  %v1928_v43 = vadd.f32 %v1927_v35, %v1843_v14  ;;  %v8047_v25 = vadd.f32 %v8046_v46, %v8045_v19  ;;  %v10547_v21 = vpack.i.bf16 %v1937_v45, %v1936_v10 }
 0x330   : > { %v1939_v63 = vmax.f32 %v1933_v33, 0.0 }
 0x331   : > { %v1938_v54 = vmax.f32 %v1928_v43, 0.0  ;;  %v8048_v62 = vpop.f32.mrb[30].mxu0  ;;  %10548 = vrot.lane.b32.xlu0 %v10547_v21, %s10856_s30  ;;  %v2247_v59 = vadd.f32 %v8047_v25, %v11761_v3 }
 0x332   : > { %v8049_v20 = vpop.f32.mrb[31].mxu0 }
 0x333   : > { %v11792_v23 = vpack.c.bf16 %v1939_v63, %v1938_v54  ;;  %v8050_v4 = vadd.f32 %v8049_v20, %v8048_v62  ;;  %v10552_v5 = vpack.i.bf16 %v1939_v63, %v1938_v54  ;;  %v11830_v62 = vld [vmem:[%s12922_s5 + $0x10] sm:$0xff] }
 0x334   : > { %9049 = vmatprep.mubr.msk.f32.mxu1 %vm1551_vm1, %v11830_v62 }
 0x335   : > { %10553 = vrot.lane.b32.xlu1 %v10552_v5, %s10856_s30  ;;  %10563 = vrot.lane.b32.xlu0 %v11770_v30, %s10856_s30  ;;  %v11797_v61 = vpop.f32.mrb[32].mxu0  ;;  %v2252_v35 = vadd.f32 %v8050_v4, %v11772_v29 }
 0x336   : > { %v11799_v13 = vpop.f32.mrb[33].mxu0 }
 0x339   : > { %10558 = vrot.lane.b32.xlu1 %v10547_v21, %s10857_s24  ;;  %v11802_v15 = vpop.f32.mrb[34].mxu0 }
 0x33a   : > { %v11804_v27 = vpop.f32.mrb[35].mxu0 }
 0x349   : > { %v7987_v17 = vpop.f32.mrb[40].mxu1 }
 0x34a   : > { %v7988_v50 = vpop.f32.mrb[41].mxu1 }
 0x34b   : > { %v7989_v16 = vadd.f32 %v7988_v50, %v7987_v17 }
 0x34d   : > { %v2035_v18 = vadd.f32 %v7989_v16, %v11755_v31  ;;  %v7990_v39 = vpop.f32.mrb[42].mxu1 }
 0x34e   : > { %v7991_v22 = vpop.f32.mrb[43].mxu1 }
 0x34f   : > { %v2120_v40 = vadd.f32 %v11766_v2, %v2035_v18  ;;  %v7992_v26 = vadd.f32 %v7991_v22, %v7990_v39 }
 0x351   : > { %v2040_v58 = vadd.f32 %v7992_v26, %v11758_v56  ;;  %v7993_v44 = vpop.f32.mrb[44].mxu1  ;;  %v2138_v51 = vmax.f32 %v2120_v40, 0.0 }
 0x352   : > { %v7994_v48 = vpop.f32.mrb[45].mxu1 }
 0x353   : > { %v2125_v11 = vadd.f32 %v11764_v37, %v2040_v58  ;;  %v7995_v34 = vadd.f32 %v7994_v48, %v7993_v44 }
 0x355   : > { %v2139_v55 = vmax.f32 %v2125_v11, 0.0  ;;  %v2045_v52 = vadd.f32 %v7995_v34, %v11761_v3  ;;  %v7996_v32 = vpop.f32.mrb[46].mxu1  ;;  %v8143_v36 = vpop.f32.mrb[36].mxu0 }
 0x356   : > { %v7997_v0 = vpop.f32.mrb[47].mxu1  ;;  %v8144_v42 = vpop.f32.mrb[37].mxu0 }
 0x357   : > { %v2130_v47 = vadd.f32 %v11777_v1, %v2045_v52  ;;  %v7998_v6 = vadd.f32 %v7997_v0, %v7996_v32  ;;  %v11812_v2 = vadd.f32 %v8144_v42, %v8143_v36  ;;  %v10567_v9 = vpack.i.bf16 %v2139_v55, %v2138_v51  ;;  %v11864_v52 = vld [vmem:[%s12922_s5 + $0x8] sm:$0xff] }
 0x358   : > { %v11815_v12 = vpack.c.bf16 %v2139_v55, %v2138_v51  ;;  %3146 = vmatprep.mubr.f32.mxu0 %v11864_v52 }
 0x359   : > { %v2050_v37 = vadd.f32 %v7998_v6, %v11772_v29  ;;  %v8995_v53 = vpop.f32.mrb[48].mxu1  ;;  %v8146_v45 = vpop.f32.mrb[38].mxu0  ;;  %10568 = vrot.lane.b32.xlu0 %v10567_v9, %s10857_s24  ;;  %v2140_v46 = vmax.f32 %v2130_v47, 0.0 }
 0x35a   : > { %v2327_v10 = vadd.f32 %v8995_v53, %v2242_v28  ;;  %v2321_v24 = vpop.f32.mrb[49].mxu1  ;;  %v8147_v1 = vpop.f32.mrb[39].mxu0 }
 0x35b   : > { %v2135_v19 = vadd.f32 %v11775_v7, %v2050_v37  ;;  %v2322_v14 = vadd.f32 %v2321_v24, %v2237_v57  ;;  %v11822_v33 = vadd.f32 %v8147_v1, %v8146_v45 }
 0x35c   : > { %v2341_v41 = vmax.f32 %v2327_v10, 0.0 }
 0x35d   : > { %v2141_v43 = vmax.f32 %v2135_v19, 0.0  ;;  %v2340_v21 = vmax.f32 %v2322_v14, 0.0  ;;  %v8998_v63 = vpop.f32.mrb[50].mxu1  ;;  %v8149_v54 = vpop.f32.mrb[40].mxu0  ;;  %10573 = vrot.lane.b32.xlu0 %v10552_v5, %s10857_s24 }
 0x35e   : > { %v2337_v7 = vadd.f32 %v8998_v63, %v2252_v35  ;;  %v2331_v20 = vpop.f32.mrb[51].mxu1  ;;  %v8150_v17 = vpop.f32.mrb[41].mxu0 }
 0x35f   : > { %v2332_v4 = vadd.f32 %v2331_v20, %v2247_v59  ;;  %v11834_v50 = vadd.f32 %v8150_v17, %v8149_v54  ;;  %v10577_v16 = vpack.i.bf16 %v2141_v43, %v2140_v46  ;;  %v10607_v39 = vpack.i.bf16 %v2341_v41, %v2340_v21 }
 0x360   : > { %v2343_v18 = vmax.f32 %v2337_v7, 0.0  ;;  %v11836_v5 = vpack.c.bf16 %v2141_v43, %v2140_v46  ;;  %v11840_v40 = vpack.c.bf16 %v2341_v41, %v2340_v21 }
 0x361   : > { %v2342_v25 = vmax.f32 %v2332_v4, 0.0  ;;  %v8152_v22 = vpop.f32.mrb[42].mxu0  ;;  %10578 = vrot.lane.b32.xlu1 %v10577_v16, %s10857_s24  ;;  %10588 = vrot.lane.b32.xlu0 %v10567_v9, %s10856_s30 }
 0x362   : > { %v8153_v26 = vpop.f32.mrb[43].mxu0 }
 0x363   : > { %v8154_v58 = vadd.f32 %v8153_v26, %v8152_v22  ;;  %v10617_v44 = vpack.i.bf16 %v2343_v18, %v2342_v25  ;;  %v11842_v48 = vpack.c.bf16 %v2343_v18, %v2342_v25  ;;  %v2651_v18 = vadd.f32 %v11834_v50, %v11761_v3 }
 0x365   : > { %10583 = vrot.lane.b32.xlu1 %v11781_v60, %s10856_s30  ;;  %10598 = vrot.lane.b32.xlu0 %v10577_v16, %s10856_s30  ;;  %v11847_v11 = vpop.f32.mrb[44].mxu0  ;;  %v2656_v20 = vadd.f32 %v8154_v58, %v11772_v29 }
 0x366   : > { %v11849_v34 = vpop.f32.mrb[45].mxu0 }
 0x369   : > { %10593 = vrot.lane.b32.xlu1 %v11770_v30, %s10857_s24  ;;  %10608 = vrot.lane.b32.xlu0 %v10607_v39, %s10856_s30  ;;  %v11854_v51 = vpop.f32.mrb[46].mxu0 }
 0x36a   : > { %v11856_v55 = vpop.f32.mrb[47].mxu0 }
 0x36d   : > { %10603 = vrot.lane.b32.xlu1 %v11781_v60, %s10857_s24  ;;  %10618 = vrot.lane.b32.xlu0 %v10617_v44, %s10856_s30 }
 0x371   : > { %10613 = vrot.lane.b32.xlu1 %v10607_v39, %s10857_s24 }
 0x375   : > { %10623 = vrot.lane.b32.xlu1 %v10617_v44, %s10857_s24 }
 0x379   : > { %v8091_v30 = vpop.f32.mrb[52].mxu1 }
 0x37a   : > { %v8092_v32 = vpop.f32.mrb[53].mxu1 }
 0x37b   : > { %v8093_v36 = vadd.f32 %v8092_v32, %v8091_v30 }
 0x37d   : > { %v2439_v0 = vadd.f32 %v8093_v36, %v11755_v31  ;;  %v8094_v42 = vpop.f32.mrb[54].mxu1 }
 0x37e   : > { %v8095_v60 = vpop.f32.mrb[55].mxu1 }
 0x37f   : > { %v2524_v47 = vadd.f32 %v11799_v13, %v2439_v0  ;;  %v8096_v6 = vadd.f32 %v8095_v60, %v8094_v42  ;;  %v2646_v13 = vadd.f32 %v11822_v33, %v11758_v56 }
 0x381   : > { %v2444_v9 = vadd.f32 %v8096_v6, %v11758_v56  ;;  %v8097_v28 = vpop.f32.mrb[56].mxu1  ;;  %v2542_v57 = vmax.f32 %v2524_v47, 0.0 }
 0x382   : > { %v8098_v37 = vpop.f32.mrb[57].mxu1 }
 0x383   : > { %v2529_v53 = vadd.f32 %v11797_v61, %v2444_v9  ;;  %v8099_v45 = vadd.f32 %v8098_v37, %v8097_v28  ;;  %v2641_v61 = vadd.f32 %v11812_v2, %v11755_v31 }
 0x385   : > { %v2543_v10 = vmax.f32 %v2529_v53, 0.0  ;;  %v2449_v24 = vadd.f32 %v8099_v45, %v11761_v3  ;;  %v8100_v1 = vpop.f32.mrb[58].mxu1 }
 0x386   : > { %v8101_v19 = vpop.f32.mrb[59].mxu1 }
 0x387   : > { %v2534_v14 = vadd.f32 %v11804_v27, %v2449_v24  ;;  %v8102_v41 = vadd.f32 %v8101_v19, %v8100_v1  ;;  %v10627_v35 = vpack.i.bf16 %v2543_v10, %v2542_v57  ;;  %v11877_v46 = vpack.c.bf16 %v2543_v10, %v2542_v57 }
 0x389   : > { %v2454_v43 = vadd.f32 %v8102_v41, %v11772_v29  ;;  %v9023_v21 = vpop.f32.mrb[60].mxu1  ;;  %10628 = vrot.lane.b32.xlu0 %v10627_v35, %s10857_s24  ;;  %v2544_v17 = vmax.f32 %v2534_v14, 0.0 }
 0x38a   : > { %v2731_v63 = vadd.f32 %v9023_v21, %v2646_v13  ;;  %v2725_v54 = vpop.f32.mrb[61].mxu1 }
 0x38b   : > { %v2539_v59 = vadd.f32 %v11802_v15, %v2454_v43  ;;  %v2726_v27 = vadd.f32 %v2725_v54, %v2641_v61 }
 0x38c   : > { %v2745_v7 = vmax.f32 %v2731_v63, 0.0 }
 0x38d   : > { %v2545_v33 = vmax.f32 %v2539_v59, 0.0  ;;  %v2744_v4 = vmax.f32 %v2726_v27, 0.0  ;;  %v9026_v16 = vpop.f32.mrb[62].mxu1  ;;  %10638 = vrot.lane.b32.xlu0 %v10627_v35, %s10856_s30 }
 0x38e   : > { %v2741_v39 = vadd.f32 %v9026_v16, %v2656_v20  ;;  %v2735_v25 = vpop.f32.mrb[63].mxu1 }
 0x38f   : > { %v2736_v2 = vadd.f32 %v2735_v25, %v2651_v18  ;;  %v10632_v22 = vpack.i.bf16 %v2545_v33, %v2544_v17  ;;  %v10647_v26 = vpack.i.bf16 %v2745_v7, %v2744_v4  ;;  %v11888_v15 = vpack.c.bf16 %v2545_v33, %v2544_v17 }
 0x390   : > { %v2747_v44 = vmax.f32 %v2741_v39, 0.0  ;;  %v11890_v30 = vpack.c.bf16 %v2745_v7, %v2744_v4 }
 0x391   : > { %v2746_v58 = vmax.f32 %v2736_v2, 0.0  ;;  %10633 = vrot.lane.b32.xlu1 %v10632_v22, %s10857_s24  ;;  %10648 = vrot.lane.b32.xlu0 %v10647_v26, %s10856_s30 }
 0x393   : > { %v10657_v32 = vpack.i.bf16 %v2747_v44, %v2746_v58  ;;  %v11894_v36 = vpack.c.bf16 %v2747_v44, %v2746_v58 }
 0x395   : > { %10643 = vrot.lane.b32.xlu1 %v10632_v22, %s10856_s30  ;;  %10658 = vrot.lane.b32.xlu0 %v10657_v32, %s10856_s30 }
 0x399   : > { %10653 = vrot.lane.b32.xlu1 %v10647_v26, %s10857_s24 }
 0x39d   : > { %10663 = vrot.lane.b32.xlu1 %v10657_v32, %s10857_s24 }
 0x3a3   : > { %v10549_v50 = vpop.permute.xlu0 %10548 }
 0x3a4   : > { %v10551_v0 = vunpack.i.h.bf16 %v10549_v50  ;;  %v10550_v42 = vunpack.i.l.bf16 %v10549_v50 }
 0x3a6   : > { %v11900_v60 = vpack.c.bf16 %v10551_v0, %v10550_v42 }
 0x3a7   : > { %v10554_v47 = vpop.permute.xlu1 %10553  ;;  %v10564_v28 = vpop.permute.xlu0 %10563 }
 0x3a8   : > { %v10556_v6 = vunpack.i.h.bf16 %v10554_v47  ;;  %v10555_v9 = vunpack.i.l.bf16 %v10554_v47  ;;  %9802 = vmatprep.subr.bf16.mxu0 %v11900_v60  ;;  %v10566_v10 = vunpack.i.h.bf16 %v10564_v28  ;;  %v10565_v24 = vunpack.i.l.bf16 %v10564_v28 }
 0x3a9   : > { %v8195_v37 = vpop.f32.mrb[64].mxu1  ;;  %9804 = vmatpush3.bf16.msra.mxu0 %v11768_v8 }
 0x3aa   : > { %v8196_v53 = vpop.f32.mrb[65].mxu1  ;;  %v11904_v45 = vpack.c.bf16 %v10556_v6, %v10555_v9  ;;  %v9811_v8 = vpack.c.bf16 %v10566_v10, %v10565_v24 }
 0x3ab   : > { %v8197_v57 = vadd.f32 %v8196_v53, %v8195_v37  ;;  %v10559_v1 = vpop.permute.xlu1 %10558 }
 0x3ac   : > { %v10561_v19 = vunpack.i.h.bf16 %v10559_v1  ;;  %v10560_v14 = vunpack.i.l.bf16 %v10559_v1  ;;  %9806 = vmatprep.subr.bf16.mxu0 %v11904_v45 }
 0x3ad   : > { %v8198_v41 = vpop.f32.mrb[66].mxu1  ;;  %v2843_v35 = vadd.f32 %v8197_v57, %v11755_v31  ;;  %9808 = vmatpush3.bf16.msra.mxu0 %v11779_v49 }
 0x3ae   : > { %v8199_v13 = vpop.f32.mrb[67].mxu1  ;;  %v11909_v43 = vpack.c.bf16 %v10561_v19, %v10560_v14 }
 0x3af   : > { %v8200_v21 = vadd.f32 %v8199_v13, %v8198_v41  ;;  %v2928_v61 = vadd.f32 %v11849_v34, %v2843_v35 }
 0x3b0   : > { %9810 = vmatprep.subr.bf16.mxu0 %v11909_v43 }
 0x3b1   : > { %v2848_v63 = vadd.f32 %v8200_v21, %v11758_v56  ;;  %v8201_v54 = vpop.f32.mrb[68].mxu1  ;;  %9812 = vmatpush3.bf16.msra.mxu0 %v9811_v8  ;;  %v2946_v20 = vmax.f32 %v2928_v61, 0.0  ;;  %v11955_v8 = vld [vmem:[%s12922_s5 + $0x28] sm:$0xff] }
 0x3b2   : > { %v8202_v59 = vpop.f32.mrb[69].mxu1 }
 0x3b3   : > { %v2933_v27 = vadd.f32 %v11847_v11, %v2848_v63  ;;  %v8203_v7 = vadd.f32 %v8202_v59, %v8201_v54  ;;  %v11961_v63 = vld [vmem:[%s12922_s5 + $0x40] sm:$0xff] }
 0x3b5   : > { %v2947_v31 = vmax.f32 %v2933_v27, 0.0  ;;  %v8204_v49 = vpop.f32.mrb[70].mxu1  ;;  %v2853_v17 = vadd.f32 %v8203_v7, %v11761_v3  ;;  %v2962_v3 = vld [vmem:[%s12923_s6] sm:$0xff]  ;;  %v11972_v7 = vld [vmem:[%s12922_s5 + $0x58] sm:$0xff] }
 0x3b6   : > { %v8205_v33 = vpop.f32.mrb[71].mxu1 }
 0x3b7   : > { %v8206_v4 = vadd.f32 %v8205_v33, %v8204_v49  ;;  %v2938_v16 = vadd.f32 %v11856_v55, %v2853_v17  ;;  %v10667_v34 = vpack.i.bf16 %v2947_v31, %v2946_v20  ;;  %v11917_v18 = vpack.c.bf16 %v2947_v31, %v2946_v20  ;;  %v2965_v55 = vld [vmem:[%s12923_s6 + $0x18] sm:$0xff] }
 0x3b9   : > { %v2858_v56 = vadd.f32 %v8206_v4, %v11772_v29  ;;  %10668 = vrot.lane.b32.xlu0 %v10667_v34, %s10856_s30  ;;  %v2948_v25 = vmax.f32 %v2938_v16, 0.0  ;;  %v2964_v29 = vld [vmem:[%s12923_s6 + $0x10] sm:$0xff] }
 0x3bb   : > { %v2943_v39 = vadd.f32 %v11854_v51, %v2858_v56  ;;  %v2963_v51 = vld [vmem:[%s12923_s6 + $0x8] sm:$0xff] }
 0x3bd   : > { %v2949_v11 = vmax.f32 %v2943_v39, 0.0  ;;  %10678 = vrot.lane.b32.xlu0 %v10667_v34, %s10857_s24 }
 0x3bf   : > { %v10672_v2 = vpack.i.bf16 %v2949_v11, %v2948_v25  ;;  %v11926_v22 = vpack.c.bf16 %v2949_v11, %v2948_v25 }
 0x3c1   : > { %10673 = vrot.lane.b32.xlu1 %v10672_v2, %s10856_s30  ;;  %3052 = vperm.xlu0 %10365, %v2962_v3  }
 0x3c5   : > { %10683 = vrot.lane.b32.xlu1 %v10672_v2, %s10857_s24  ;;  %3062 = vperm.xlu0 %10365, %v2964_v29   ;;  %v11996_v29 = vld [vmem:[%s12922_s5] sm:$0xff] }
 0x3c9   : > { %3057 = vperm.xlu1 %10366, %v2963_v51  }
 0x3cb   : > { %v10569_v26 = vpop.permute.xlu0 %10568 }
 0x3cc   : > { %v10571_v44 = vunpack.i.h.bf16 %v10569_v26  ;;  %v10570_v58 = vunpack.i.l.bf16 %v10569_v26 }
 0x3cd   : > { %3067 = vperm.xlu1 %10366, %v2965_v55  }
 0x3ce   : > { %v11939_v32 = vpack.c.bf16 %v10571_v44, %v10570_v58  ;;  %v12023_v44 = vld [vmem:[%s12922_s5 + $0x38] sm:$0xff] }
 0x3cf   : > { %v10574_v50 = vpop.permute.xlu0 %10573 }
 0x3d0   : > { %v10576_v0 = vunpack.i.h.bf16 %v10574_v50  ;;  %v10575_v42 = vunpack.i.l.bf16 %v10574_v50  ;;  %9834 = vmatprep.subr.bf16.mxu1 %v11939_v32  ;;  %v12034_v50 = vld [vmem:[%s12922_s5 + $0x30] sm:$0xff] }
 0x3d1   : > { %9836 = vmatpush3.bf16.msra.mxu1 %v11939_v32 }
 0x3d2   : > { %v11943_v47 = vpack.c.bf16 %v10576_v0, %v10575_v42  ;;  %v12041_v0 = vld [vmem:[%s12922_s5 + $0x50] sm:$0xff]  ;;  %v12049_v42 = vld [vmem:[%s12922_s5 + $0x48] sm:$0xff] }
 0x3d3   : > { %v10579_v6 = vpop.permute.xlu1 %10578  ;;  %v10589_v9 = vpop.permute.xlu0 %10588 }
 0x3d4   : > { %v10581_v28 = vunpack.i.h.bf16 %v10579_v6  ;;  %v10580_v37 = vunpack.i.l.bf16 %v10579_v6  ;;  %v10591_v53 = vunpack.i.h.bf16 %v10589_v9  ;;  %v10590_v57 = vunpack.i.l.bf16 %v10589_v9  ;;  %9814 = vmatprep.subr.bf16.mxu0 %v11943_v47 }
 0x3d6   : > { %v11946_v10 = vpack.c.bf16 %v10581_v28, %v10580_v37  ;;  %v11948_v24 = vpack.c.bf16 %v10591_v53, %v10590_v57 }
 0x3d7   : > { %v10584_v1 = vpop.permute.xlu1 %10583  ;;  %v10599_v19 = vpop.permute.xlu0 %10598 }
 0x3d8   : > { %v10586_v14 = vunpack.i.h.bf16 %v10584_v1  ;;  %v10585_v41 = vunpack.i.l.bf16 %v10584_v1  ;;  %v10601_v35 = vunpack.i.h.bf16 %v10599_v19  ;;  %v10600_v13 = vunpack.i.l.bf16 %v10599_v19  ;;  %9838 = vmatprep.subr.bf16.mxu1 %v11946_v10 }
 0x3d9   : > { %9840 = vmatpush3.bf16.msra.mxu1 %v11946_v10 }
 0x3da   : > { %v9815_v21 = vpack.c.bf16 %v10586_v14, %v10585_v41  ;;  %9842 = vmatprep.subr.bf16.mxu1 %v11948_v24  ;;  %v11963_v54 = vpack.c.bf16 %v10601_v35, %v10600_v13 }
 0x3db   : > { %v10594_v61 = vpop.permute.xlu1 %10593  ;;  %v10609_v16 = vpop.permute.xlu0 %10608 }
 0x3dc   : > { %v10596_v59 = vunpack.i.h.bf16 %v10594_v61  ;;  %v10595_v27 = vunpack.i.l.bf16 %v10594_v61  ;;  %9816 = vmatpush3.bf16.msra.mxu0 %v9815_v21  ;;  %9050 = vmatmul.mubr.msk.f32.vlgmr.msra.gmra.mrb[72].mxu1 %vm1551_vm1, %v11955_v8  ;;  %v10611_v2 = vunpack.i.h.bf16 %v10609_v16 }
 0x3dd   : > { %9818 = vmatprep.subr.bf16.mxu0 %v11815_v12  ;;  %9844 = vmatpush3.bf16.msra.mxu1 %v11789_v38 }
 0x3de   : > { %v9819_v31 = vpack.c.bf16 %v10596_v59, %v10595_v27  ;;  %9846 = vmatprep.subr.bf16.mxu1 %v11963_v54  ;;  %9052 = vmatprep.mubr.msk.f32.mxu1 %vm1551_vm1, %v11961_v63 }
 0x3df   : > { %v10604_v20 = vpop.permute.xlu1 %10603 }
 0x3e0   : > { %v10606_v49 = vunpack.i.h.bf16 %v10604_v20  ;;  %v10605_v17 = vunpack.i.l.bf16 %v10604_v20  ;;  %9820 = vmatpush3.bf16.msra.mxu0 %v9819_v31  ;;  %9053 = vmatmul.mubr.msk.f32.gmra.mrb[74].mxu1 %vm1551_vm1, %v11972_v7 }
 0x3e1   : > { %9822 = vmatprep.subr.bf16.mxu0 %v11836_v5  ;;  %9848 = vmatpush3.bf16.msra.mxu1 %v11792_v23 }
 0x3e2   : > { %v9823_v33 = vpack.c.bf16 %v10606_v49, %v10605_v17  ;;  %9850 = vmatprep.subr.bf16.mxu1 %v11939_v32  ;;  %3348 = vmatprep.mubr.f32.mxu1 %v11864_v52 }
 0x3e3   : > { %v10614_v4 = vpop.permute.xlu1 %10613 }
 0x3e4   : > { %9824 = vmatpush3.bf16.msra.mxu0 %v9823_v33  ;;  %v10616_v34 = vunpack.i.h.bf16 %v10614_v4  ;;  %v10615_v56 = vunpack.i.l.bf16 %v10614_v4 }
 0x3e5   : > { %9826 = vmatprep.subr.bf16.mxu0 %v11948_v24  ;;  %9852 = vmatpush3.bf16.msra.mxu1 %v11900_v60  ;;  %v10610_v60 = vunpack.i.l.bf16 %v10609_v16 }
 0x3e6   : > { %9854 = vmatprep.subr.bf16.mxu1 %v11946_v10  ;;  %v11990_v11 = vpack.c.bf16 %v10616_v34, %v10615_v56 }
 0x3e7   : > { %v10624_v39 = vpop.permute.xlu1 %10623 }
 0x3e8   : > { %9828 = vmatpush3.bf16.msra.mxu0 %v11789_v38  ;;  %v10626_v25 = vunpack.i.h.bf16 %v10624_v39  ;;  %v10625_v3 = vunpack.i.l.bf16 %v10624_v39  ;;  %v10619_v38 = vpop.permute.xlu0 %10618 }
 0x3e9   : > { %9830 = vmatprep.subr.bf16.mxu0 %v11963_v54  ;;  %9856 = vmatpush3.bf16.msra.mxu1 %v11904_v45  ;;  %v12003_v45 = vld [vmem:[%s12922_s5 + $0x20] sm:$0xff]  ;;  %v10621_v55 = vunpack.i.h.bf16 %v10619_v38  ;;  %v10620_v26 = vunpack.i.l.bf16 %v10619_v38 }
 0x3ea   : > { %9858 = vmatprep.subr.bf16.mxu1 %v11840_v40  ;;  %v12006_v51 = vpack.c.bf16 %v10626_v25, %v10625_v3 }
 0x3eb   : > { %v12027_v58 = vpack.c.bf16 %v10621_v55, %v10620_v26 }
 0x3ec   : > { %9832 = vmatpush3.bf16.msra.mxu0 %v11792_v23  ;;  %v12009_v23 = vpack.c.bf16 %v10611_v2, %v10610_v60 }
 0x3ed   : > { %9860 = vmatpush3.bf16.msra.mxu1 %v11909_v43  ;;  %9874 = vmatprep.subr.bf16.mxu0 %v11990_v11  ;;  %v12016_v43 = vld [vmem:[%s12922_s5 + $0x18] sm:$0xff] }
 0x3ee   : > { %9862 = vmatprep.subr.bf16.mxu1 %v11842_v48 }
 0x3ef   : > { %3147 = vmatmul.mubr.f32.vlgmr.msra.gmra.mrb[48].mxu0 %v11996_v29 }
 0x3f0   : > { %9876 = vmatpush3.bf16.msra.mxu0 %v11990_v11  ;;  %3151 = vmatprep.mubr.f32.mxu0 %v12003_v45 }
 0x3f1   : > { %9864 = vmatpush3.bf16.msra.mxu1 %v11943_v47  ;;  %9878 = vmatprep.subr.bf16.mxu0 %v12006_v51 }
 0x3f2   : > { %9866 = vmatprep.subr.bf16.mxu1 %v12009_v23 }
 0x3f3   : > { %3152 = vmatmul.mubr.f32.gmra.mrb[50].mxu0 %v12016_v43 }
 0x3f4   : > { %9880 = vmatpush3.bf16.msra.mxu0 %v12006_v51  ;;  %3156 = vmatprep.mubr.f32.mxu0 %v12023_v44 }
 0x3f5   : > { %9868 = vmatpush3.bf16.msra.mxu1 %v11815_v12  ;;  %9882 = vmatprep.subr.bf16.mxu0 %v12009_v23 }
 0x3f6   : > { %9870 = vmatprep.subr.bf16.mxu1 %v12027_v58 }
 0x3f7   : > { %3157 = vmatmul.mubr.f32.gmra.mrb[52].mxu0 %v12034_v50 }
 0x3f8   : > { %3161 = vmatprep.mubr.f32.mxu0 %v12041_v0 }
 0x3f9   : > { %9872 = vmatpush3.bf16.msra.mxu1 %v11836_v5 }
 0x3fb   : > { %v10629_v47 = vpop.permute.xlu0 %10628  ;;  %3162 = vmatmul.mubr.f32.gmra.mrb[54].mxu0 %v12049_v42 }
 0x3fc   : > { %v10631_v6 = vunpack.i.h.bf16 %v10629_v47  ;;  %v10630_v9 = vunpack.i.l.bf16 %v10629_v47  ;;  %3349 = vmatmul.mubr.f32.vlgmr.msra.gmra.mrb[76].mxu1 %v11996_v29  ;;  %9063 = vmatprep.mubr.msk.f32.mxu0 %vm1551_vm1, %v11830_v62 }
 0x3fd   : > { %3353 = vmatprep.mubr.f32.mxu1 %v12003_v45 }
 0x3fe   : > { %v12057_v28 = vpack.c.bf16 %v10631_v6, %v10630_v9 }
 0x3ff   : > { %9064 = vmatmul.mubr.msk.f32.vlgmr.msra.gmra.mrb[56].mxu0 %vm1551_vm1, %v11955_v8  ;;  %v10639_v37 = vpop.permute.xlu0 %10638 }
 0x400   : > { %9884 = vmatpush3.bf16.msra.mxu0 %v11815_v12  ;;  %9914 = vmatprep.subr.bf16.mxu1 %v12057_v28  ;;  %v10641_v12 = vunpack.i.h.bf16 %v10639_v37  ;;  %v10640_v19 = vunpack.i.l.bf16 %v10639_v37 }
 0x401   : > { %3354 = vmatmul.mubr.f32.gmra.mrb[78].mxu1 %v12016_v43  ;;  %9886 = vmatprep.subr.bf16.mxu0 %v12027_v58 }
 0x402   : > { %9916 = vmatpush3.bf16.msra.mxu1 %v12057_v28  ;;  %3358 = vmatprep.mubr.f32.mxu1 %v12023_v44 }
 0x403   : > { %v10634_v53 = vpop.permute.xlu1 %10633  ;;  %9066 = vmatprep.mubr.msk.f32.mxu0 %vm1551_vm1, %v11961_v63 }
 0x404   : > { %v10636_v57 = vunpack.i.h.bf16 %v10634_v53  ;;  %v10635_v1 = vunpack.i.l.bf16 %v10634_v53  ;;  %9888 = vmatpush3.bf16.msra.mxu0 %v11836_v5  ;;  %v12080_v5 = vpack.c.bf16 %v10641_v12, %v10640_v19 }
 0x405   : > { %3359 = vmatmul.mubr.f32.gmra.mrb[80].mxu1 %v12034_v50  ;;  %9890 = vmatprep.subr.bf16.mxu0 %v11990_v11 }
 0x406   : > { %v12072_v14 = vpack.c.bf16 %v10636_v57, %v10635_v1  ;;  %3363 = vmatprep.mubr.f32.mxu1 %v12041_v0  ;;  %9067 = vmatmul.mubr.msk.f32.gmra.mrb[58].mxu0 %vm1551_vm1, %v11972_v7 }
 0x407   : > { %v10644_v41 = vpop.permute.xlu1 %10643  ;;  %3550 = vmatprep.mubr.f32.mxu0 %v11864_v52 }
 0x408   : > { %9892 = vmatpush3.bf16.msra.mxu0 %v11948_v24  ;;  %9918 = vmatprep.subr.bf16.mxu1 %v12072_v14  ;;  %v10646_v35 = vunpack.i.h.bf16 %v10644_v41  ;;  %v10645_v13 = vunpack.i.l.bf16 %v10644_v41 }
 0x409   : > { %3364 = vmatmul.mubr.f32.gmra.mrb[82].mxu1 %v12049_v42  ;;  %9894 = vmatprep.subr.bf16.mxu0 %v12006_v51 }
 0x40a   : > { %9920 = vmatpush3.bf16.msra.mxu1 %v12072_v14  ;;  %9077 = vmatprep.mubr.msk.f32.mxu1 %vm1551_vm1, %v11830_v62  ;;  %v12089_v24 = vpack.c.bf16 %v10646_v35, %v10645_v13 }
 0x40b   : > { %9922 = vmatprep.subr.bf16.mxu1 %v12080_v5  ;;  %v10654_v21 = vpop.permute.xlu1 %10653 }
 0x40c   : > { %9896 = vmatpush3.bf16.msra.mxu0 %v11963_v54  ;;  %v10656_v61 = vunpack.i.h.bf16 %v10654_v21  ;;  %v10649_v54 = vpop.permute.xlu0 %10648 }
 0x40d   : > { %9898 = vmatprep.subr.bf16.mxu0 %v11877_v46  ;;  %9078 = vmatmul.mubr.msk.f32.vlgmr.msra.gmra.mrb[84].mxu1 %vm1551_vm1, %v11955_v8  ;;  %v10650_v49 = vunpack.i.l.bf16 %v10649_v54 }
 0x40e   : > { %9924 = vmatpush3.bf16.msra.mxu1 %v11840_v40  ;;  %9080 = vmatprep.mubr.msk.f32.mxu1 %vm1551_vm1, %v11961_v63 }
 0x40f   : > { %9926 = vmatprep.subr.bf16.mxu1 %v12089_v24  ;;  %v10664_v59 = vpop.permute.xlu1 %10663 }
 0x410   : > { %9900 = vmatpush3.bf16.msra.mxu0 %v11939_v32  ;;  %v10655_v32 = vunpack.i.l.bf16 %v10654_v21  ;;  %v10666_v31 = vunpack.i.h.bf16 %v10664_v59  ;;  %v10665_v20 = vunpack.i.l.bf16 %v10664_v59  ;;  %v10659_v17 = vpop.permute.xlu0 %10658 }
 0x411   : > { %9902 = vmatprep.subr.bf16.mxu0 %v11888_v15  ;;  %9081 = vmatmul.mubr.msk.f32.gmra.mrb[86].mxu1 %vm1551_vm1, %v11972_v7  ;;  %v10661_v4 = vunpack.i.h.bf16 %v10659_v17  ;;  %v10660_v16 = vunpack.i.l.bf16 %v10659_v17 }
 0x412   : > { %9928 = vmatpush3.bf16.msra.mxu1 %v11842_v48  ;;  %3752 = vmatprep.mubr.f32.mxu1 %v11864_v52  ;;  %v9953_v27 = vpack.c.bf16 %v10656_v61, %v10655_v32  ;;  %v9957_v33 = vpack.c.bf16 %v10666_v31, %v10665_v20 }
 0x413   : > { %9930 = vmatprep.subr.bf16.mxu1 %v12057_v28 }
 0x414   : > { %9904 = vmatpush3.bf16.msra.mxu0 %v11946_v10  ;;  %v10651_v10 = vunpack.i.h.bf16 %v10649_v54 }
 0x415   : > { %9906 = vmatprep.subr.bf16.mxu0 %v12080_v5 }
 0x416   : > { %9932 = vmatpush3.bf16.msra.mxu1 %v12009_v23 }
 0x417   : > { %9934 = vmatprep.subr.bf16.mxu1 %v12072_v14 }
 0x418   : > { %9908 = vmatpush3.bf16.msra.mxu0 %v11840_v40  ;;  %v9945_v40 = vpack.c.bf16 %v10651_v10, %v10650_v49 }
 0x419   : > { %9910 = vmatprep.subr.bf16.mxu0 %v12089_v24 }
 0x41a   : > { %9936 = vmatpush3.bf16.msra.mxu1 %v12027_v58 }
 0x41b   : > { %9938 = vmatprep.subr.bf16.mxu1 %v11890_v30 }
 0x41c   : > { %9912 = vmatpush3.bf16.msra.mxu0 %v11842_v48  ;;  %v9949_v48 = vpack.c.bf16 %v10661_v4, %v10660_v16 }
 0x41d   : > { %9954 = vmatprep.subr.bf16.mxu0 %v9953_v27 }
 0x41e   : > { %9940 = vmatpush3.bf16.msra.mxu1 %v11990_v11 }
 0x41f   : > { %9942 = vmatprep.subr.bf16.mxu1 %v11894_v36  ;;  %3551 = vmatmul.mubr.f32.vlgmr.msra.gmra.mrb[60].mxu0 %v11996_v29 }
 0x420   : > { %9956 = vmatpush3.bf16.msra.mxu0 %v9953_v27  ;;  %3555 = vmatprep.mubr.f32.mxu0 %v12003_v45 }
 0x421   : > { %9958 = vmatprep.subr.bf16.mxu0 %v9957_v33 }
 0x422   : > { %9944 = vmatpush3.bf16.msra.mxu1 %v12006_v51 }
 0x423   : > { %9946 = vmatprep.subr.bf16.mxu1 %v9945_v40  ;;  %3556 = vmatmul.mubr.f32.gmra.mrb[62].mxu0 %v12016_v43 }
 0x424   : > { %9960 = vmatpush3.bf16.msra.mxu0 %v9957_v33  ;;  %3560 = vmatprep.mubr.f32.mxu0 %v12023_v44 }
 0x425   : > { %9962 = vmatprep.subr.bf16.mxu0 %v9945_v40 }
 0x426   : > { %9948 = vmatpush3.bf16.msra.mxu1 %v11877_v46 }
 0x427   : > { %9950 = vmatprep.subr.bf16.mxu1 %v9949_v48  ;;  %3561 = vmatmul.mubr.f32.gmra.mrb[64].mxu0 %v12034_v50 }
 0x428   : > { %3565 = vmatprep.mubr.f32.mxu0 %v12041_v0 }
 0x42a   : > { %9952 = vmatpush3.bf16.msra.mxu1 %v11888_v15 }
 0x42b   : > { %v10669_v34 = vpop.permute.xlu0 %10668  ;;  %3566 = vmatmul.mubr.f32.gmra.mrb[66].mxu0 %v12049_v42 }
 0x42c   : > { %9091 = vmatprep.mubr.msk.f32.mxu0 %vm1551_vm1, %v11830_v62  ;;  %v10670_v51 = vunpack.i.l.bf16 %v10669_v34 }
 0x42d   : > { %3753 = vmatmul.mubr.f32.vlgmr.msra.gmra.mrb[88].mxu1 %v11996_v29 }
 0x42e   : > { %3757 = vmatprep.mubr.f32.mxu1 %v12003_v45 }
 0x42f   : > { %v10679_v56 = vpop.permute.xlu0 %10678  ;;  %9092 = vmatmul.mubr.msk.f32.vlgmr.msra.gmra.mrb[68].mxu0 %vm1551_vm1, %v11955_v8 }
 0x430   : > { %v10681_v39 = vunpack.i.h.bf16 %v10679_v56  ;;  %v10680_v11 = vunpack.i.l.bf16 %v10679_v56  ;;  %9964 = vmatpush3.bf16.msra.mxu0 %v11877_v46  ;;  %9094 = vmatprep.mubr.msk.f32.mxu0 %vm1551_vm1, %v11961_v63 }
 0x431   : > { %3758 = vmatmul.mubr.f32.gmra.mrb[90].mxu1 %v12016_v43  ;;  %9966 = vmatprep.subr.bf16.mxu0 %v9949_v48 }
 0x432   : > { %v9993_v25 = vpack.c.bf16 %v10681_v39, %v10680_v11  ;;  %3762 = vmatprep.mubr.f32.mxu1 %v12023_v44 }
 0x433   : > { %v10674_v3 = vpop.permute.xlu1 %10673  ;;  %9095 = vmatmul.mubr.msk.f32.gmra.mrb[70].mxu0 %vm1551_vm1, %v11972_v7 }
 0x434   : > { %9968 = vmatpush3.bf16.msra.mxu0 %v11888_v15  ;;  %9994 = vmatprep.subr.bf16.mxu1 %v9993_v25  ;;  %v10671_v15 = vunpack.i.h.bf16 %v10669_v34  ;;  %v10675_v23 = vunpack.i.l.bf16 %v10674_v3 }
 0x435   : > { %3763 = vmatmul.mubr.f32.gmra.mrb[92].mxu1 %v12034_v50  ;;  %9970 = vmatprep.subr.bf16.mxu0 %v9953_v27 }
 0x436   : > { %9996 = vmatpush3.bf16.msra.mxu1 %v9993_v25  ;;  %3767 = vmatprep.mubr.f32.mxu1 %v12041_v0 }
 0x437   : > { %v10684_v46 = vpop.permute.xlu1 %10683  ;;  %3954 = vmatprep.mubr.f32.mxu0 %v11864_v52  ;;  %v9985_v52 = vpack.c.bf16 %v10671_v15, %v10670_v51 }
 0x438   : > { %v10686_v2 = vunpack.i.h.bf16 %v10684_v46  ;;  %v10685_v60 = vunpack.i.l.bf16 %v10684_v46  ;;  %9972 = vmatpush3.bf16.msra.mxu0 %v12080_v5 }
 0x439   : > { %3768 = vmatmul.mubr.f32.gmra.mrb[94].mxu1 %v12049_v42  ;;  %9974 = vmatprep.subr.bf16.mxu0 %v9957_v33 }
 0x43a   : > { %v9997_v38 = vpack.c.bf16 %v10686_v2, %v10685_v60  ;;  %9105 = vmatprep.mubr.msk.f32.mxu1 %vm1551_vm1, %v11830_v62  ;;  %v10676_v62 = vunpack.i.h.bf16 %v10674_v3 }
 0x43c   : > { %9976 = vmatpush3.bf16.msra.mxu0 %v12089_v24  ;;  %9998 = vmatprep.subr.bf16.mxu1 %v9997_v38 }
 0x43d   : > { %9978 = vmatprep.subr.bf16.mxu0 %v11917_v18  ;;  %10000 = vmatpush3.bf16.msra.mxu1 %v9997_v38  ;;  %v9989_v18 = vpack.c.bf16 %v10676_v62, %v10675_v23 }
 0x440   : > { %9980 = vmatpush3.bf16.msra.mxu0 %v12057_v28  ;;  %9106 = vmatmul.mubr.msk.f32.vlgmr.msra.gmra.mrb[96].mxu1 %vm1551_vm1, %v11955_v8 }
 0x441   : > { %9982 = vmatprep.subr.bf16.mxu0 %v11926_v22  ;;  %9108 = vmatprep.mubr.msk.f32.mxu1 %vm1551_vm1, %v11961_v63 }
 0x444   : > { %9984 = vmatpush3.bf16.msra.mxu0 %v12072_v14  ;;  %9109 = vmatmul.mubr.msk.f32.gmra.mrb[98].mxu1 %vm1551_vm1, %v11972_v7 }
 0x445   : > { %9986 = vmatprep.subr.bf16.mxu0 %v9985_v52 }
 0x448   : > { %9988 = vmatpush3.bf16.msra.mxu0 %v11890_v30 }
 0x449   : > { %9990 = vmatprep.subr.bf16.mxu0 %v9989_v18 }
 0x44c   : > { %9992 = vmatpush3.bf16.msra.mxu0 %v11894_v36 }
 0x44f   : > { %3955 = vmatmul.mubr.f32.vlgmr.msra.gmra.mrb[72].mxu0 %v11996_v29  ;;  %v12167_v29 = vpop.permute.xlu0 %3052 }
 0x450   : > { %3959 = vmatprep.mubr.f32.mxu0 %v12003_v45 }
 0x453   : > { %3960 = vmatmul.mubr.f32.gmra.mrb[74].mxu0 %v12016_v43  ;;  %v12173_v28 = vpop.permute.xlu0 %3062 }
 0x454   : > { %3964 = vmatprep.mubr.f32.mxu0 %v12023_v44 }
 0x457   : > { %3965 = vmatmul.mubr.f32.gmra.mrb[76].mxu0 %v12034_v50  ;;  %v12170_v50 = vpop.permute.xlu1 %3057 }
 0x458   : > { %3969 = vmatprep.mubr.f32.mxu0 %v12041_v0 }
 0x45b   : > { %3970 = vmatmul.mubr.f32.gmra.mrb[78].mxu0 %v12049_v42  ;;  %v12176_v13 = vpop.permute.xlu1 %3067 }
 0x4af   : > { %v9051_v22 = vpop.f32.mrb[72].mxu1 }
 0x4b0   : > { %v3233_v8 = vpop.f32.mrb[73].mxu1 }
 0x4b3   : > { %v9054_v30 = vpop.f32.mrb[74].mxu1 }
 0x4b4   : > { %v3243_v63 = vpop.f32.mrb[75].mxu1 }
 0x4c2   : > { %v8247_v7 = vpop.f32.mrb[48].mxu0 }
 0x4c3   : > { %v8248_v36 = vpop.f32.mrb[49].mxu0 }
 0x4c4   : > { %v8249_v55 = vadd.f32 %v8248_v36, %v8247_v7 }
 0x4c6   : > { %v3149_v45 = vadd.f32 %v8249_v55, %v12167_v29  ;;  %v8250_v26 = vpop.f32.mrb[50].mxu0 }
 0x4c7   : > { %v8251_v43 = vpop.f32.mrb[51].mxu0 }
 0x4c8   : > { %v3234_v44 = vadd.f32 %v3233_v8, %v3149_v45  ;;  %v8252_v58 = vadd.f32 %v8251_v43, %v8250_v26 }
 0x4ca   : > { %v3154_v0 = vadd.f32 %v8252_v58, %v12170_v50  ;;  %v8253_v42 = vpop.f32.mrb[52].mxu0  ;;  %v3252_v37 = vmax.f32 %v3234_v44, 0.0 }
 0x4cb   : > { %v8254_v47 = vpop.f32.mrb[53].mxu0 }
 0x4cc   : > { %v3239_v6 = vadd.f32 %v9051_v22, %v3154_v0  ;;  %v8255_v9 = vadd.f32 %v8254_v47, %v8253_v42 }
 0x4ce   : > { %v3253_v53 = vmax.f32 %v3239_v6, 0.0  ;;  %v8256_v57 = vpop.f32.mrb[54].mxu0  ;;  %v3159_v1 = vadd.f32 %v8255_v9, %v12173_v28 }
 0x4cf   : > { %v8257_v12 = vpop.f32.mrb[55].mxu0  ;;  %v8299_v19 = vpop.f32.mrb[76].mxu1 }
 0x4d0   : > { %v3244_v14 = vadd.f32 %v3243_v63, %v3159_v1  ;;  %v8258_v41 = vadd.f32 %v8257_v12, %v8256_v57  ;;  %v8300_v5 = vpop.f32.mrb[77].mxu1  ;;  %v10717_v35 = vpack.i.bf16 %v3253_v53, %v3252_v37  ;;  %v12178_v21 = vpack.c.bf16 %v3253_v53, %v3252_v37 }
 0x4d1   : > { %v8301_v24 = vadd.f32 %v8300_v5, %v8299_v19 }
 0x4d2   : > { %v3164_v61 = vadd.f32 %v8258_v41, %v12176_v13  ;;  %v9065_v32 = vpop.f32.mrb[56].mxu0  ;;  %v3254_v49 = vmax.f32 %v3244_v14, 0.0 }
 0x4d3   : > { %v3351_v54 = vadd.f32 %v8301_v24, %v12167_v29  ;;  %v3435_v59 = vpop.f32.mrb[57].mxu0 }
 0x4d4   : > { %v3249_v27 = vadd.f32 %v9054_v30, %v3164_v61  ;;  %v8302_v31 = vpop.f32.mrb[78].mxu1 }
 0x4d5   : > { %v3436_v20 = vadd.f32 %v3435_v59, %v3351_v54  ;;  %v8303_v10 = vpop.f32.mrb[79].mxu1 }
 0x4d6   : > { %v3255_v17 = vmax.f32 %v3249_v27, 0.0  ;;  %v8304_v33 = vadd.f32 %v8303_v10, %v8302_v31 }
 0x4d7   : > { %v3454_v3 = vmax.f32 %v3436_v20, 0.0 }
 0x4d8   : > { %v3356_v40 = vadd.f32 %v8304_v33, %v12170_v50  ;;  %v8305_v4 = vpop.f32.mrb[80].mxu1  ;;  %v10712_v16 = vpack.i.bf16 %v3255_v17, %v3254_v49  ;;  %v12183_v48 = vpack.c.bf16 %v3255_v17, %v3254_v49 }
 0x4d9   : > { %v8306_v34 = vpop.f32.mrb[81].mxu1  ;;  %v9068_v56 = vpop.f32.mrb[58].mxu0 }
 0x4da   : > { %v3441_v39 = vadd.f32 %v9065_v32, %v3356_v40  ;;  %v8307_v11 = vadd.f32 %v8306_v34, %v8305_v4  ;;  %v3445_v25 = vpop.f32.mrb[59].mxu0  ;;  %v12211_v4 = vld [vmem:[%s12924_s7 + $0x8] sm:$0xff] }
 0x4db   : > { %4260 = vmatprep.mubr.f32.mxu1 %v12211_v4 }
 0x4dc   : > { %v3455_v46 = vmax.f32 %v3441_v39, 0.0  ;;  %v8308_v2 = vpop.f32.mrb[82].mxu1  ;;  %v3361_v60 = vadd.f32 %v8307_v11, %v12173_v28 }
 0x4dd   : > { %v8309_v38 = vpop.f32.mrb[83].mxu1 }
 0x4de   : > { %v8310_v15 = vadd.f32 %v8309_v38, %v8308_v2  ;;  %v3446_v51 = vadd.f32 %v3445_v25, %v3361_v60  ;;  %v10687_v52 = vpack.i.bf16 %v3455_v46, %v3454_v3  ;;  %v12186_v62 = vpack.c.bf16 %v3455_v46, %v3454_v3 }
 0x4e0   : > { %v3366_v23 = vadd.f32 %v8310_v15, %v12176_v13  ;;  %10688 = vrot.lane.b32.xlu0 %v10687_v52, %s10856_s30  ;;  %v9079_v18 = vpop.f32.mrb[84].mxu1  ;;  %v3456_v63 = vmax.f32 %v3446_v51, 0.0 }
 0x4e1   : > { %v3637_v22 = vpop.f32.mrb[85].mxu1 }
 0x4e2   : > { %v3451_v8 = vadd.f32 %v9068_v56, %v3366_v23 }
 0x4e4   : > { %v3457_v30 = vmax.f32 %v3451_v8, 0.0  ;;  %10698 = vrot.lane.b32.xlu0 %v10687_v52, %s10857_s24  ;;  %v9082_v7 = vpop.f32.mrb[86].mxu1 }
 0x4e5   : > { %v3647_v36 = vpop.f32.mrb[87].mxu1 }
 0x4e6   : > { %v10707_v55 = vpack.i.bf16 %v3457_v30, %v3456_v63  ;;  %v12191_v45 = vpack.c.bf16 %v3457_v30, %v3456_v63 }
 0x4e8   : > { %10693 = vrot.lane.b32.xlu1 %v10707_v55, %s10856_s30  ;;  %10708 = vrot.lane.b32.xlu0 %v10707_v55, %s10857_s24 }
 0x4ec   : > { %10718 = vrot.lane.b32.xlu0 %v10717_v35, %s10857_s24  ;;  %10703 = vrot.lane.b32.xlu1 %v10717_v35, %s10856_s30 }
 0x4f0   : > { %10713 = vrot.lane.b32.xlu1 %v10712_v16, %s10856_s30 }
 0x4f2   : > { %v8351_v26 = vpop.f32.mrb[60].mxu0 }
 0x4f3   : > { %v8352_v43 = vpop.f32.mrb[61].mxu0 }
 0x4f4   : > { %v8353_v44 = vadd.f32 %v8352_v43, %v8351_v26  ;;  %10723 = vrot.lane.b32.xlu1 %v10712_v16, %s10857_s24  ;;  %v12216_v16 = vld [vmem:[%s12924_s7 + $0x10] sm:$0xff] }
 0x4f5   : > { %9119 = vmatprep.mubr.msk.f32.mxu0 %vm1551_vm1, %v12216_v16 }
 0x4f6   : > { %v3553_v58 = vadd.f32 %v8353_v44, %v12167_v29  ;;  %v8354_v0 = vpop.f32.mrb[62].mxu0 }
 0x4f7   : > { %v8355_v42 = vpop.f32.mrb[63].mxu0 }
 0x4f8   : > { %v3638_v47 = vadd.f32 %v3637_v22, %v3553_v58  ;;  %v8356_v6 = vadd.f32 %v8355_v42, %v8354_v0 }
 0x4fa   : > { %v3558_v9 = vadd.f32 %v8356_v6, %v12170_v50  ;;  %v8357_v37 = vpop.f32.mrb[64].mxu0  ;;  %v3656_v12 = vmax.f32 %v3638_v47, 0.0 }
 0x4fb   : > { %v8358_v53 = vpop.f32.mrb[65].mxu0 }
 0x4fc   : > { %v3643_v57 = vadd.f32 %v9079_v18, %v3558_v9  ;;  %v8359_v1 = vadd.f32 %v8358_v53, %v8357_v37 }
 0x4fe   : > { %v3657_v19 = vmax.f32 %v3643_v57, 0.0  ;;  %v8360_v14 = vpop.f32.mrb[66].mxu0  ;;  %v3563_v41 = vadd.f32 %v8359_v1, %v12173_v28 }
 0x4ff   : > { %v8361_v5 = vpop.f32.mrb[67].mxu0 }
 0x500   : > { %v3648_v35 = vadd.f32 %v3647_v36, %v3563_v41  ;;  %v8362_v24 = vadd.f32 %v8361_v5, %v8360_v14  ;;  %v8403_v61 = vpop.f32.mrb[88].mxu1  ;;  %v10727_v32 = vpack.i.bf16 %v3657_v19, %v3656_v12  ;;  %v12202_v59 = vpack.c.bf16 %v3657_v19, %v3656_v12 }
 0x501   : > { %v8404_v54 = vpop.f32.mrb[89].mxu1 }
 0x502   : > { %v3568_v27 = vadd.f32 %v8362_v24, %v12176_v13  ;;  %v8405_v31 = vadd.f32 %v8404_v54, %v8403_v61  ;;  %v9093_v20 = vpop.f32.mrb[68].mxu0  ;;  %10728 = vrot.lane.b32.xlu0 %v10727_v32, %s10856_s30  ;;  %10733 = vrot.lane.b32.xlu1 %v10727_v32, %s10857_s24  ;;  %v3658_v34 = vmax.f32 %v3648_v35, 0.0 }
 0x503   : > { %v3839_v10 = vpop.f32.mrb[69].mxu0 }
 0x504   : > { %v3653_v49 = vadd.f32 %v9082_v7, %v3568_v27  ;;  %v8406_v17 = vpop.f32.mrb[90].mxu1  ;;  %v3755_v33 = vadd.f32 %v8405_v31, %v12167_v29 }
 0x505   : > { %v8407_v40 = vpop.f32.mrb[91].mxu1 }
 0x506   : > { %v3659_v56 = vmax.f32 %v3653_v49, 0.0  ;;  %v3840_v39 = vadd.f32 %v3839_v10, %v3755_v33  ;;  %v8408_v11 = vadd.f32 %v8407_v40, %v8406_v17  ;;  %v9096_v25 = vpop.f32.mrb[70].mxu0 }
 0x507   : > { %v3849_v3 = vpop.f32.mrb[71].mxu0 }
 0x508   : > { %v3760_v46 = vadd.f32 %v8408_v11, %v12170_v50  ;;  %v8409_v2 = vpop.f32.mrb[92].mxu1  ;;  %v10737_v60 = vpack.i.bf16 %v3659_v56, %v3658_v34  ;;  %v12222_v15 = vpack.c.bf16 %v3659_v56, %v3658_v34  ;;  %v3858_v23 = vmax.f32 %v3840_v39, 0.0  ;;  %v4076_v11 = vld [vmem:[%s12925_s8] sm:$0xff] }
 0x509   : > { %v8410_v38 = vpop.f32.mrb[93].mxu1 }
 0x50a   : > { %v3845_v51 = vadd.f32 %v9093_v20, %v3760_v46  ;;  %v8411_v52 = vadd.f32 %v8410_v38, %v8409_v2  ;;  %10738 = vrot.lane.b32.xlu0 %v10737_v60, %s10856_s30  ;;  %10743 = vrot.lane.b32.xlu1 %v10737_v60, %s10857_s24 }
 0x50c   : > { %v3859_v18 = vmax.f32 %v3845_v51, 0.0  ;;  %v8412_v22 = vpop.f32.mrb[94].mxu1  ;;  %v3765_v8 = vadd.f32 %v8411_v52, %v12173_v28 }
 0x50d   : > { %v8413_v30 = vpop.f32.mrb[95].mxu1 }
 0x50e   : > { %v8414_v63 = vadd.f32 %v8413_v30, %v8412_v22  ;;  %v3850_v7 = vadd.f32 %v3849_v3, %v3765_v8  ;;  %v10747_v36 = vpack.i.bf16 %v3859_v18, %v3858_v23  ;;  %v12227_v55 = vpack.c.bf16 %v3859_v18, %v3858_v23 }
 0x510   : > { %v3770_v26 = vadd.f32 %v8414_v63, %v12176_v13  ;;  %10748 = vrot.lane.b32.xlu0 %v10747_v36, %s10857_s24  ;;  %v3860_v0 = vmax.f32 %v3850_v7, 0.0 }
 0x512   : > { %v3855_v43 = vadd.f32 %v9096_v25, %v3770_v26 }
 0x513   : > { %v9107_v44 = vpop.f32.mrb[96].mxu1 }
 0x514   : > { %v3861_v58 = vmax.f32 %v3855_v43, 0.0  ;;  %10758 = vrot.lane.b32.xlu0 %v10747_v36, %s10856_s30  ;;  %v4041_v42 = vpop.f32.mrb[97].mxu1 }
 0x516   : > { %v10762_v47 = vpack.i.bf16 %v3861_v58, %v3860_v0  ;;  %v12232_v6 = vpack.c.bf16 %v3861_v58, %v3860_v0 }
 0x517   : > { %v9110_v9 = vpop.f32.mrb[98].mxu1 }
 0x518   : > { %10753 = vrot.lane.b32.xlu1 %v10762_v47, %s10857_s24  ;;  %v4051_v37 = vpop.f32.mrb[99].mxu1 }
 0x51c   : > { %10763 = vrot.lane.b32.xlu1 %v10762_v47, %s10856_s30 }
 0x522   : > { %v8455_v53 = vpop.f32.mrb[72].mxu0 }
 0x523   : > { %v8456_v57 = vpop.f32.mrb[73].mxu0 }
 0x524   : > { %v8457_v1 = vadd.f32 %v8456_v57, %v8455_v53 }
 0x526   : > { %v8458_v12 = vpop.f32.mrb[74].mxu0  ;;  %v3957_v19 = vadd.f32 %v8457_v1, %v12167_v29 }
 0x527   : > { %v8459_v14 = vpop.f32.mrb[75].mxu0 }
 0x528   : > { %v8460_v41 = vadd.f32 %v8459_v14, %v8458_v12  ;;  %v4042_v5 = vadd.f32 %v4041_v42, %v3957_v19 }
 0x52a   : > { %v3962_v35 = vadd.f32 %v8460_v41, %v12170_v50  ;;  %v8461_v24 = vpop.f32.mrb[76].mxu0  ;;  %v4060_v31 = vmax.f32 %v4042_v5, 0.0 }
 0x52b   : > { %v8462_v61 = vpop.f32.mrb[77].mxu0 }
 0x52c   : > { %v4047_v32 = vadd.f32 %v9107_v44, %v3962_v35  ;;  %v8463_v54 = vadd.f32 %v8462_v61, %v8461_v24 }
 0x52e   : > { %v4061_v27 = vmax.f32 %v4047_v32, 0.0  ;;  %v8464_v20 = vpop.f32.mrb[78].mxu0  ;;  %v3967_v10 = vadd.f32 %v8463_v54, %v12173_v28 }
 0x52f   : > { %v8465_v49 = vpop.f32.mrb[79].mxu0 }
 0x530   : > { %v10772_v17 = vpack.i.bf16 %v4061_v27, %v4060_v31  ;;  %v8466_v33 = vadd.f32 %v8465_v49, %v8464_v20  ;;  %v4052_v40 = vadd.f32 %v4051_v37, %v3967_v10  ;;  %v12239_v34 = vpack.c.bf16 %v4061_v27, %v4060_v31 }
 0x532   : > { %v3972_v29 = vadd.f32 %v8466_v33, %v12176_v13  ;;  %10768 = vrot.lane.b32.xlu0 %v10772_v17, %s10856_s30  ;;  %v4062_v39 = vmax.f32 %v4052_v40, 0.0  ;;  %v4077_v13 = vld [vmem:[%s12925_s8 + $0x8] sm:$0xff] }
 0x534   : > { %v4057_v50 = vadd.f32 %v9110_v9, %v3972_v29 }
 0x536   : > { %v4063_v56 = vmax.f32 %v4057_v50, 0.0  ;;  %10773 = vrot.lane.b32.xlu0 %v10772_v17, %s10857_s24 }
 0x538   : > { %v10782_v28 = vpack.i.bf16 %v4063_v56, %v4062_v39  ;;  %v12247_v25 = vpack.c.bf16 %v4063_v56, %v4062_v39  ;;  %v12289_v56 = vld [vmem:[%s12924_s7] sm:$0xff]  ;;  %v12294_v39 = vld [vmem:[%s12924_s7 + $0x28] sm:$0xff] }
 0x53a   : > { %4166 = vperm.xlu0 %10365, %v4076_v11   ;;  %10778 = vrot.lane.b32.xlu1 %v10782_v28, %s10856_s30 }
 0x53e   : > { %10783 = vrot.lane.b32.xlu1 %v10782_v28, %s10857_s24 }
 0x542   : > { %4171 = vperm.xlu1 %10366, %v4077_v13   ;;  %v12300_v13 = vld [vmem:[%s12924_s7 + $0x20] sm:$0xff] }
 0x552   : > { %v10689_v3 = vpop.permute.xlu0 %10688 }
 0x553   : > { %v10691_v46 = vunpack.i.h.bf16 %v10689_v3  ;;  %v10690_v2 = vunpack.i.l.bf16 %v10689_v3 }
 0x555   : > { %v12254_v60 = vpack.c.bf16 %v10691_v46, %v10690_v2  ;;  %v12308_v46 = vld [vmem:[%s12924_s7 + $0x40] sm:$0xff]  ;;  %v12315_v2 = vld [vmem:[%s12924_s7 + $0x18] sm:$0xff] }
 0x556   : > { %v10699_v38 = vpop.permute.xlu0 %10698 }
 0x557   : > { %10002 = vmatprep.subr.bf16.mxu1 %v12254_v60  ;;  %v10701_v51 = vunpack.i.h.bf16 %v10699_v38  ;;  %v10700_v52 = vunpack.i.l.bf16 %v10699_v38  ;;  %v12320_v38 = vld [vmem:[%s12924_s7 + $0x58] sm:$0xff] }
 0x558   : > { %10004 = vmatpush3.bf16.msra.mxu1 %v12178_v21 }
 0x559   : > { %v12260_v63 = vpack.c.bf16 %v10701_v51, %v10700_v52  ;;  %v12326_v51 = vld [vmem:[%s12924_s7 + $0x38] sm:$0xff] }
 0x55a   : > { %v10694_v23 = vpop.permute.xlu1 %10693  ;;  %v10709_v8 = vpop.permute.xlu0 %10708 }
 0x55b   : > { %v10696_v18 = vunpack.i.h.bf16 %v10694_v23  ;;  %v10695_v22 = vunpack.i.l.bf16 %v10694_v23  ;;  %v10711_v36 = vunpack.i.h.bf16 %v10709_v8  ;;  %v10710_v26 = vunpack.i.l.bf16 %v10709_v8  ;;  %v12338_v23 = vld [vmem:[%s12924_s7 + $0x30] sm:$0xff] }
 0x55d   : > { %v12258_v30 = vpack.c.bf16 %v10696_v18, %v10695_v22  ;;  %v12265_v0 = vpack.c.bf16 %v10711_v36, %v10710_v26  ;;  %v12344_v36 = vld [vmem:[%s12924_s7 + $0x50] sm:$0xff] }
 0x55e   : > { %v10704_v7 = vpop.permute.xlu1 %10703  ;;  %v10719_v42 = vpop.permute.xlu0 %10718 }
 0x55f   : > { %v10706_v43 = vunpack.i.h.bf16 %v10704_v7  ;;  %v10705_v44 = vunpack.i.l.bf16 %v10704_v7  ;;  %10006 = vmatprep.subr.bf16.mxu1 %v12258_v30  ;;  %v10721_v53 = vunpack.i.h.bf16 %v10719_v42  ;;  %v10720_v57 = vunpack.i.l.bf16 %v10719_v42 }
 0x560   : > { %10008 = vmatpush3.bf16.msra.mxu1 %v12183_v48 }
 0x561   : > { %v10011_v21 = vpack.c.bf16 %v10706_v43, %v10705_v44  ;;  %10010 = vmatprep.subr.bf16.mxu1 %v12260_v63  ;;  %v10019_v48 = vpack.c.bf16 %v10721_v53, %v10720_v57  ;;  %v12353_v43 = vld [vmem:[%s12924_s7 + $0x48] sm:$0xff] }
 0x562   : > { %v10714_v58 = vpop.permute.xlu1 %10713 }
 0x563   : > { %v10716_v47 = vunpack.i.h.bf16 %v10714_v58  ;;  %v10715_v9 = vunpack.i.l.bf16 %v10714_v58 }
 0x564   : > { %10012 = vmatpush3.bf16.msra.mxu1 %v10011_v21 }
 0x565   : > { %v10015_v37 = vpack.c.bf16 %v10716_v47, %v10715_v9  ;;  %10014 = vmatprep.subr.bf16.mxu1 %v12265_v0 }
 0x566   : > { %v10724_v1 = vpop.permute.xlu1 %10723 }
 0x567   : > { %v10726_v12 = vunpack.i.h.bf16 %v10724_v1  ;;  %v10725_v19 = vunpack.i.l.bf16 %v10724_v1 }
 0x568   : > { %10016 = vmatpush3.bf16.msra.mxu1 %v10015_v37 }
 0x569   : > { %10018 = vmatprep.subr.bf16.mxu1 %v12202_v59  ;;  %v10023_v14 = vpack.c.bf16 %v10726_v12, %v10725_v19 }
 0x56c   : > { %10020 = vmatpush3.bf16.msra.mxu1 %v10019_v48 }
 0x56d   : > { %10022 = vmatprep.subr.bf16.mxu1 %v12222_v15 }
 0x570   : > { %10024 = vmatpush3.bf16.msra.mxu1 %v10023_v14 }
 0x574   : > { %v10729_v41 = vpop.permute.xlu0 %10728  ;;  %v10734_v5 = vpop.permute.xlu1 %10733 }
 0x575   : > { %v10731_v35 = vunpack.i.h.bf16 %v10729_v41  ;;  %v10730_v24 = vunpack.i.l.bf16 %v10729_v41  ;;  %v10736_v61 = vunpack.i.h.bf16 %v10734_v5  ;;  %v10735_v32 = vunpack.i.l.bf16 %v10734_v5 }
 0x577   : > { %v12270_v54 = vpack.c.bf16 %v10731_v35, %v10730_v24  ;;  %v12272_v27 = vpack.c.bf16 %v10736_v61, %v10735_v32 }
 0x579   : > { %10026 = vmatprep.subr.bf16.mxu1 %v12270_v54  ;;  %10034 = vmatprep.subr.bf16.mxu0 %v12272_v27 }
 0x57a   : > { %10028 = vmatpush3.bf16.msra.mxu1 %v12186_v62  ;;  %10036 = vmatpush3.bf16.msra.mxu0 %v12272_v27 }
 0x57c   : > { %v10739_v31 = vpop.permute.xlu0 %10738  ;;  %v10744_v20 = vpop.permute.xlu1 %10743 }
 0x57d   : > { %v10741_v10 = vunpack.i.h.bf16 %v10739_v31  ;;  %v10740_v49 = vunpack.i.l.bf16 %v10739_v31  ;;  %v10746_v17 = vunpack.i.h.bf16 %v10744_v20  ;;  %v10745_v33 = vunpack.i.l.bf16 %v10744_v20 }
 0x57f   : > { %v12278_v40 = vpack.c.bf16 %v10741_v10, %v10740_v49  ;;  %v12280_v29 = vpack.c.bf16 %v10746_v17, %v10745_v33 }
 0x581   : > { %10030 = vmatprep.subr.bf16.mxu1 %v12278_v40  ;;  %10038 = vmatprep.subr.bf16.mxu0 %v12280_v29 }
 0x582   : > { %v10749_v50 = vpop.permute.xlu0 %10748  ;;  %10032 = vmatpush3.bf16.msra.mxu1 %v12191_v45  ;;  %10040 = vmatpush3.bf16.msra.mxu0 %v12280_v29 }
 0x583   : > { %v10751_v11 = vunpack.i.h.bf16 %v10749_v50  ;;  %v10750_v28 = vunpack.i.l.bf16 %v10749_v50  ;;  %10042 = vmatprep.subr.bf16.mxu0 %v12270_v54 }
 0x585   : > { %v10073_v3 = vpack.c.bf16 %v10751_v11, %v10750_v28  ;;  %4261 = vmatmul.mubr.f32.vlgmr.msra.gmra.mrb[100].mxu1 %v12289_v56  ;;  %9120 = vmatmul.mubr.msk.f32.vlgmr.msra.gmra.mrb[80].mxu0 %vm1551_vm1, %v12294_v39  ;;  %v4817_v28 = vld [vmem:[%s12926_s9] sm:$0xff] }
 0x586   : > { %10044 = vmatpush3.bf16.msra.mxu0 %v12186_v62  ;;  %4265 = vmatprep.mubr.f32.mxu1 %v12300_v13  ;;  %v10759_v62 = vpop.permute.xlu0 %10758 }
 0x587   : > { %10074 = vmatprep.subr.bf16.mxu1 %v10073_v3  ;;  %10046 = vmatprep.subr.bf16.mxu0 %v12278_v40  ;;  %v10761_v18 = vunpack.i.h.bf16 %v10759_v62  ;;  %v10760_v22 = vunpack.i.l.bf16 %v10759_v62 }
 0x588   : > { %10076 = vmatpush3.bf16.msra.mxu1 %v10073_v3  ;;  %9122 = vmatprep.mubr.msk.f32.mxu0 %vm1551_vm1, %v12308_v46 }
 0x589   : > { %4266 = vmatmul.mubr.f32.gmra.mrb[102].mxu1 %v12315_v2  ;;  %9123 = vmatmul.mubr.msk.f32.gmra.mrb[82].mxu0 %vm1551_vm1, %v12320_v38  ;;  %v10065_v44 = vpack.c.bf16 %v10761_v18, %v10760_v22 }
 0x58a   : > { %v10754_v52 = vpop.permute.xlu1 %10753  ;;  %10048 = vmatpush3.bf16.msra.mxu0 %v12191_v45  ;;  %4270 = vmatprep.mubr.f32.mxu1 %v12326_v51 }
 0x58b   : > { %v10756_v8 = vunpack.i.h.bf16 %v10754_v52  ;;  %v10755_v7 = vunpack.i.l.bf16 %v10754_v52  ;;  %10050 = vmatprep.subr.bf16.mxu0 %v12272_v27  ;;  %4462 = vmatprep.mubr.f32.mxu0 %v12211_v4 }
 0x58d   : > { %v10077_v45 = vpack.c.bf16 %v10756_v8, %v10755_v7  ;;  %4271 = vmatmul.mubr.f32.gmra.mrb[104].mxu1 %v12338_v23 }
 0x58e   : > { %v10764_v26 = vpop.permute.xlu1 %10763  ;;  %10052 = vmatpush3.bf16.msra.mxu0 %v12254_v60  ;;  %4275 = vmatprep.mubr.f32.mxu1 %v12344_v36 }
 0x58f   : > { %10078 = vmatprep.subr.bf16.mxu1 %v10077_v45  ;;  %10054 = vmatprep.subr.bf16.mxu0 %v12280_v29  ;;  %v10766_v21 = vunpack.i.h.bf16 %v10764_v26  ;;  %v10765_v58 = vunpack.i.l.bf16 %v10764_v26 }
 0x590   : > { %10080 = vmatpush3.bf16.msra.mxu1 %v10077_v45 }
 0x591   : > { %10082 = vmatprep.subr.bf16.mxu1 %v10065_v44  ;;  %4276 = vmatmul.mubr.f32.gmra.mrb[106].mxu1 %v12353_v43  ;;  %v10069_v60 = vpack.c.bf16 %v10766_v21, %v10765_v58  ;;  %v4078_v21 = vld [vmem:[%s12925_s8 + $0x10] sm:$0xff] }
 0x592   : > { %10056 = vmatpush3.bf16.msra.mxu0 %v12258_v30  ;;  %9133 = vmatprep.mubr.msk.f32.mxu1 %vm1551_vm1, %v12216_v16 }
 0x593   : > { %10058 = vmatprep.subr.bf16.mxu0 %v12227_v55 }
 0x595   : > { %9134 = vmatmul.mubr.msk.f32.vlgmr.msra.gmra.mrb[108].mxu1 %vm1551_vm1, %v12294_v39 }
 0x596   : > { %10084 = vmatpush3.bf16.msra.mxu1 %v12202_v59  ;;  %10060 = vmatpush3.bf16.msra.mxu0 %v12260_v63 }
 0x597   : > { %10086 = vmatprep.subr.bf16.mxu1 %v10069_v60  ;;  %10062 = vmatprep.subr.bf16.mxu0 %v12232_v6 }
 0x598   : > { %9136 = vmatprep.mubr.msk.f32.mxu1 %vm1551_vm1, %v12308_v46 }
 0x599   : > { %9137 = vmatmul.mubr.msk.f32.gmra.mrb[110].mxu1 %vm1551_vm1, %v12320_v38 }
 0x59a   : > { %10088 = vmatpush3.bf16.msra.mxu1 %v12222_v15  ;;  %10064 = vmatpush3.bf16.msra.mxu0 %v12265_v0 }
 0x59b   : > { %10090 = vmatprep.subr.bf16.mxu1 %v10073_v3  ;;  %10066 = vmatprep.subr.bf16.mxu0 %v10065_v44  ;;  %v10858_v3 = vmov 0.0|0.0  }
 0x59c   : > { %4664 = vmatprep.mubr.f32.mxu1 %v12211_v4 }
 0x59e   : > { %10092 = vmatpush3.bf16.msra.mxu1 %v12270_v54  ;;  %10068 = vmatpush3.bf16.msra.mxu0 %v12202_v59 }
 0x59f   : > { %10094 = vmatprep.subr.bf16.mxu1 %v10077_v45  ;;  %10070 = vmatprep.subr.bf16.mxu0 %v10069_v60 }
 0x5a2   : > { %10096 = vmatpush3.bf16.msra.mxu1 %v12278_v40  ;;  %10072 = vmatpush3.bf16.msra.mxu0 %v12222_v15 }
 0x5a3   : > { %10098 = vmatprep.subr.bf16.mxu1 %v12239_v34 }
 0x5a4   : > { %v10769_v30 = vpop.permute.xlu0 %10768 }
 0x5a5   : > { %v10771_v63 = vunpack.i.h.bf16 %v10769_v30  ;;  %v10770_v42 = vunpack.i.l.bf16 %v10769_v30  ;;  %4463 = vmatmul.mubr.f32.vlgmr.msra.gmra.mrb[84].mxu0 %v12289_v56 }
 0x5a6   : > { %10100 = vmatpush3.bf16.msra.mxu1 %v12272_v27  ;;  %4467 = vmatprep.mubr.f32.mxu0 %v12300_v13 }
 0x5a7   : > { %10102 = vmatprep.subr.bf16.mxu1 %v12247_v25  ;;  %v10105_v4 = vpack.c.bf16 %v10771_v63, %v10770_v42  ;;  %v10862_v63 = vmov 0.0  }
 0x5a8   : > { %v10774_v59 = vpop.permute.xlu0 %10773 }
 0x5a9   : > { %v10776_v0 = vunpack.i.h.bf16 %v10774_v59  ;;  %v10775_v47 = vunpack.i.l.bf16 %v10774_v59  ;;  %4468 = vmatmul.mubr.f32.gmra.mrb[86].mxu0 %v12315_v2 }
 0x5aa   : > { %10104 = vmatpush3.bf16.msra.mxu1 %v12280_v29  ;;  %4472 = vmatprep.mubr.f32.mxu0 %v12326_v51 }
 0x5ab   : > { %v10113_v15 = vpack.c.bf16 %v10776_v0, %v10775_v47  ;;  %10106 = vmatprep.subr.bf16.mxu1 %v10105_v4 }
 0x5ac   : > { %v10779_v34 = vpop.permute.xlu1 %10778 }
 0x5ad   : > { %v10781_v9 = vunpack.i.h.bf16 %v10779_v34  ;;  %v10780_v37 = vunpack.i.l.bf16 %v10779_v34  ;;  %10114 = vmatprep.subr.bf16.mxu0 %v10113_v15  ;;  %4473 = vmatmul.mubr.f32.gmra.mrb[88].mxu0 %v12338_v23 }
 0x5ae   : > { %10108 = vmatpush3.bf16.msra.mxu1 %v12227_v55  ;;  %10116 = vmatpush3.bf16.msra.mxu0 %v10113_v15 }
 0x5af   : > { %v10109_v25 = vpack.c.bf16 %v10781_v9, %v10780_v37  ;;  %4477 = vmatprep.mubr.f32.mxu0 %v12344_v36 }
 0x5b0   : > { %v10784_v53 = vpop.permute.xlu1 %10783 }
 0x5b1   : > { %v10786_v57 = vunpack.i.h.bf16 %v10784_v53  ;;  %v10785_v1 = vunpack.i.l.bf16 %v10784_v53  ;;  %10110 = vmatprep.subr.bf16.mxu1 %v10109_v25  ;;  %4478 = vmatmul.mubr.f32.gmra.mrb[90].mxu0 %v12353_v43 }
 0x5b2   : > { %10112 = vmatpush3.bf16.msra.mxu1 %v12232_v6  ;;  %9147 = vmatprep.mubr.msk.f32.mxu0 %vm1551_vm1, %v12216_v16 }
 0x5b3   : > { %v10117_v48 = vpack.c.bf16 %v10786_v57, %v10785_v1  ;;  %10249 = vmatprep.subr.bf16.mxu1 %v10113_v15 }
 0x5b5   : > { %4665 = vmatmul.mubr.f32.vlgmr.msra.gmra.mrb[112].mxu1 %v12289_v56  ;;  %10118 = vmatprep.subr.bf16.mxu0 %v10117_v48 }
 0x5b6   : > { %10251 = vmatpush3.bf16.msra.mxu1 %v10113_v15  ;;  %10120 = vmatpush3.bf16.msra.mxu0 %v10117_v48 }
 0x5b7   : > { %10250 = vmatprep.subr.bf16.mxu1 %v10117_v48  ;;  %4669 = vmatprep.mubr.f32.mxu1 %v12300_v13  ;;  %v4818_v13 = vld [vmem:[%s12926_s9 + $0x8] sm:$0x1] }
 0x5b8   : > { %10121 = vmatprep.subr.bf16.mxu0 %v10858_v3 }
 0x5b9   : > { %4670 = vmatmul.mubr.f32.gmra.mrb[114].mxu1 %v12315_v2  ;;  %9148 = vmatmul.mubr.msk.f32.vlgmr.msra.gmra.mrb[92].mxu0 %vm1551_vm1, %v12294_v39  ;;  %v4167_v14 = vpop.permute.xlu0 %4166 }
 0x5ba   : > { %10252 = vmatpush3.bf16.msra.mxu1 %v10117_v48  ;;  %4674 = vmatprep.mubr.f32.mxu1 %v12326_v51 }
 0x5bb   : > { %9157 = vmatprep.mubr.msk.f32.mxu0 %vm10861_vm5, %v10862_v63 }
 0x5bd   : > { %4675 = vmatmul.mubr.f32.gmra.mrb[116].mxu1 %v12338_v23 }
 0x5be   : > { %4679 = vmatprep.mubr.f32.mxu1 %v12344_v36 }
 0x5c1   : > { %4680 = vmatmul.mubr.f32.gmra.mrb[118].mxu1 %v12353_v43  ;;  %v4172_v27 = vpop.permute.xlu1 %4171 }
 0x5c2   : > { %9150 = vmatprep.mubr.msk.f32.mxu1 %vm1551_vm1, %v12308_v46  ;;  %v10122_v46 = vpack.c.bf16 %v4818_v13, %v4817_v28 }
 0x5c4   : > { %10124 = vmatpush3.bf16.msk.msra.mxu0 %vm12428_vm4, %v10122_v46 }
 0x5c5   : > { %9151 = vmatmul.mubr.msk.f32.vlgmr.msra.gmra.mrb[120].mxu1 %vm1551_vm1, %v12320_v38  ;;  %10125 = vmatprep.subr.bf16.mxu0 %v10858_v3 }
 0x658   : > { %v8507_v16 = vpop.f32.mrb[100].mxu1  ;;  %v9121_v55 = vpop.f32.mrb[80].mxu0 }
 0x659   : > { %v8508_v6 = vpop.f32.mrb[101].mxu1  ;;  %v4347_v12 = vpop.f32.mrb[81].mxu0 }
 0x65a   : > { %v8509_v19 = vadd.f32 %v8508_v6, %v8507_v16 }
 0x65c   : > { %v8510_v41 = vpop.f32.mrb[102].mxu1  ;;  %v4263_v5 = vadd.f32 %v8509_v19, %v4167_v14  ;;  %v12405_v35 = vpop.f32.mrb[82].mxu0 }
 0x65d   : > { %v8511_v24 = vpop.f32.mrb[103].mxu1  ;;  %v12407_v61 = vpop.f32.mrb[83].mxu0 }
 0x65e   : > { %v8512_v32 = vadd.f32 %v8511_v24, %v8510_v41  ;;  %v12409_v54 = vadd.f32 %v4347_v12, %v4263_v5  ;;  %v4079_v5 = vld [vmem:[%s12925_s8 + $0x18] sm:$0xff] }
 0x660   : > { %v4268_v31 = vadd.f32 %v8512_v32, %v4172_v27  ;;  %v8513_v20 = vpop.f32.mrb[104].mxu1 }
 0x661   : > { %v8514_v10 = vpop.f32.mrb[105].mxu1 }
 0x662   : > { %v12411_v49 = vadd.f32 %v9121_v55, %v4268_v31  ;;  %v12413_v17 = vadd.f32 %v8514_v10, %v8513_v20  ;;  %v7608_v31 = vld [vmem:[%s12926_s9 + $0x18] sm:$0x1]  ;;  %v4366_v10 = vmax.f32 %v12409_v54, 0.0 }
 0x664   : > { %v8516_v33 = vpop.f32.mrb[106].mxu1 }
 0x665   : > { %v8517_v40 = vpop.f32.mrb[107].mxu1 }
 0x666   : > { %v12415_v29 = vadd.f32 %v8517_v40, %v8516_v33 }
 0x668   : > { %v9135_v50 = vpop.f32.mrb[108].mxu1 }
 0x669   : > { %v4549_v56 = vpop.f32.mrb[109].mxu1 }
 0x66c   : > { %v12417_v39 = vpop.f32.mrb[110].mxu1 }
 0x66d   : > { %v12419_v11 = vpop.f32.mrb[111].mxu1 }
 0x678   : > { %v8559_v38 = vpop.f32.mrb[84].mxu0 }
 0x679   : > { %v8560_v51 = vpop.f32.mrb[85].mxu0 }
 0x67a   : > { %v8561_v62 = vadd.f32 %v8560_v51, %v8559_v38 }
 0x67c   : > { %v4465_v52 = vadd.f32 %v8561_v62, %v4167_v14  ;;  %v8562_v23 = vpop.f32.mrb[86].mxu0 }
 0x67d   : > { %v8563_v18 = vpop.f32.mrb[87].mxu0 }
 0x67e   : > { %v4550_v22 = vadd.f32 %v4549_v56, %v4465_v52  ;;  %v8564_v8 = vadd.f32 %v8563_v18, %v8562_v23  ;;  %v7612_v52 = vld [vmem:[%s12926_s9 + $0x28] sm:$0x1] }
 0x680   : > { %v4568_v7 = vmax.f32 %v4550_v22, 0.0  ;;  %v4470_v36 = vadd.f32 %v8564_v8, %v4172_v27  ;;  %v8565_v45 = vpop.f32.mrb[88].mxu0  ;;  %v7616_v8 = vld [vmem:[%s12926_s9 + $0x38] sm:$0x1] }
 0x681   : > { %v8566_v26 = vpop.f32.mrb[89].mxu0 }
 0x682   : > { %v4555_v43 = vadd.f32 %v9135_v50, %v4470_v36  ;;  %4778 = vrot.lane.b32.xlu0 %v4568_v7, %s10860_s0  ;;  %v8567_v44 = vadd.f32 %v8566_v26, %v8565_v45  ;;  %v7619_v26 = vld [vmem:[%s12926_s9 + $0x40] sm:$0xff] }
 0x684   : > { %v8568_v58 = vpop.f32.mrb[90].mxu0  ;;  %v4569_v6 = vmax.f32 %v4555_v43, 0.0  ;;  %v7620_v43 = vld [vmem:[%s12926_s9 + $0x48] sm:$0x1] }
 0x685   : > { %v8569_v60 = vpop.f32.mrb[91].mxu0 }
 0x686   : > { %4176 = vperm.xlu0 %10365, %v4078_v21   ;;  %v12439_v30 = vadd.f32 %v8569_v60, %v8568_v58 }
 0x688   : > { %v8611_v42 = vpop.f32.mrb[112].mxu1 }
 0x689   : > { %v8612_v59 = vpop.f32.mrb[113].mxu1 }
 0x68a   : > { %v8613_v4 = vadd.f32 %v8612_v59, %v8611_v42  ;;  %v10138_v42 = vpack.c.bf16 %v7620_v43, %v7619_v26  ;;  %v7667_v26 = vld [vmem:[%s12926_s9 + $0x100] sm:$0xff]  ;;  %v7668_v43 = vld [vmem:[%s12926_s9 + $0x108] sm:$0x1] }
 0x68c   : > { %v8614_v0 = vpop.f32.mrb[114].mxu1  ;;  %v9149_v47 = vpop.f32.mrb[92].mxu0  ;;  %v4667_v15 = vadd.f32 %v8613_v4, %v4167_v14 }
 0x68d   : > { %v8615_v34 = vpop.f32.mrb[115].mxu1  ;;  %v4751_v9 = vpop.f32.mrb[93].mxu0 }
 0x68e   : > { %v8616_v37 = vadd.f32 %v8615_v34, %v8614_v0  ;;  %v4752_v25 = vadd.f32 %v4751_v9, %v4667_v15  ;;  %v7627_v9 = vld [vmem:[%s12926_s9 + $0x60] sm:$0xff] }
 0x690   : > { %v4672_v53 = vadd.f32 %v8616_v37, %v4172_v27  ;;  %v4770_v57 = vmax.f32 %v4752_v25, 0.0  ;;  %v8617_v1 = vpop.f32.mrb[116].mxu1  ;;  %v7607_v27 = vld [vmem:[%s12926_s9 + $0x10] sm:$0xff]  ;;  %v7628_v37 = vld [vmem:[%s12926_s9 + $0x68] sm:$0x1] }
 0x691   : > { %v8618_v48 = vpop.f32.mrb[117].mxu1  ;;  %v10126_v33 = vpack.c.bf16 %v7608_v31, %v7607_v27  ;;  %v10146_v25 = vpack.c.bf16 %v7628_v37, %v7627_v9  ;;  %v7680_v9 = vld [vmem:[%s12926_s9 + $0x138] sm:$0x1] }
 0x692   : > { %v4757_v16 = vadd.f32 %v9149_v47, %v4672_v53  ;;  %4794 = vrot.lane.b32.xlu1 %v4770_v57, %s10863_s21  ;;  %v8619_v55 = vadd.f32 %v8618_v48, %v8617_v1  ;;  %v7631_v57 = vld [vmem:[%s12926_s9 + $0x70] sm:$0xff]  ;;  %v7632_v1 = vld [vmem:[%s12926_s9 + $0x78] sm:$0x1] }
 0x693   : > { %v10150_v48 = vpack.c.bf16 %v7632_v1, %v7631_v57  ;;  %v7684_v57 = vld [vmem:[%s12926_s9 + $0x148] sm:$0x1] }
 0x694   : > { %v4771_v12 = vmax.f32 %v4757_v16, 0.0  ;;  %v8620_v19 = vpop.f32.mrb[118].mxu1 }
 0x695   : > { %v8621_v41 = vpop.f32.mrb[119].mxu1 }
 0x696   : > { %4780 = vrot.lane.b32.xlu1 %v4569_v6, %s10860_s0  ;;  %4796 = vrot.lane.b32.xlu0 %v4771_v12, %s10863_s21  ;;  %v8622_v14 = vadd.f32 %v8621_v41, %v8620_v19  ;;  %v7636_v6 = vld [vmem:[%s12926_s9 + $0x88] sm:$0x1]  ;;  %v4367_v41 = vmax.f32 %v12411_v49, 0.0  ;;  %v7643_v49 = vld [vmem:[%s12926_s9 + $0xa0] sm:$0xff] }
 0x698   : > { %v9152_v24 = vpop.f32.mrb[120].mxu1 }
 0x699   : > { %v4761_v32 = vpop.f32.mrb[121].mxu1 }
 0x69a   : > { %4181 = vperm.xlu1 %10366, %v4079_v5   ;;  %v7640_v5 = vld [vmem:[%s12926_s9 + $0x98] sm:$0x1] }
 0x6f4   : > { %v4779_v20 = vpop.permute.xlu0 %4778 }
 0x6f5   : > { %v4807_v40 = vsel %vm4806_vm6, %v4366_v10, %v4779_v20  ;;  %v7644_v20 = vld [vmem:[%s12926_s9 + $0xa8] sm:$0x1] }
 0x6f6   : > { %v10162_v10 = vpack.c.bf16 %v7644_v20, %v7643_v49  ;;  %v7699_v49 = vld [vmem:[%s12926_s9 + $0x180] sm:$0xff]  ;;  %v7700_v20 = vld [vmem:[%s12926_s9 + $0x188] sm:$0x1] }
 0x704   : > { %v4795_v50 = vpop.permute.xlu1 %4794 }
 0x705   : > { %v12458_v56 = vsel %vm4811_vm7, %v4807_v40, %v4795_v50  ;;  %v4177_v28 = vpop.permute.xlu0 %4176  ;;  %v7647_v40 = vld [vmem:[%s12926_s9 + $0xb0] sm:$0xff]  ;;  %v7648_v50 = vld [vmem:[%s12926_s9 + $0xb8] sm:$0x1] }
 0x706   : > { %v4273_v13 = vadd.f32 %v12413_v17, %v4177_v28  ;;  %v4475_v46 = vadd.f32 %v8567_v44, %v4177_v28  ;;  %9158 = vmatmul.mubr.msk.f32.vlgmr.msra.gmra.mrb[94].mxu0 %vm4819_vm8, %v12458_v56  ;;  %v4677_v38 = vadd.f32 %v8619_v55, %v4177_v28  ;;  %v7611_v17 = vld [vmem:[%s12926_s9 + $0x20] sm:$0xff]  ;;  %v4981_v36 = vrot.slane %v12458_v56, 2 }
 0x707   : > { %10128 = vmatpush3.bf16.msk.msra.mxu0 %vm12428_vm4, %v10126_v33  ;;  %9164 = vmatprep.mubr.msk.f32.mxu0 %vm10861_vm5, %v10862_v63  ;;  %v10130_v22 = vpack.c.bf16 %v7612_v52, %v7611_v17  ;;  %v5061_v47 = vrot.slane %v12458_v56, 3  ;;  %v5221_v53 = vrot.slane %v12458_v56, 5  ;;  %v5301_v16 = vrot.slane %v12458_v56, 6  ;;  %v7635_v55 = vld [vmem:[%s12926_s9 + $0x80] sm:$0xff]  ;;  %v7656_v17 = vld [vmem:[%s12926_s9 + $0xd8] sm:$0x1] }
 0x708   : > { %v12468_v54 = vadd.f32 %v12407_v61, %v4273_v13  ;;  %v4560_v51 = vadd.f32 %v12419_v11, %v4475_v46  ;;  %v4762_v62 = vadd.f32 %v4761_v32, %v4677_v38  ;;  %10129 = vmatprep.subr.bf16.mxu0 %v10858_v3  ;;  %v4901_v61 = vrot.slane %v12458_v56, 1  ;;  %v7615_v11 = vld [vmem:[%s12926_s9 + $0x30] sm:$0xff]  ;;  %v4781_v45 = vpop.permute.xlu1 %4780  ;;  %v7651_v13 = vld [vmem:[%s12926_s9 + $0xc0] sm:$0xff]  ;;  %v7652_v46 = vld [vmem:[%s12926_s9 + $0xc8] sm:$0x1] }
 0x709   : > { %v10134_v7 = vpack.c.bf16 %v7616_v8, %v7615_v11  ;;  %v10154_v12 = vpack.c.bf16 %v7636_v6, %v7635_v55  ;;  %v5381_v19 = vrot.slane %v12458_v56, 7  ;;  %v4797_v32 = vpop.permute.xlu0 %4796  ;;  %v10170_v38 = vpack.c.bf16 %v7652_v46, %v7651_v13  ;;  %v7663_v8 = vld [vmem:[%s12926_s9 + $0xf0] sm:$0xff]  ;;  %v7688_v55 = vld [vmem:[%s12926_s9 + $0x158] sm:$0x1] }
 0x70a   : > { %v4570_v23 = vmax.f32 %v4560_v51, 0.0  ;;  %v4772_v18 = vmax.f32 %v4762_v62, 0.0  ;;  %v7655_v62 = vld [vmem:[%s12926_s9 + $0xd0] sm:$0xff] }
 0x70b   : > { %v10174_v52 = vpack.c.bf16 %v7656_v17, %v7655_v62  ;;  %v7708_v62 = vld [vmem:[%s12926_s9 + $0x1a8] sm:$0x1] }
 0x70c   : > { %4798 = vrot.lane.b32.xlu1 %v4772_v18, %s10863_s21  ;;  %4782 = vrot.lane.b32.xlu0 %v4570_v23, %s10860_s0  ;;  %v7659_v18 = vld [vmem:[%s12926_s9 + $0xe0] sm:$0xff] }
 0x70e   : > { %9165 = vmatmul.mubr.msk.f32.vlgmr.msra.gmra.mrb[94].mxu0 %vm4819_vm8, %v4901_v61 }
 0x70f   : > { %10132 = vmatpush3.bf16.msk.msra.mxu0 %vm12428_vm4, %v10130_v22  ;;  %9171 = vmatprep.mubr.msk.f32.mxu0 %vm10861_vm5, %v10862_v63  ;;  %v7660_v22 = vld [vmem:[%s12926_s9 + $0xe8] sm:$0x1] }
 0x710   : > { %10133 = vmatprep.subr.bf16.mxu0 %v10858_v3  ;;  %v10178_v61 = vpack.c.bf16 %v7660_v22, %v7659_v18  ;;  %v7712_v18 = vld [vmem:[%s12926_s9 + $0x1b8] sm:$0x1] }
 0x716   : > { %9172 = vmatmul.mubr.msk.f32.vlgmr.msra.gmra.mrb[94].mxu0 %vm4819_vm8, %v4981_v36 }
 0x717   : > { %10136 = vmatpush3.bf16.msk.msra.mxu0 %vm12428_vm4, %v10134_v7  ;;  %9178 = vmatprep.mubr.msk.f32.mxu0 %vm10861_vm5, %v10862_v63  ;;  %v7664_v7 = vld [vmem:[%s12926_s9 + $0xf8] sm:$0x1] }
 0x718   : > { %10137 = vmatprep.subr.bf16.mxu0 %v10858_v3  ;;  %v10182_v36 = vpack.c.bf16 %v7664_v7, %v7663_v8  ;;  %v7716_v8 = vld [vmem:[%s12926_s9 + $0x1c8] sm:$0x1] }
 0x719   : > { %v4182_v44 = vpop.permute.xlu1 %4181 }
 0x71a   : > { %v4278_v21 = vadd.f32 %v12415_v29, %v4182_v44  ;;  %v4480_v58 = vadd.f32 %v12439_v30, %v4182_v44  ;;  %v4682_v60 = vadd.f32 %v8622_v14, %v4182_v44  ;;  %v7624_v29 = vld [vmem:[%s12926_s9 + $0x58] sm:$0x1]  ;;  %v5141_v30 = vrot.slane %v12458_v56, 4  ;;  %v7639_v14 = vld [vmem:[%s12926_s9 + $0x90] sm:$0xff] }
 0x71b   : > { %v10158_v27 = vpack.c.bf16 %v7640_v5, %v7639_v14  ;;  %v10166_v56 = vpack.c.bf16 %v7648_v50, %v7647_v40  ;;  %v10186_v44 = vpack.c.bf16 %v7668_v43, %v7667_v26  ;;  %v7720_v26 = vld [vmem:[%s12926_s9 + $0x1d8] sm:$0x1] }
 0x71c   : > { %v12509_v59 = vadd.f32 %v12405_v35, %v4278_v21  ;;  %v4565_v4 = vadd.f32 %v12417_v39, %v4480_v58  ;;  %v4767_v0 = vadd.f32 %v9152_v24, %v4682_v60  ;;  %v7623_v35 = vld [vmem:[%s12926_s9 + $0x50] sm:$0xff]  ;;  %v4808_v24 = vsel %vm4806_vm6, %v4367_v41, %v4781_v45  ;;  %v7692_v41 = vld [vmem:[%s12926_s9 + $0x168] sm:$0x1] }
 0x71d   : > { %v10142_v39 = vpack.c.bf16 %v7624_v29, %v7623_v35  ;;  %v4813_v31 = vsel %vm4811_vm7, %v4808_v24, %v4797_v32  ;;  %v4368_v60 = vmax.f32 %v12468_v54, 0.0  ;;  %v7675_v54 = vld [vmem:[%s12926_s9 + $0x120] sm:$0xff]  ;;  %v7676_v35 = vld [vmem:[%s12926_s9 + $0x128] sm:$0x1]  ;;  %v7695_v24 = vld [vmem:[%s12926_s9 + $0x170] sm:$0xff] }
 0x71e   : > { %v4571_v15 = vmax.f32 %v4565_v4, 0.0  ;;  %v4773_v34 = vmax.f32 %v4767_v0, 0.0  ;;  %9179 = vmatmul.mubr.msk.f32.vlgmr.msra.gmra.mrb[94].mxu0 %vm4819_vm8, %v5061_v47  ;;  %v5541_v33 = vrot.slane %v4813_v31, 1  ;;  %v5621_v28 = vrot.slane %v4813_v31, 2  ;;  %v7672_v4 = vld [vmem:[%s12926_s9 + $0x118] sm:$0x1] }
 0x71f   : > { %10140 = vmatpush3.bf16.msk.msra.mxu0 %vm12428_vm4, %v10138_v42  ;;  %9185 = vmatprep.mubr.msk.f32.mxu0 %vm10861_vm5, %v10862_v63  ;;  %v5701_v51 = vrot.slane %v4813_v31, 3  ;;  %v5781_v23 = vrot.slane %v4813_v31, 4  ;;  %v5861_v11 = vrot.slane %v4813_v31, 5  ;;  %v5941_v45 = vrot.slane %v4813_v31, 6  ;;  %v7671_v42 = vld [vmem:[%s12926_s9 + $0x110] sm:$0xff] }
 0x720   : > { %4800 = vrot.lane.b32.xlu1 %v4773_v34, %s10863_s21  ;;  %4784 = vrot.lane.b32.xlu0 %v4571_v15, %s10860_s0  ;;  %v6021_v21 = vrot.slane %v4813_v31, 7  ;;  %v10190_v15 = vpack.c.bf16 %v7672_v4, %v7671_v42  ;;  %v10194_v29 = vpack.c.bf16 %v7676_v35, %v7675_v54  ;;  %v7696_v32 = vld [vmem:[%s12926_s9 + $0x178] sm:$0x1]  ;;  %v4369_v50 = vmax.f32 %v12509_v59, 0.0  ;;  %v7707_v59 = vld [vmem:[%s12926_s9 + $0x1a0] sm:$0xff]  ;;  %s431_s0 = sand.u32 1, %s10845_s26  }
 0x721   : > { %10141 = vmatprep.subr.bf16.mxu0 %v10858_v3  ;;  %v10226_v17 = vpack.c.bf16 %v7708_v62, %v7707_v59  ;;  %v7727_v4 = vld [vmem:[%s12926_s9 + $0x1f0] sm:$0xff]  ;;  %s7731_s21 = sshll.u32 %s10956_s29, 4  ;;  %s432_s17 = scalar_lea.vmem [#allocation2], %s431_s0 }
 0x722   : > { %s7412_s20 = sshll.u32 %s432_s17, 4  ;;  %s12874_s1 = scalar_lea.hbm %s12930_s13, %s7731_s21  ;;  %s12876_s20 = int_to_ptr.vmem [resolvable:$true] %s7412_s20 }
 0x723   : > { %s7400_s30 = scalar_lea.sflag [#allocation3], %s431_s0  ;;  %s10791_s24 = scalar_lea.vmem %s12876_s20, 16 }
 0x724   : > { %p10792_p11 = scmp.ne.s32.totalorder %s12876_s20, %s10791_s24  ;;  %s10864_s29 = smov [#allocation2]  }
 0x725   : > { %s10795_s15 = sshll.u32 %s10864_s29, 4  ;;  %s10796_s15 = int_to_ptr.vmem [resolvable:$false] %s10795_s15 }
 0x726   : > { %9186 = vmatmul.mubr.msk.f32.vlgmr.msra.gmra.mrb[94].mxu0 %vm4819_vm8, %v5141_v30  ;;  %v7679_v30 = vld [vmem:[%s12926_s9 + $0x130] sm:$0xff]  ;;  %p10793_p12 = pnand %p10792_p11, %p10973_p5  ;;  %s10797_s16 = scalar_lea.vmem %s10796_s15, 32 }
 0x727   : > { %10144 = vmatpush3.bf16.msk.msra.mxu0 %vm12428_vm4, %v10142_v39  ;;  %9192 = vmatprep.mubr.msk.f32.mxu0 %vm10861_vm5, %v10862_v63  ;;  %v10198_v37 = vpack.c.bf16 %v7680_v9, %v7679_v30  ;;  %p10798_p0 = scmp.lt.s32.totalorder %s12876_s20, %s10796_s15  ;;  %p10799_p1 = scmp.lt.s32.totalorder %s10797_s16, %s10791_s24 }
 0x728   : > { %10145 = vmatprep.subr.bf16.mxu0 %v10858_v3  ;;  %p10794_p13 = pneg %p10793_p12 }
 0x729   : > { %p10800_p2 = por %p10799_p1, %p10798_p0 }
 0x72b   : > { %p10801_p3 = pnand %p10800_p2, %p10794_p13 }
 0x72e   : > { %9193 = vmatmul.mubr.msk.f32.vlgmr.msra.gmra.mrb[94].mxu0 %vm4819_vm8, %v5221_v53  ;;  %v7683_v53 = vld [vmem:[%s12926_s9 + $0x140] sm:$0xff] }
 0x72f   : > { %10148 = vmatpush3.bf16.msk.msra.mxu0 %vm12428_vm4, %v10146_v25  ;;  %9199 = vmatprep.mubr.msk.f32.mxu0 %vm10861_vm5, %v10862_v63  ;;  %v10202_v1 = vpack.c.bf16 %v7684_v57, %v7683_v53 }
 0x730   : > { %10149 = vmatprep.subr.bf16.mxu0 %v10858_v3 }
 0x736   : > { %9200 = vmatmul.mubr.msk.f32.vlgmr.msra.gmra.mrb[94].mxu0 %vm4819_vm8, %v5301_v16  ;;  %v7687_v16 = vld [vmem:[%s12926_s9 + $0x150] sm:$0xff] }
 0x737   : > { %10152 = vmatpush3.bf16.msk.msra.mxu0 %vm12428_vm4, %v10150_v48  ;;  %9206 = vmatprep.mubr.msk.f32.mxu0 %vm10861_vm5, %v10862_v63  ;;  %v10206_v6 = vpack.c.bf16 %v7688_v55, %v7687_v16  ;;  %v7395_v55 = vld [vmem:[%s12929_s12] sm:$0x1] }
 0x738   : > { %10153 = vmatprep.subr.bf16.mxu0 %v10858_v3 }
 0x73e   : > { %9207 = vmatmul.mubr.msk.f32.vlgmr.msra.gmra.mrb[94].mxu0 %vm4819_vm8, %v5381_v19  ;;  %v7691_v19 = vld [vmem:[%s12926_s9 + $0x160] sm:$0xff] }
 0x73f   : > { %10156 = vmatpush3.bf16.msk.msra.mxu0 %vm12428_vm4, %v10154_v12  ;;  %9213 = vmatprep.mubr.msk.f32.mxu0 %vm10861_vm5, %v10862_v63  ;;  %v10210_v14 = vpack.c.bf16 %v7692_v41, %v7691_v19 }
 0x740   : > { %10157 = vmatprep.subr.bf16.mxu0 %v10858_v3 }
 0x746   : > { %9214 = vmatmul.mubr.msk.f32.vlgmr.msra.gmra.mrb[94].mxu0 %vm4819_vm8, %v4813_v31 }
 0x747   : > { %10160 = vmatpush3.bf16.msk.msra.mxu0 %vm12428_vm4, %v10158_v27  ;;  %9220 = vmatprep.mubr.msk.f32.mxu0 %vm10861_vm5, %v10862_v63  ;;  %v10214_v27 = vpack.c.bf16 %v7696_v32, %v7695_v24 }
 0x748   : > { %10161 = vmatprep.subr.bf16.mxu0 %v10858_v3 }
 0x74e   : > { %9221 = vmatmul.mubr.msk.f32.vlgmr.msra.gmra.mrb[94].mxu0 %vm4819_vm8, %v5541_v33 }
 0x74f   : > { %10164 = vmatpush3.bf16.msk.msra.mxu0 %vm12428_vm4, %v10162_v10  ;;  %9227 = vmatprep.mubr.msk.f32.mxu0 %vm10861_vm5, %v10862_v63  ;;  %v10218_v10 = vpack.c.bf16 %v7700_v20, %v7699_v49 }
 0x750   : > { %10165 = vmatprep.subr.bf16.mxu0 %v10858_v3 }
 0x756   : > { %9228 = vmatmul.mubr.msk.f32.vlgmr.msra.gmra.mrb[94].mxu0 %vm4819_vm8, %v5621_v28  ;;  %v7704_v28 = vld [vmem:[%s12926_s9 + $0x198] sm:$0x1] }
 0x757   : > { %10168 = vmatpush3.bf16.msk.msra.mxu0 %vm12428_vm4, %v10166_v56  ;;  %9234 = vmatprep.mubr.msk.f32.mxu0 %vm10861_vm5, %v10862_v63  ;;  %v7703_v56 = vld [vmem:[%s12926_s9 + $0x190] sm:$0xff] }
 0x758   : > { %10169 = vmatprep.subr.bf16.mxu0 %v10858_v3 }
 0x75e   : > { %9235 = vmatmul.mubr.msk.f32.vlgmr.msra.gmra.mrb[94].mxu0 %vm4819_vm8, %v5701_v51 }
 0x75f   : > { %10172 = vmatpush3.bf16.msk.msra.mxu0 %vm12428_vm4, %v10170_v38  ;;  %9241 = vmatprep.mubr.msk.f32.mxu0 %vm10861_vm5, %v10862_v63  ;;  %v10222_v38 = vpack.c.bf16 %v7704_v28, %v7703_v56 }
 0x760   : > { %10173 = vmatprep.subr.bf16.mxu0 %v10858_v3 }
 0x766   : > { %9242 = vmatmul.mubr.msk.f32.vlgmr.msra.gmra.mrb[94].mxu0 %vm4819_vm8, %v5781_v23  ;;  %v7711_v23 = vld [vmem:[%s12926_s9 + $0x1b0] sm:$0xff] }
 0x767   : > { %10176 = vmatpush3.bf16.msk.msra.mxu0 %vm12428_vm4, %v10174_v52  ;;  %9248 = vmatprep.mubr.msk.f32.mxu0 %vm10861_vm5, %v10862_v63  ;;  %v10230_v22 = vpack.c.bf16 %v7712_v18, %v7711_v23 }
 0x768   : > { %10177 = vmatprep.subr.bf16.mxu0 %v10858_v3 }
 0x76e   : > { %9249 = vmatmul.mubr.msk.f32.vlgmr.msra.gmra.mrb[94].mxu0 %vm4819_vm8, %v5861_v11  ;;  %v7715_v11 = vld [vmem:[%s12926_s9 + $0x1c0] sm:$0xff] }
 0x76f   : > { %10180 = vmatpush3.bf16.msk.msra.mxu0 %vm12428_vm4, %v10178_v61  ;;  %9255 = vmatprep.mubr.msk.f32.mxu0 %vm10861_vm5, %v10862_v63  ;;  %v10234_v7 = vpack.c.bf16 %v7716_v8, %v7715_v11 }
 0x770   : > { %10181 = vmatprep.subr.bf16.mxu0 %v10858_v3 }
 0x776   : > { %9256 = vmatmul.mubr.msk.f32.vlgmr.msra.gmra.mrb[94].mxu0 %vm4819_vm8, %v5941_v45  ;;  %v7719_v45 = vld [vmem:[%s12926_s9 + $0x1d0] sm:$0xff] }
 0x777   : > { %10184 = vmatpush3.bf16.msk.msra.mxu0 %vm12428_vm4, %v10182_v36  ;;  %9262 = vmatprep.mubr.msk.f32.mxu0 %vm10861_vm5, %v10862_v63  ;;  %v10238_v43 = vpack.c.bf16 %v7720_v26, %v7719_v45 }
 0x778   : > { %10185 = vmatprep.subr.bf16.mxu0 %v10858_v3 }
 0x77e   : > { %9263 = vmatmul.mubr.msk.f32.vlgmr.msra.gmra.mrb[94].mxu0 %vm4819_vm8, %v6021_v21  ;;  %v4783_v58 = vpop.permute.xlu0 %4782  ;;  %v4799_v0 = vpop.permute.xlu1 %4798  ;;  %v7723_v21 = vld [vmem:[%s12926_s9 + $0x1e0] sm:$0xff] }
 0x77f   : > { %10188 = vmatpush3.bf16.msk.msra.mxu0 %vm12428_vm4, %v10186_v44  ;;  %9269 = vmatprep.mubr.msk.f32.mxu0 %vm10861_vm5, %v10862_v63  ;;  %v4809_v47 = vsel %vm4806_vm6, %v4368_v60, %v4783_v58  ;;  %v7724_v58 = vld [vmem:[%s12926_s9 + $0x1e8] sm:$0x1] }
 0x780   : > { %10189 = vmatprep.subr.bf16.mxu0 %v10858_v3  ;;  %v4814_v34 = vsel %vm4811_vm7, %v4809_v47, %v4799_v0  ;;  %v10242_v60 = vpack.c.bf16 %v7724_v58, %v7723_v21  ;;  %v7728_v0 = vld [vmem:[%s12926_s9 + $0x1f8] sm:$0x1] }
 0x781   : > { %v6181_v39 = vrot.slane %v4814_v34, 1  ;;  %v6261_v25 = vrot.slane %v4814_v34, 2  ;;  %v6341_v48 = vrot.slane %v4814_v34, 3  ;;  %v6421_v12 = vrot.slane %v4814_v34, 4 }
 0x782   : > { %v6501_v5 = vrot.slane %v4814_v34, 5  ;;  %v6581_v31 = vrot.slane %v4814_v34, 6  ;;  %v6661_v33 = vrot.slane %v4814_v34, 7  ;;  %v10246_v47 = vpack.c.bf16 %v7728_v0, %v7727_v4 }
 0x786   : > { %9270 = vmatmul.mubr.msk.f32.vlgmr.msra.gmra.mrb[94].mxu0 %vm4819_vm8, %v4814_v34 }
 0x787   : > { %10192 = vmatpush3.bf16.msk.msra.mxu0 %vm12428_vm4, %v10190_v15  ;;  %9276 = vmatprep.mubr.msk.f32.mxu0 %vm10861_vm5, %v10862_v63 }
 0x788   : > { %10193 = vmatprep.subr.bf16.mxu0 %v10858_v3 }
 0x78e   : > { %9277 = vmatmul.mubr.msk.f32.vlgmr.msra.gmra.mrb[94].mxu0 %vm4819_vm8, %v6181_v39 }
 0x78f   : > { %10196 = vmatpush3.bf16.msk.msra.mxu0 %vm12428_vm4, %v10194_v29  ;;  %9283 = vmatprep.mubr.msk.f32.mxu0 %vm10861_vm5, %v10862_v63 }
 0x790   : > { %10197 = vmatprep.subr.bf16.mxu0 %v10858_v3 }
 0x792   : > { %v4785_v40 = vpop.permute.xlu0 %4784  ;;  %v4801_v13 = vpop.permute.xlu1 %4800 }
 0x793   : > { %v4810_v46 = vsel %vm4806_vm6, %v4369_v50, %v4785_v40 }
 0x794   : > { %v4815_v51 = vsel %vm4811_vm7, %v4810_v46, %v4801_v13 }
 0x795   : > { %v6821_v52 = vrot.slane %v4815_v51, 1  ;;  %v6901_v61 = vrot.slane %v4815_v51, 2  ;;  %v6981_v36 = vrot.slane %v4815_v51, 3  ;;  %v7061_v44 = vrot.slane %v4815_v51, 4 }
 0x796   : > { %9284 = vmatmul.mubr.msk.f32.vlgmr.msra.gmra.mrb[94].mxu0 %vm4819_vm8, %v6261_v25  ;;  %v7141_v42 = vrot.slane %v4815_v51, 5  ;;  %v7221_v15 = vrot.slane %v4815_v51, 6  ;;  %v7301_v34 = vrot.slane %v4815_v51, 7 }
 0x797   : > { %10200 = vmatpush3.bf16.msk.msra.mxu0 %vm12428_vm4, %v10198_v37  ;;  %9290 = vmatprep.mubr.msk.f32.mxu0 %vm10861_vm5, %v10862_v63 }
 0x798   : > { %10201 = vmatprep.subr.bf16.mxu0 %v10858_v3 }
 0x79e   : > { %9291 = vmatmul.mubr.msk.f32.vlgmr.msra.gmra.mrb[94].mxu0 %vm4819_vm8, %v6341_v48  ;;  %v7393_v48 = vld [vmem:[%s12928_s11] sm:$0x1] }
 0x79f   : > { %10204 = vmatpush3.bf16.msk.msra.mxu0 %vm12428_vm4, %v10202_v1  ;;  %9297 = vmatprep.mubr.msk.f32.mxu0 %vm10861_vm5, %v10862_v63 }
 0x7a0   : > { %10205 = vmatprep.subr.bf16.mxu0 %v10858_v3 }
 0x7a6   : > { %9298 = vmatmul.mubr.msk.f32.vlgmr.msra.gmra.mrb[94].mxu0 %vm4819_vm8, %v6421_v12 }
 0x7a7   : > { %10208 = vmatpush3.bf16.msk.msra.mxu0 %vm12428_vm4, %v10206_v6  ;;  %9304 = vmatprep.mubr.msk.f32.mxu0 %vm10861_vm5, %v10862_v63 }
 0x7a8   : > { %10209 = vmatprep.subr.bf16.mxu0 %v10858_v3 }
 0x7ae   : > { %9305 = vmatmul.mubr.msk.f32.vlgmr.msra.gmra.mrb[94].mxu0 %vm4819_vm8, %v6501_v5 }
 0x7af   : > { %10212 = vmatpush3.bf16.msk.msra.mxu0 %vm12428_vm4, %v10210_v14  ;;  %9311 = vmatprep.mubr.msk.f32.mxu0 %vm10861_vm5, %v10862_v63 }
 0x7b0   : > { %10213 = vmatprep.subr.bf16.mxu0 %v10858_v3 }
 0x7b6   : > { %9312 = vmatmul.mubr.msk.f32.vlgmr.msra.gmra.mrb[94].mxu0 %vm4819_vm8, %v6581_v31 }
 0x7b7   : > { %10216 = vmatpush3.bf16.msk.msra.mxu0 %vm12428_vm4, %v10214_v27  ;;  %9318 = vmatprep.mubr.msk.f32.mxu0 %vm10861_vm5, %v10862_v63 }
 0x7b8   : > { %10217 = vmatprep.subr.bf16.mxu0 %v10858_v3 }
 0x7be   : > { %9319 = vmatmul.mubr.msk.f32.vlgmr.msra.gmra.mrb[94].mxu0 %vm4819_vm8, %v6661_v33 }
 0x7bf   : > { %10220 = vmatpush3.bf16.msk.msra.mxu0 %vm12428_vm4, %v10218_v10  ;;  %9325 = vmatprep.mubr.msk.f32.mxu0 %vm10861_vm5, %v10862_v63 }
 0x7c0   : > { %10221 = vmatprep.subr.bf16.mxu0 %v10858_v3 }
 0x7c6   : > { %9326 = vmatmul.mubr.msk.f32.vlgmr.msra.gmra.mrb[94].mxu0 %vm4819_vm8, %v4815_v51 }
 0x7c7   : > { %10224 = vmatpush3.bf16.msk.msra.mxu0 %vm12428_vm4, %v10222_v38  ;;  %9332 = vmatprep.mubr.msk.f32.mxu0 %vm10861_vm5, %v10862_v63 }
 0x7c8   : > { %10225 = vmatprep.subr.bf16.mxu0 %v10858_v3 }
 0x7ce   : > { %9333 = vmatmul.mubr.msk.f32.vlgmr.msra.gmra.mrb[94].mxu0 %vm4819_vm8, %v6821_v52 }
 0x7cf   : > { %10228 = vmatpush3.bf16.msk.msra.mxu0 %vm12428_vm4, %v10226_v17  ;;  %9339 = vmatprep.mubr.msk.f32.mxu0 %vm10861_vm5, %v10862_v63 }
 0x7d0   : > { %10229 = vmatprep.subr.bf16.mxu0 %v10858_v3 }
 0x7d6   : > { %9340 = vmatmul.mubr.msk.f32.vlgmr.msra.gmra.mrb[94].mxu0 %vm4819_vm8, %v6901_v61 }
 0x7d7   : > { %10232 = vmatpush3.bf16.msk.msra.mxu0 %vm12428_vm4, %v10230_v22  ;;  %9346 = vmatprep.mubr.msk.f32.mxu0 %vm10861_vm5, %v10862_v63 }
 0x7d8   : > { %10233 = vmatprep.subr.bf16.mxu0 %v10858_v3 }
 0x7de   : > { %9347 = vmatmul.mubr.msk.f32.vlgmr.msra.gmra.mrb[94].mxu0 %vm4819_vm8, %v6981_v36 }
 0x7df   : > { %10236 = vmatpush3.bf16.msk.msra.mxu0 %vm12428_vm4, %v10234_v7  ;;  %9353 = vmatprep.mubr.msk.f32.mxu0 %vm10861_vm5, %v10862_v63 }
 0x7e0   : > { %10237 = vmatprep.subr.bf16.mxu0 %v10858_v3 }
 0x7e6   : > { %9354 = vmatmul.mubr.msk.f32.vlgmr.msra.gmra.mrb[94].mxu0 %vm4819_vm8, %v7061_v44 }
 0x7e7   : > { %10240 = vmatpush3.bf16.msk.msra.mxu0 %vm12428_vm4, %v10238_v43  ;;  %9360 = vmatprep.mubr.msk.f32.mxu0 %vm10861_vm5, %v10862_v63 }
 0x7e8   : > { %10241 = vmatprep.subr.bf16.mxu0 %v10858_v3 }
 0x7ee   : > { %9361 = vmatmul.mubr.msk.f32.vlgmr.msra.gmra.mrb[94].mxu0 %vm4819_vm8, %v7141_v42 }
 0x7ef   : > { %10244 = vmatpush3.bf16.msk.msra.mxu0 %vm12428_vm4, %v10242_v60  ;;  %9367 = vmatprep.mubr.msk.f32.mxu0 %vm10861_vm5, %v10862_v63 }
 0x7f0   : > { %10245 = vmatprep.subr.bf16.mxu0 %v10858_v3  ;;  %v4816_v3 = vld [vmem:[%s12927_s10] sm:$0x1] }
 0x7f6   : > { %9368 = vmatmul.mubr.msk.f32.vlgmr.msra.gmra.mrb[94].mxu0 %vm4819_vm8, %v7221_v15 }
 0x7f7   : > { %10248 = vmatpush3.bf16.msk.msra.mxu0 %vm12428_vm4, %v10246_v47  ;;  %9374 = vmatprep.mubr.msk.f32.mxu0 %vm10861_vm5, %v10862_v63 }
 0x7fe   : > { %9375 = vmatmul.mubr.msk.f32.vlgmr.msra.gmra.mrb[94].mxu0 %vm4819_vm8, %v7301_v34 }
 0x8d1   : > { %v7373_v54 = vpop.f32.mrb[94].mxu0 }
 0x8d2   : > { %v10253_v35 = vadd.f32 %v7373_v54, %v4816_v3  ;;  %v9376_v29 = vpop.f32.mrb[95].mxu0 }
 0x8d4   : > { %v7379_v39 = vsel %vm7378_vm9, %v10253_v35, 0.0 }
 0x8d5   : > { %7380 = vadd.xlane.f32.xlu0 %v7379_v39 }
 0x962   : > { %v7381_v30 = vpop.xlane.xlu0 %7380 }
 0x963   : > { %v7383_v2 = vmul.f32 0.03125, %v7381_v30 }
 0x965   : > { %v7384_v9 = vsub.f32 %v10253_v35, %v7383_v2 }
 0x967   : > { %v7385_v63 = vmul.f32 %v7384_v9, %v7384_v9 }
 0x969   : > { %v7386_v37 = vsel %vm7378_vm9, %v7385_v63, 0.0 }
 0x96a   : > { %7387 = vadd.xlane.f32.xlu1 %v7386_v37 }
 0x9f7   : > { %v7388_v25 = vpop.xlane.xlu1 %7387 }
 0x9f8   : > { %v7389_v53 = vmul.f32 0.03125, %v7388_v25 }
 0x9fa   : > { %v7390_v57 = vadd.f32 1e-05, %v7389_v53 }
 0x9fc   : > { %10787 = vrsqrt.f32 %v7390_v57 }
 0xa06   : > { %v10788_v1 = vpop.eup %10787 }
 0xa07   : > { %v7392_v16 = vmul.f32 %v10788_v1, %v7384_v9 }
 0xa09   : > { %v7394_v6 = vmul.f32 %v7393_v48, %v7392_v16 }
 0xa0b   : > { %v7396_v12 = vadd.f32 %v7395_v55, %v7394_v6 }
 0xa0d   : > { %10789 = vtanh.f32 %v7396_v12 }
 0xa17   : > { %v10790_v19 = vpop.eup %10789 }
 0xa18   : > { %7398 = vst.msk [vmem:[%s432_s17] sm:$0x1] %vm7378_vm9, %v10790_v19 }
 0xa19   : > { %10804 = shalt.err (!%p10801_p3)
}
 0xa1a   : > { %s10805_s0 = scalar_lea.hbm %s12874_s1, 16  ;;  %s10809_s22 = scalar_lea.hbm %s12930_s13, 32 }
 0xa1b   : > { %p10806_p4 = scmp.ne.s32.totalorder %s12874_s1, %s10805_s0  ;;  %p10810_p9 = scmp.lt.u32.totalorder %s12874_s1, %s12930_s13 }
 0xa1c   : > { %p10811_p10 = scmp.lt.u32.totalorder %s10809_s22, %s10805_s0  ;;  %p10813_p12 = scmp.lt.u32.totalorder %s10805_s0, %s12874_s1 }
 0xa1d   : > { %p10807_p7 = pnand %p10806_p4, %p10973_p5 }
 0xa1e   : > { %p10812_p11 = por %p10811_p10, %p10810_p9 }
 0xa1f   : > { %p10808_p8 = pneg %p10807_p7 }
 0xa20   : > { %p10814_p13 = por %p10813_p12, %p10812_p11 }
 0xa22   : > { %p10815_p0 = pnand %p10814_p13, %p10808_p8 }
 0xa24   : > { %10818 = shalt.err (!%p10815_p0)
}
 0xa25   : > { %10317 = dma.vmem_to_hbm [thread:$0]  (%p10973_p5), %s12876_s20, 16, %s12874_s1, %s7400_s30  }
 0xa26 PF: > { %p10323_p1 = scmp.ge.s32.totalorder %s10853_s28, 2  ;;  %s7424_s24 = sand.u32 1, %s10841_s25  }
 0xa27   : > { %s7425_s15 = scalar_lea.sflag [#allocation3], %s7424_s24 }
 0xa28   : > { %p10320_p2 = pnand %p10323_p1, %p10977_p6 }
 0xa2a   : > { %10836 = dma.done.wait (!%p10320_p2), %s7425_s15, 16  }
 0xa2b   : > { %10838 = vsyncadd (!%p10320_p2), %s7425_s15, 4294967280  ;;  %s12940_s16 = sld [smem:[#allocation5_spill]]  ;;  %p23_p3 = scmp.ge.s32.totalorder %s10960_s14, 4  }
 0xa2c   : > { %s12941_s25 = smov %s10845_s26  ;;  %s12942_s26 = smov %s10849_s27 }
 0xa2d   : > { %s12944_s28 = smov %s10960_s14  ;;  %25 = sbr.rel (!%p23_p3) target bundleno = 6 (0x6), region = 175 }
 0xa31   : > { %s12943_s27 = smov %s12940_s16 }
 0xa34   :  { %7429 = vsyncpa [#allocation3], 1 }
 0xa35   :  { %7431 = vsyncpa [#allocation3 + $0x1], 1 }

</bundles_post_ra>
